<compile_context>
chip_gen: v5e
topology: v5e:2x2
jax: 0.10.0
libtpu: 0.0.40
codegen_flags: <defaults>
</compile_context>

<pallas_src>
import numpy as np
import jax
import jax.numpy as jnp
from jax.experimental import pallas as pl
from jax.experimental.pallas import tpu as pltpu


# ---------------------------------------------------------------------------
# Pallas kernel: one grid step == one block of TB time steps.
#   gx_ref    : (TB, NB, 4*Hp) bf16  precomputed gate pre-activations (Wx + b)
#   u_ref     : (Hp, 4*Hp)     bf16  fused recurrent weight [Uf | Ui | Uo | Uc]
#   h_out_ref : (TB, NB, Hp)   bf16  hidden state for every step (lane-dense)
#   h_sc/c_sc : (NB, Hp)       f32   carries across time blocks
# ---------------------------------------------------------------------------
def qlstm_recurrent_kernel(gx_ref, u_ref, h_out_ref, h_sc, c_sc):
    # grid = (batch_blocks [parallel], time_blocks [arbitrary/sequential]).
    # Re-initialize the carry at the start of every batch block's time sweep.
    @pl.when(pl.program_id(1) == 0)
    def _():
        h_sc[...] = jnp.zeros_like(h_sc)
        c_sc[...] = jnp.zeros_like(c_sc)

    hp = h_sc.shape[-1]
    tb = gx_ref.shape[0]

    def step(i, carry):
        h, c = carry                                    # f32 carries
        # One bf16 MXU matmul per time step, f32 accumulate.
        z = gx_ref[i].astype(jnp.float32) + jnp.dot(
            h.astype(jnp.bfloat16), u_ref[...],
            preferred_element_type=jnp.float32)
        # Lane-aligned static slices (Hp is a multiple of 128 -> no relayout).
        ft = jax.nn.sigmoid(z[:, 0 * hp:1 * hp])
        it = jax.nn.sigmoid(z[:, 1 * hp:2 * hp])
        ot = jax.nn.sigmoid(z[:, 2 * hp:3 * hp])
        at = z[:, 3 * hp:4 * hp]
        c = it * jnp.tanh(at) + ft * c
        h = ot * jnp.tanh(c)
        h_out_ref[i] = h.astype(h_out_ref.dtype)
        return (h, c)

    # Partial unroll: keeps LLO scheduling visibility without the instruction /
    # vreg-live-range blowup of fully unrolling a large time block.
    h, c = jax.lax.fori_loop(0, tb, step, (h_sc[...], c_sc[...]),
                             unroll=min(8, tb))
    h_sc[...] = h
    c_sc[...] = c


# ---------------------------------------------------------------------------
# Wrapper: hoisted (pre-padded) projections + pallas recurrence + output head.
# ---------------------------------------------------------------------------
def qlstm_forward(x, params, *, time_block=32, batch_block=None):
    T, N, F = x.shape
    H = params["uf"].shape[0]
    C = params["wfco"].shape[1]
    f32, bf16 = jnp.float32, jnp.bfloat16

    LANE, SUBLANE = 128, 8
    Hp = pl.cdiv(H, LANE) * LANE                 # lane-dense hidden width
    Np = pl.cdiv(N, SUBLANE) * SUBLANE           # full sublane utilization
    TB = min(time_block, T)
    Tp = pl.cdiv(T, TB) * TB

    # Batch block: fill MXU rows when batch is big, and split >=2 ways whenever
    # possible so both TensorCores are used on v7x megacore.
    if batch_block is None:
        if Np >= 512:
            NB = 256
        elif Np % 16 == 0:
            NB = Np // 2
        else:
            NB = Np
    else:
        NB = batch_block
    assert Np % NB == 0 and NB % SUBLANE == 0

    # ---- hoisted + fused input projections: ONE big matmul on PRE-PADDED ----
    # ---- weights/bias/x so gx is born padded (no full-gx jnp.pad pass).  ----
    def pad_cols(w):                              # (A, H) -> (A, Hp), zero cols
        return jnp.pad(w, ((0, 0), (0, Hp - H)))

    w_in = jnp.concatenate(
        [pad_cols(params["wf"]), pad_cols(params["wi"]),
         pad_cols(params["wo"]), pad_cols(params["wc"])], axis=1)      # (F, 4*Hp)
    b_in = jnp.concatenate(
        [pad_cols(params["bf"]), pad_cols(params["bi"]),
         pad_cols(params["bo"]), pad_cols(params["bc"])], axis=1)      # (1, 4*Hp)
    x_p = jnp.pad(x.astype(f32), ((0, Tp - T), (0, Np - N), (0, 0)))
    gx = (x_p.reshape(Tp * Np, F) @ w_in + b_in).astype(bf16)
    gx = gx.reshape(Tp, Np, 4 * Hp)
    # Padded hidden columns have zero weight/bias -> zero pre-activation; padded
    # rows of U are zero, so padding never leaks into real outputs.  Padded
    # batch rows / trailing time steps are stripped after the call.

    # ---- fused recurrent weight, zero-padded to (Hp, 4*Hp), bf16 for MXU ----
    def pad_u(u):
        return jnp.pad(u, ((0, Hp - H), (0, Hp - H)))

    u_fused = jnp.concatenate(
        [pad_u(params["uf"]), pad_u(params["ui"]),
         pad_u(params["uo"]), pad_u(params["uc"])], axis=1).astype(bf16)  # (Hp, 4*Hp)

    grid = (Np // NB, Tp // TB)

    # ---- explicit VMEM budget (double-buffered gx/h, single-buffered U) ----
    gx_blk_bytes = TB * NB * 4 * Hp * 2
    h_blk_bytes = TB * NB * Hp * 2
    u_bytes = Hp * 4 * Hp * 2
    carry_bytes = 2 * NB * Hp * 4
    vmem_needed = 2 * gx_blk_bytes + 2 * h_blk_bytes + u_bytes + carry_bytes
    vmem_limit = int(min(max(2 * vmem_needed + (4 << 20), 32 << 20), 64 << 20))

    cost = pl.CostEstimate(
        flops=2 * Tp * Np * Hp * (4 * Hp),
        transcendentals=5 * Tp * Np * Hp,
        bytes_accessed=gx.size * 2 + Tp * Np * Hp * 2 + u_fused.size * 2,
    )

    h_seq = pl.pallas_call(
        qlstm_recurrent_kernel,
        out_shape=jax.ShapeDtypeStruct((Tp, Np, Hp), bf16),
        grid_spec=pltpu.PrefetchScalarGridSpec(
            num_scalar_prefetch=0,
            grid=grid,
            in_specs=[
                # Per-time-block slab of precomputed gate pre-activations.
                pl.BlockSpec((TB, NB, 4 * Hp), lambda nb, tb: (tb, nb, 0)),
                # Constant fused recurrent weight: index never changes, so a
                # single buffer suffices (saves Hp*4Hp*2 bytes of dead VMEM).
                pl.BlockSpec((Hp, 4 * Hp), lambda nb, tb: (0, 0),
                             pipeline_mode=pl.Buffered(1)),
            ],
            out_specs=pl.BlockSpec((TB, NB, Hp), lambda nb, tb: (tb, nb, 0)),
            scratch_shapes=[
                pltpu.VMEM((NB, Hp), f32),   # h carry
                pltpu.VMEM((NB, Hp), f32),   # c carry
            ],
        ),
        compiler_params=pltpu.CompilerParams(
            # batch blocks independent (megacore on v7x); time is a recurrence.
            dimension_semantics=("parallel", "arbitrary"),
            vmem_limit_bytes=vmem_limit,
        ),
        cost_estimate=cost,
    )(gx, u_fused)

    # ---- fco applied once, outside the serial loop (one big matmul) ----
    h_seq = h_seq[:T, :N, :H].astype(f32).reshape(T * N, H)
    out = h_seq @ params["wfco"] + params["bfco"]
    return out.reshape(T, N, C)


# ---------------------------------------------------------------------------
# Parameter construction (deterministic, synthetic).
# Quaternion linear: weight built via the Hamilton-product block structure
# from r/i/j/k components of shape (in//4, out//4) ("input @ W" convention).
# ---------------------------------------------------------------------------
def make_quaternion_weight(key, in_features, out_features):
    assert in_features % 4 == 0 and out_features % 4 == 0
    in_q, out_q = in_features // 4, out_features // 4
    kr, ki, kj, kk = jax.random.split(key, 4)
    scale = 1.0 / np.sqrt(2.0 * in_q)
    r = jax.random.uniform(kr, (in_q, out_q), minval=-scale, maxval=scale, dtype=jnp.float32)
    i = jax.random.uniform(ki, (in_q, out_q), minval=-scale, maxval=scale, dtype=jnp.float32)
    j = jax.random.uniform(kj, (in_q, out_q), minval=-scale, maxval=scale, dtype=jnp.float32)
    k = jax.random.uniform(kk, (in_q, out_q), minval=-scale, maxval=scale, dtype=jnp.float32)
    col_r = jnp.concatenate([r, -i, -j, -k], axis=0)   # (in_features, out_q)
    col_i = jnp.concatenate([i, r, -k, j], axis=0)
    col_j = jnp.concatenate([j, k, r, -i], axis=0)
    col_k = jnp.concatenate([k, -j, i, r], axis=0)
    return jnp.concatenate([col_r, col_i, col_j, col_k], axis=1)   # (in, out)


def make_params(key, feat_size, hidden_size):
    keys = jax.random.split(key, 13)
    F, H = feat_size, hidden_size
    C = feat_size
    p = {}
    # input quaternion linears (with bias)
    for idx, name in enumerate(["wf", "wi", "wo", "wc"]):
        p[name] = make_quaternion_weight(keys[idx], F, H)
        p["b" + name[1]] = jax.random.uniform(
            keys[4 + idx], (1, H), minval=-0.1, maxval=0.1, dtype=jnp.float32
        )
    # recurrent quaternion linears (no bias)
    for idx, name in enumerate(["uf", "ui", "uo", "uc"]):
        p[name] = make_quaternion_weight(keys[8 + idx], H, H)
    # plain Linear fco: stored already transposed as (H, C)
    kf, kb = jax.random.split(keys[12], 2)
    bound = 1.0 / np.sqrt(H)
    p["wfco"] = jax.random.uniform(kf, (H, C), minval=-bound, maxval=bound, dtype=jnp.float32)
    p["bfco"] = jax.random.uniform(kb, (1, C), minval=-bound, maxval=bound, dtype=jnp.float32)
    return p


# ---------------------------------------------------------------------------
# Pure-JAX f32 reference (mirrors the PyTorch forward) for a correctness check.
# ---------------------------------------------------------------------------
def qlstm_reference(x, p):
    T, N, F = x.shape
    H = p["uf"].shape[0]
    h = jnp.zeros((N, H), jnp.float32)
    c = jnp.zeros((N, H), jnp.float32)
    wfx = x @ p["wf"] + p["bf"]
    wix = x @ p["wi"] + p["bi"]
    wox = x @ p["wo"] + p["bo"]
    wcx = x @ p["wc"] + p["bc"]
    outs = []
    for k in range(T):
        ft = jax.nn.sigmoid(wfx[k] + h @ p["uf"])
        it = jax.nn.sigmoid(wix[k] + h @ p["ui"])
        ot = jax.nn.sigmoid(wox[k] + h @ p["uo"])
        at = wcx[k] + h @ p["uc"]
        c = it * jnp.tanh(at) + ft * c
        h = ot * jnp.tanh(c)
        outs.append(h @ p["wfco"] + p["bfco"])
    return jnp.stack(outs, axis=0)


if __name__ == "__main__":
    # Small shapes consistent with the module: x is (seq, batch, feat),
    # feat/hidden divisible by 4 (quaternion requirement).
    T, N, F, H = 8, 4, 8, 32

    key = jax.random.PRNGKey(0)
    kx, kp = jax.random.split(key)
    x = jax.random.normal(kx, (T, N, F), dtype=jnp.float32)
    params = make_params(kp, feat_size=F, hidden_size=H)

    out = qlstm_forward(x, params)
    out = jax.block_until_ready(out)

    ref = qlstm_reference(x, params)
    assert out.shape == (T, N, F)
    # bf16 gx / U / h on the MXU path -> looser tolerance than the f32 version.
    np.testing.assert_allclose(np.asarray(out), np.asarray(ref), rtol=2e-2, atol=2e-2)

    print("KERNEL_OK")
</pallas_src>

<mosaic_0001>
module attributes {stable_mosaic.version = 11 : i64} {
  func.func @qlstm_recurrent_kernel(%arg0: i32, %arg1: i32, %arg2: memref<8x8x512xbf16, #tpu.memory_space<vmem>>, %arg3: memref<128x512xbf16, #tpu.memory_space<vmem>>, %arg4: memref<8x8x128xbf16, #tpu.memory_space<vmem>>, %arg5: memref<8x128xf32, #tpu.memory_space<vmem>>, %arg6: memref<8x128xf32, #tpu.memory_space<vmem>>) attributes {dimension_semantics = [#tpu.dimension_semantics<parallel>, #tpu.dimension_semantics<arbitrary>], iteration_bounds = array<i64: 1, 1>, scalar_prefetch = 0 : i64, scratch_operands = 2 : i64, tpu.core_type = #tpu.core_type<tc>, window_params = [{transform_indices = @transform_0, window_bounds = array<i64: 8, 8, 512>}, {pipeline_mode = #tpu.pipeline_mode<synchronous>, transform_indices = @transform_1, window_bounds = array<i64: 128, 512>}, {transform_indices = @transform_2, window_bounds = array<i64: 8, 8, 128>}]} {
    %c0_i32 = arith.constant 0 : i32
    %0 = arith.cmpi eq, %arg1, %c0_i32 : i32
    %1 = arith.extui %0 : i1 to i32
    %c0_i32_0 = arith.constant 0 : i32
    %2 = arith.cmpi ne, %1, %c0_i32_0 : i32
    scf.if %2 {
      %cst_88 = arith.constant 0.000000e+00 : f32
      %311 = vector.broadcast %cst_88 : f32 to vector<8x128xf32>
      %c0_89 = arith.constant 0 : index
      %c0_90 = arith.constant 0 : index
      %312 = vector.load %arg5[%c0_89, %c0_90] : memref<8x128xf32, #tpu.memory_space<vmem>>, vector<8x128xf32>
      tpu.vector_store %arg5[%c0_89, %c0_90], %311 {strides = array<i32>} : memref<8x128xf32, #tpu.memory_space<vmem>>, vector<8x128xf32>,
      %cst_91 = arith.constant 0.000000e+00 : f32
      %313 = vector.broadcast %cst_91 : f32 to vector<8x128xf32>
      %c0_92 = arith.constant 0 : index
      %c0_93 = arith.constant 0 : index
      %314 = vector.load %arg6[%c0_92, %c0_93] : memref<8x128xf32, #tpu.memory_space<vmem>>, vector<8x128xf32>
      tpu.vector_store %arg6[%c0_92, %c0_93], %313 {strides = array<i32>} : memref<8x128xf32, #tpu.memory_space<vmem>>, vector<8x128xf32>,
    } else {
    }
    %c0 = arith.constant 0 : index
    %c0_1 = arith.constant 0 : index
    %3 = vector.load %arg5[%c0, %c0_1] : memref<8x128xf32, #tpu.memory_space<vmem>>, vector<8x128xf32>
    %c0_2 = arith.constant 0 : index
    %c0_3 = arith.constant 0 : index
    %4 = vector.load %arg6[%c0_2, %c0_3] : memref<8x128xf32, #tpu.memory_space<vmem>>, vector<8x128xf32>
    %c0_i32_4 = arith.constant 0 : i32
    %5 = arith.index_cast %c0_i32_4 : i32 to index
    %c0_5 = arith.constant 0 : index
    %c0_6 = arith.constant 0 : index
    %6 = vector.load %arg2[%5, %c0_5, %c0_6] : memref<8x8x512xbf16, #tpu.memory_space<vmem>>, vector<1x8x512xbf16>
    %7 = vector.shape_cast %6 : vector<1x8x512xbf16> to vector<8x512xbf16>
    %8 = arith.extf %7 : vector<8x512xbf16> to vector<8x512xf32>
    %9 = arith.truncf %3 : vector<8x128xf32> to vector<8x128xbf16>
    %c0_7 = arith.constant 0 : index
    %c0_8 = arith.constant 0 : index
    %10 = vector.load %arg3[%c0_7, %c0_8] : memref<128x512xbf16, #tpu.memory_space<vmem>>, vector<128x512xbf16>
    %cst = arith.constant dense<0.000000e+00> : vector<8x512xf32>
    %11 = tpu.matmul %9, %10, %cst {dimension_numbers = #tpu.dot_dimension_numbers<[1], [0], [0], [1], [0, 0, 1, 1], [], []>} : vector<8x128xbf16>, vector<128x512xbf16>, vector<8x512xf32> -> vector<8x512xf32>
    %12 = arith.addf %8, %11 : vector<8x512xf32>
    %13 = vector.extract_strided_slice %12 {offsets = [0, 0], sizes = [8, 128], strides = [1, 1]} : vector<8x512xf32> to vector<8x128xf32>
    %14 = arith.negf %13 : vector<8x128xf32>
    %15 = math.exp %14 : vector<8x128xf32>
    %cst_9 = arith.constant 1.000000e+00 : f32
    %16 = vector.broadcast %cst_9 : f32 to vector<8x128xf32>
    %17 = arith.addf %16, %15 : vector<8x128xf32>
    %18 = arith.divf %16, %17 : vector<8x128xf32>
    %19 = vector.extract_strided_slice %12 {offsets = [0, 128], sizes = [8, 128], strides = [1, 1]} : vector<8x512xf32> to vector<8x128xf32>
    %20 = arith.negf %19 : vector<8x128xf32>
    %21 = math.exp %20 : vector<8x128xf32>
    %cst_10 = arith.constant 1.000000e+00 : f32
    %22 = vector.broadcast %cst_10 : f32 to vector<8x128xf32>
    %23 = arith.addf %22, %21 : vector<8x128xf32>
    %24 = arith.divf %22, %23 : vector<8x128xf32>
    %25 = vector.extract_strided_slice %12 {offsets = [0, 256], sizes = [8, 128], strides = [1, 1]} : vector<8x512xf32> to vector<8x128xf32>
    %26 = arith.negf %25 : vector<8x128xf32>
    %27 = math.exp %26 : vector<8x128xf32>
    %cst_11 = arith.constant 1.000000e+00 : f32
    %28 = vector.broadcast %cst_11 : f32 to vector<8x128xf32>
    %29 = arith.addf %28, %27 : vector<8x128xf32>
    %30 = arith.divf %28, %29 : vector<8x128xf32>
    %31 = vector.extract_strided_slice %12 {offsets = [0, 384], sizes = [8, 128], strides = [1, 1]} : vector<8x512xf32> to vector<8x128xf32>
    %32 = math.tanh %31 : vector<8x128xf32>
    %33 = arith.mulf %24, %32 : vector<8x128xf32>
    %34 = arith.mulf %18, %4 : vector<8x128xf32>
    %35 = arith.addf %33, %34 : vector<8x128xf32>
    %36 = math.tanh %35 : vector<8x128xf32>
    %37 = arith.mulf %30, %36 : vector<8x128xf32>
    %38 = arith.truncf %37 : vector<8x128xf32> to vector<8x128xbf16>
    %39 = arith.index_cast %c0_i32_4 : i32 to index
    %c0_12 = arith.constant 0 : index
    %c0_13 = arith.constant 0 : index
    %40 = vector.load %arg4[%39, %c0_12, %c0_13] : memref<8x8x128xbf16, #tpu.memory_space<vmem>>, vector<1x8x128xbf16>
    %41 = vector.shape_cast %40 : vector<1x8x128xbf16> to vector<8x128xbf16>
    %42 = vector.shape_cast %38 : vector<8x128xbf16> to vector<1x8x128xbf16>
    tpu.vector_store %arg4[%39, %c0_12, %c0_13], %42 {strides = array<i32>} : memref<8x8x128xbf16, #tpu.memory_space<vmem>>, vector<1x8x128xbf16>,
    %c1_i32 = arith.constant 1 : i32
    %43 = arith.index_cast %c1_i32 : i32 to index
    %c0_14 = arith.constant 0 : index
    %c0_15 = arith.constant 0 : index
    %44 = vector.load %arg2[%43, %c0_14, %c0_15] : memref<8x8x512xbf16, #tpu.memory_space<vmem>>, vector<1x8x512xbf16>
    %45 = vector.shape_cast %44 : vector<1x8x512xbf16> to vector<8x512xbf16>
    %46 = arith.extf %45 : vector<8x512xbf16> to vector<8x512xf32>
    %47 = arith.truncf %37 : vector<8x128xf32> to vector<8x128xbf16>
    %c0_16 = arith.constant 0 : index
    %c0_17 = arith.constant 0 : index
    %48 = vector.load %arg3[%c0_16, %c0_17] : memref<128x512xbf16, #tpu.memory_space<vmem>>, vector<128x512xbf16>
    %cst_18 = arith.constant dense<0.000000e+00> : vector<8x512xf32>
    %49 = tpu.matmul %47, %48, %cst_18 {dimension_numbers = #tpu.dot_dimension_numbers<[1], [0], [0], [1], [0, 0, 1, 1], [], []>} : vector<8x128xbf16>, vector<128x512xbf16>, vector<8x512xf32> -> vector<8x512xf32>
    %50 = arith.addf %46, %49 : vector<8x512xf32>
    %51 = vector.extract_strided_slice %50 {offsets = [0, 0], sizes = [8, 128], strides = [1, 1]} : vector<8x512xf32> to vector<8x128xf32>
    %52 = arith.negf %51 : vector<8x128xf32>
    %53 = math.exp %52 : vector<8x128xf32>
    %cst_19 = arith.constant 1.000000e+00 : f32
    %54 = vector.broadcast %cst_19 : f32 to vector<8x128xf32>
    %55 = arith.addf %54, %53 : vector<8x128xf32>
    %56 = arith.divf %54, %55 : vector<8x128xf32>
    %57 = vector.extract_strided_slice %50 {offsets = [0, 128], sizes = [8, 128], strides = [1, 1]} : vector<8x512xf32> to vector<8x128xf32>
    %58 = arith.negf %57 : vector<8x128xf32>
    %59 = math.exp %58 : vector<8x128xf32>
    %cst_20 = arith.constant 1.000000e+00 : f32
    %60 = vector.broadcast %cst_20 : f32 to vector<8x128xf32>
    %61 = arith.addf %60, %59 : vector<8x128xf32>
    %62 = arith.divf %60, %61 : vector<8x128xf32>
    %63 = vector.extract_strided_slice %50 {offsets = [0, 256], sizes = [8, 128], strides = [1, 1]} : vector<8x512xf32> to vector<8x128xf32>
    %64 = arith.negf %63 : vector<8x128xf32>
    %65 = math.exp %64 : vector<8x128xf32>
    %cst_21 = arith.constant 1.000000e+00 : f32
    %66 = vector.broadcast %cst_21 : f32 to vector<8x128xf32>
    %67 = arith.addf %66, %65 : vector<8x128xf32>
    %68 = arith.divf %66, %67 : vector<8x128xf32>
    %69 = vector.extract_strided_slice %50 {offsets = [0, 384], sizes = [8, 128], strides = [1, 1]} : vector<8x512xf32> to vector<8x128xf32>
    %70 = math.tanh %69 : vector<8x128xf32>
    %71 = arith.mulf %62, %70 : vector<8x128xf32>
    %72 = arith.mulf %56, %35 : vector<8x128xf32>
    %73 = arith.addf %71, %72 : vector<8x128xf32>
    %74 = math.tanh %73 : vector<8x128xf32>
    %75 = arith.mulf %68, %74 : vector<8x128xf32>
    %76 = arith.truncf %75 : vector<8x128xf32> to vector<8x128xbf16>
    %77 = arith.index_cast %c1_i32 : i32 to index
    %c0_22 = arith.constant 0 : index
    %c0_23 = arith.constant 0 : index
    %78 = vector.load %arg4[%77, %c0_22, %c0_23] : memref<8x8x128xbf16, #tpu.memory_space<vmem>>, vector<1x8x128xbf16>
    %79 = vector.shape_cast %78 : vector<1x8x128xbf16> to vector<8x128xbf16>
    %80 = vector.shape_cast %76 : vector<8x128xbf16> to vector<1x8x128xbf16>
    tpu.vector_store %arg4[%77, %c0_22, %c0_23], %80 {strides = array<i32>} : memref<8x8x128xbf16, #tpu.memory_space<vmem>>, vector<1x8x128xbf16>,
    %c2_i32 = arith.constant 2 : i32
    %81 = arith.index_cast %c2_i32 : i32 to index
    %c0_24 = arith.constant 0 : index
    %c0_25 = arith.constant 0 : index
    %82 = vector.load %arg2[%81, %c0_24, %c0_25] : memref<8x8x512xbf16, #tpu.memory_space<vmem>>, vector<1x8x512xbf16>
    %83 = vector.shape_cast %82 : vector<1x8x512xbf16> to vector<8x512xbf16>
    %84 = arith.extf %83 : vector<8x512xbf16> to vector<8x512xf32>
    %85 = arith.truncf %75 : vector<8x128xf32> to vector<8x128xbf16>
    %c0_26 = arith.constant 0 : index
    %c0_27 = arith.constant 0 : index
    %86 = vector.load %arg3[%c0_26, %c0_27] : memref<128x512xbf16, #tpu.memory_space<vmem>>, vector<128x512xbf16>
    %cst_28 = arith.constant dense<0.000000e+00> : vector<8x512xf32>
    %87 = tpu.matmul %85, %86, %cst_28 {dimension_numbers = #tpu.dot_dimension_numbers<[1], [0], [0], [1], [0, 0, 1, 1], [], []>} : vector<8x128xbf16>, vector<128x512xbf16>, vector<8x512xf32> -> vector<8x512xf32>
    %88 = arith.addf %84, %87 : vector<8x512xf32>
    %89 = vector.extract_strided_slice %88 {offsets = [0, 0], sizes = [8, 128], strides = [1, 1]} : vector<8x512xf32> to vector<8x128xf32>
    %90 = arith.negf %89 : vector<8x128xf32>
    %91 = math.exp %90 : vector<8x128xf32>
    %cst_29 = arith.constant 1.000000e+00 : f32
    %92 = vector.broadcast %cst_29 : f32 to vector<8x128xf32>
    %93 = arith.addf %92, %91 : vector<8x128xf32>
    %94 = arith.divf %92, %93 : vector<8x128xf32>
    %95 = vector.extract_strided_slice %88 {offsets = [0, 128], sizes = [8, 128], strides = [1, 1]} : vector<8x512xf32> to vector<8x128xf32>
    %96 = arith.negf %95 : vector<8x128xf32>
    %97 = math.exp %96 : vector<8x128xf32>
    %cst_30 = arith.constant 1.000000e+00 : f32
    %98 = vector.broadcast %cst_30 : f32 to vector<8x128xf32>
    %99 = arith.addf %98, %97 : vector<8x128xf32>
    %100 = arith.divf %98, %99 : vector<8x128xf32>
    %101 = vector.extract_strided_slice %88 {offsets = [0, 256], sizes = [8, 128], strides = [1, 1]} : vector<8x512xf32> to vector<8x128xf32>
    %102 = arith.negf %101 : vector<8x128xf32>
    %103 = math.exp %102 : vector<8x128xf32>
    %cst_31 = arith.constant 1.000000e+00 : f32
    %104 = vector.broadcast %cst_31 : f32 to vector<8x128xf32>
    %105 = arith.addf %104, %103 : vector<8x128xf32>
    %106 = arith.divf %104, %105 : vector<8x128xf32>
    %107 = vector.extract_strided_slice %88 {offsets = [0, 384], sizes = [8, 128], strides = [1, 1]} : vector<8x512xf32> to vector<8x128xf32>
    %108 = math.tanh %107 : vector<8x128xf32>
    %109 = arith.mulf %100, %108 : vector<8x128xf32>
    %110 = arith.mulf %94, %73 : vector<8x128xf32>
    %111 = arith.addf %109, %110 : vector<8x128xf32>
    %112 = math.tanh %111 : vector<8x128xf32>
    %113 = arith.mulf %106, %112 : vector<8x128xf32>
    %114 = arith.truncf %113 : vector<8x128xf32> to vector<8x128xbf16>
    %115 = arith.index_cast %c2_i32 : i32 to index
    %c0_32 = arith.constant 0 : index
    %c0_33 = arith.constant 0 : index
    %116 = vector.load %arg4[%115, %c0_32, %c0_33] : memref<8x8x128xbf16, #tpu.memory_space<vmem>>, vector<1x8x128xbf16>
    %117 = vector.shape_cast %116 : vector<1x8x128xbf16> to vector<8x128xbf16>
    %118 = vector.shape_cast %114 : vector<8x128xbf16> to vector<1x8x128xbf16>
    tpu.vector_store %arg4[%115, %c0_32, %c0_33], %118 {strides = array<i32>} : memref<8x8x128xbf16, #tpu.memory_space<vmem>>, vector<1x8x128xbf16>,
    %c3_i32 = arith.constant 3 : i32
    %119 = arith.index_cast %c3_i32 : i32 to index
    %c0_34 = arith.constant 0 : index
    %c0_35 = arith.constant 0 : index
    %120 = vector.load %arg2[%119, %c0_34, %c0_35] : memref<8x8x512xbf16, #tpu.memory_space<vmem>>, vector<1x8x512xbf16>
    %121 = vector.shape_cast %120 : vector<1x8x512xbf16> to vector<8x512xbf16>
    %122 = arith.extf %121 : vector<8x512xbf16> to vector<8x512xf32>
    %123 = arith.truncf %113 : vector<8x128xf32> to vector<8x128xbf16>
    %c0_36 = arith.constant 0 : index
    %c0_37 = arith.constant 0 : index
    %124 = vector.load %arg3[%c0_36, %c0_37] : memref<128x512xbf16, #tpu.memory_space<vmem>>, vector<128x512xbf16>
    %cst_38 = arith.constant dense<0.000000e+00> : vector<8x512xf32>
    %125 = tpu.matmul %123, %124, %cst_38 {dimension_numbers = #tpu.dot_dimension_numbers<[1], [0], [0], [1], [0, 0, 1, 1], [], []>} : vector<8x128xbf16>, vector<128x512xbf16>, vector<8x512xf32> -> vector<8x512xf32>
    %126 = arith.addf %122, %125 : vector<8x512xf32>
    %127 = vector.extract_strided_slice %126 {offsets = [0, 0], sizes = [8, 128], strides = [1, 1]} : vector<8x512xf32> to vector<8x128xf32>
    %128 = arith.negf %127 : vector<8x128xf32>
    %129 = math.exp %128 : vector<8x128xf32>
    %cst_39 = arith.constant 1.000000e+00 : f32
    %130 = vector.broadcast %cst_39 : f32 to vector<8x128xf32>
    %131 = arith.addf %130, %129 : vector<8x128xf32>
    %132 = arith.divf %130, %131 : vector<8x128xf32>
    %133 = vector.extract_strided_slice %126 {offsets = [0, 128], sizes = [8, 128], strides = [1, 1]} : vector<8x512xf32> to vector<8x128xf32>
    %134 = arith.negf %133 : vector<8x128xf32>
    %135 = math.exp %134 : vector<8x128xf32>
    %cst_40 = arith.constant 1.000000e+00 : f32
    %136 = vector.broadcast %cst_40 : f32 to vector<8x128xf32>
    %137 = arith.addf %136, %135 : vector<8x128xf32>
    %138 = arith.divf %136, %137 : vector<8x128xf32>
    %139 = vector.extract_strided_slice %126 {offsets = [0, 256], sizes = [8, 128], strides = [1, 1]} : vector<8x512xf32> to vector<8x128xf32>
    %140 = arith.negf %139 : vector<8x128xf32>
    %141 = math.exp %140 : vector<8x128xf32>
    %cst_41 = arith.constant 1.000000e+00 : f32
    %142 = vector.broadcast %cst_41 : f32 to vector<8x128xf32>
    %143 = arith.addf %142, %141 : vector<8x128xf32>
    %144 = arith.divf %142, %143 : vector<8x128xf32>
    %145 = vector.extract_strided_slice %126 {offsets = [0, 384], sizes = [8, 128], strides = [1, 1]} : vector<8x512xf32> to vector<8x128xf32>
    %146 = math.tanh %145 : vector<8x128xf32>
    %147 = arith.mulf %138, %146 : vector<8x128xf32>
    %148 = arith.mulf %132, %111 : vector<8x128xf32>
    %149 = arith.addf %147, %148 : vector<8x128xf32>
    %150 = math.tanh %149 : vector<8x128xf32>
    %151 = arith.mulf %144, %150 : vector<8x128xf32>
    %152 = arith.truncf %151 : vector<8x128xf32> to vector<8x128xbf16>
    %153 = arith.index_cast %c3_i32 : i32 to index
    %c0_42 = arith.constant 0 : index
    %c0_43 = arith.constant 0 : index
    %154 = vector.load %arg4[%153, %c0_42, %c0_43] : memref<8x8x128xbf16, #tpu.memory_space<vmem>>, vector<1x8x128xbf16>
    %155 = vector.shape_cast %154 : vector<1x8x128xbf16> to vector<8x128xbf16>
    %156 = vector.shape_cast %152 : vector<8x128xbf16> to vector<1x8x128xbf16>
    tpu.vector_store %arg4[%153, %c0_42, %c0_43], %156 {strides = array<i32>} : memref<8x8x128xbf16, #tpu.memory_space<vmem>>, vector<1x8x128xbf16>,
    %c4_i32 = arith.constant 4 : i32
    %157 = arith.index_cast %c4_i32 : i32 to index
    %c0_44 = arith.constant 0 : index
    %c0_45 = arith.constant 0 : index
    %158 = vector.load %arg2[%157, %c0_44, %c0_45] : memref<8x8x512xbf16, #tpu.memory_space<vmem>>, vector<1x8x512xbf16>
    %159 = vector.shape_cast %158 : vector<1x8x512xbf16> to vector<8x512xbf16>
    %160 = arith.extf %159 : vector<8x512xbf16> to vector<8x512xf32>
    %161 = arith.truncf %151 : vector<8x128xf32> to vector<8x128xbf16>
    %c0_46 = arith.constant 0 : index
    %c0_47 = arith.constant 0 : index
    %162 = vector.load %arg3[%c0_46, %c0_47] : memref<128x512xbf16, #tpu.memory_space<vmem>>, vector<128x512xbf16>
    %cst_48 = arith.constant dense<0.000000e+00> : vector<8x512xf32>
    %163 = tpu.matmul %161, %162, %cst_48 {dimension_numbers = #tpu.dot_dimension_numbers<[1], [0], [0], [1], [0, 0, 1, 1], [], []>} : vector<8x128xbf16>, vector<128x512xbf16>, vector<8x512xf32> -> vector<8x512xf32>
    %164 = arith.addf %160, %163 : vector<8x512xf32>
    %165 = vector.extract_strided_slice %164 {offsets = [0, 0], sizes = [8, 128], strides = [1, 1]} : vector<8x512xf32> to vector<8x128xf32>
    %166 = arith.negf %165 : vector<8x128xf32>
    %167 = math.exp %166 : vector<8x128xf32>
    %cst_49 = arith.constant 1.000000e+00 : f32
    %168 = vector.broadcast %cst_49 : f32 to vector<8x128xf32>
    %169 = arith.addf %168, %167 : vector<8x128xf32>
    %170 = arith.divf %168, %169 : vector<8x128xf32>
    %171 = vector.extract_strided_slice %164 {offsets = [0, 128], sizes = [8, 128], strides = [1, 1]} : vector<8x512xf32> to vector<8x128xf32>
    %172 = arith.negf %171 : vector<8x128xf32>
    %173 = math.exp %172 : vector<8x128xf32>
    %cst_50 = arith.constant 1.000000e+00 : f32
    %174 = vector.broadcast %cst_50 : f32 to vector<8x128xf32>
    %175 = arith.addf %174, %173 : vector<8x128xf32>
    %176 = arith.divf %174, %175 : vector<8x128xf32>
    %177 = vector.extract_strided_slice %164 {offsets = [0, 256], sizes = [8, 128], strides = [1, 1]} : vector<8x512xf32> to vector<8x128xf32>
    %178 = arith.negf %177 : vector<8x128xf32>
    %179 = math.exp %178 : vector<8x128xf32>
    %cst_51 = arith.constant 1.000000e+00 : f32
    %180 = vector.broadcast %cst_51 : f32 to vector<8x128xf32>
    %181 = arith.addf %180, %179 : vector<8x128xf32>
    %182 = arith.divf %180, %181 : vector<8x128xf32>
    %183 = vector.extract_strided_slice %164 {offsets = [0, 384], sizes = [8, 128], strides = [1, 1]} : vector<8x512xf32> to vector<8x128xf32>
    %184 = math.tanh %183 : vector<8x128xf32>
    %185 = arith.mulf %176, %184 : vector<8x128xf32>
    %186 = arith.mulf %170, %149 : vector<8x128xf32>
    %187 = arith.addf %185, %186 : vector<8x128xf32>
    %188 = math.tanh %187 : vector<8x128xf32>
    %189 = arith.mulf %182, %188 : vector<8x128xf32>
    %190 = arith.truncf %189 : vector<8x128xf32> to vector<8x128xbf16>
    %191 = arith.index_cast %c4_i32 : i32 to index
    %c0_52 = arith.constant 0 : index
    %c0_53 = arith.constant 0 : index
    %192 = vector.load %arg4[%191, %c0_52, %c0_53] : memref<8x8x128xbf16, #tpu.memory_space<vmem>>, vector<1x8x128xbf16>
    %193 = vector.shape_cast %192 : vector<1x8x128xbf16> to vector<8x128xbf16>
    %194 = vector.shape_cast %190 : vector<8x128xbf16> to vector<1x8x128xbf16>
    tpu.vector_store %arg4[%191, %c0_52, %c0_53], %194 {strides = array<i32>} : memref<8x8x128xbf16, #tpu.memory_space<vmem>>, vector<1x8x128xbf16>,
    %c5_i32 = arith.constant 5 : i32
    %195 = arith.index_cast %c5_i32 : i32 to index
    %c0_54 = arith.constant 0 : index
    %c0_55 = arith.constant 0 : index
    %196 = vector.load %arg2[%195, %c0_54, %c0_55] : memref<8x8x512xbf16, #tpu.memory_space<vmem>>, vector<1x8x512xbf16>
    %197 = vector.shape_cast %196 : vector<1x8x512xbf16> to vector<8x512xbf16>
    %198 = arith.extf %197 : vector<8x512xbf16> to vector<8x512xf32>
    %199 = arith.truncf %189 : vector<8x128xf32> to vector<8x128xbf16>
    %c0_56 = arith.constant 0 : index
    %c0_57 = arith.constant 0 : index
    %200 = vector.load %arg3[%c0_56, %c0_57] : memref<128x512xbf16, #tpu.memory_space<vmem>>, vector<128x512xbf16>
    %cst_58 = arith.constant dense<0.000000e+00> : vector<8x512xf32>
    %201 = tpu.matmul %199, %200, %cst_58 {dimension_numbers = #tpu.dot_dimension_numbers<[1], [0], [0], [1], [0, 0, 1, 1], [], []>} : vector<8x128xbf16>, vector<128x512xbf16>, vector<8x512xf32> -> vector<8x512xf32>
    %202 = arith.addf %198, %201 : vector<8x512xf32>
    %203 = vector.extract_strided_slice %202 {offsets = [0, 0], sizes = [8, 128], strides = [1, 1]} : vector<8x512xf32> to vector<8x128xf32>
    %204 = arith.negf %203 : vector<8x128xf32>
    %205 = math.exp %204 : vector<8x128xf32>
    %cst_59 = arith.constant 1.000000e+00 : f32
    %206 = vector.broadcast %cst_59 : f32 to vector<8x128xf32>
    %207 = arith.addf %206, %205 : vector<8x128xf32>
    %208 = arith.divf %206, %207 : vector<8x128xf32>
    %209 = vector.extract_strided_slice %202 {offsets = [0, 128], sizes = [8, 128], strides = [1, 1]} : vector<8x512xf32> to vector<8x128xf32>
    %210 = arith.negf %209 : vector<8x128xf32>
    %211 = math.exp %210 : vector<8x128xf32>
    %cst_60 = arith.constant 1.000000e+00 : f32
    %212 = vector.broadcast %cst_60 : f32 to vector<8x128xf32>
    %213 = arith.addf %212, %211 : vector<8x128xf32>
    %214 = arith.divf %212, %213 : vector<8x128xf32>
    %215 = vector.extract_strided_slice %202 {offsets = [0, 256], sizes = [8, 128], strides = [1, 1]} : vector<8x512xf32> to vector<8x128xf32>
    %216 = arith.negf %215 : vector<8x128xf32>
    %217 = math.exp %216 : vector<8x128xf32>
    %cst_61 = arith.constant 1.000000e+00 : f32
    %218 = vector.broadcast %cst_61 : f32 to vector<8x128xf32>
    %219 = arith.addf %218, %217 : vector<8x128xf32>
    %220 = arith.divf %218, %219 : vector<8x128xf32>
    %221 = vector.extract_strided_slice %202 {offsets = [0, 384], sizes = [8, 128], strides = [1, 1]} : vector<8x512xf32> to vector<8x128xf32>
    %222 = math.tanh %221 : vector<8x128xf32>
    %223 = arith.mulf %214, %222 : vector<8x128xf32>
    %224 = arith.mulf %208, %187 : vector<8x128xf32>
    %225 = arith.addf %223, %224 : vector<8x128xf32>
    %226 = math.tanh %225 : vector<8x128xf32>
    %227 = arith.mulf %220, %226 : vector<8x128xf32>
    %228 = arith.truncf %227 : vector<8x128xf32> to vector<8x128xbf16>
    %229 = arith.index_cast %c5_i32 : i32 to index
    %c0_62 = arith.constant 0 : index
    %c0_63 = arith.constant 0 : index
    %230 = vector.load %arg4[%229, %c0_62, %c0_63] : memref<8x8x128xbf16, #tpu.memory_space<vmem>>, vector<1x8x128xbf16>
    %231 = vector.shape_cast %230 : vector<1x8x128xbf16> to vector<8x128xbf16>
    %232 = vector.shape_cast %228 : vector<8x128xbf16> to vector<1x8x128xbf16>
    tpu.vector_store %arg4[%229, %c0_62, %c0_63], %232 {strides = array<i32>} : memref<8x8x128xbf16, #tpu.memory_space<vmem>>, vector<1x8x128xbf16>,
    %c6_i32 = arith.constant 6 : i32
    %233 = arith.index_cast %c6_i32 : i32 to index
    %c0_64 = arith.constant 0 : index
    %c0_65 = arith.constant 0 : index
    %234 = vector.load %arg2[%233, %c0_64, %c0_65] : memref<8x8x512xbf16, #tpu.memory_space<vmem>>, vector<1x8x512xbf16>
    %235 = vector.shape_cast %234 : vector<1x8x512xbf16> to vector<8x512xbf16>
    %236 = arith.extf %235 : vector<8x512xbf16> to vector<8x512xf32>
    %237 = arith.truncf %227 : vector<8x128xf32> to vector<8x128xbf16>
    %c0_66 = arith.constant 0 : index
    %c0_67 = arith.constant 0 : index
    %238 = vector.load %arg3[%c0_66, %c0_67] : memref<128x512xbf16, #tpu.memory_space<vmem>>, vector<128x512xbf16>
    %cst_68 = arith.constant dense<0.000000e+00> : vector<8x512xf32>
    %239 = tpu.matmul %237, %238, %cst_68 {dimension_numbers = #tpu.dot_dimension_numbers<[1], [0], [0], [1], [0, 0, 1, 1], [], []>} : vector<8x128xbf16>, vector<128x512xbf16>, vector<8x512xf32> -> vector<8x512xf32>
    %240 = arith.addf %236, %239 : vector<8x512xf32>
    %241 = vector.extract_strided_slice %240 {offsets = [0, 0], sizes = [8, 128], strides = [1, 1]} : vector<8x512xf32> to vector<8x128xf32>
    %242 = arith.negf %241 : vector<8x128xf32>
    %243 = math.exp %242 : vector<8x128xf32>
    %cst_69 = arith.constant 1.000000e+00 : f32
    %244 = vector.broadcast %cst_69 : f32 to vector<8x128xf32>
    %245 = arith.addf %244, %243 : vector<8x128xf32>
    %246 = arith.divf %244, %245 : vector<8x128xf32>
    %247 = vector.extract_strided_slice %240 {offsets = [0, 128], sizes = [8, 128], strides = [1, 1]} : vector<8x512xf32> to vector<8x128xf32>
    %248 = arith.negf %247 : vector<8x128xf32>
    %249 = math.exp %248 : vector<8x128xf32>
    %cst_70 = arith.constant 1.000000e+00 : f32
    %250 = vector.broadcast %cst_70 : f32 to vector<8x128xf32>
    %251 = arith.addf %250, %249 : vector<8x128xf32>
    %252 = arith.divf %250, %251 : vector<8x128xf32>
    %253 = vector.extract_strided_slice %240 {offsets = [0, 256], sizes = [8, 128], strides = [1, 1]} : vector<8x512xf32> to vector<8x128xf32>
    %254 = arith.negf %253 : vector<8x128xf32>
    %255 = math.exp %254 : vector<8x128xf32>
    %cst_71 = arith.constant 1.000000e+00 : f32
    %256 = vector.broadcast %cst_71 : f32 to vector<8x128xf32>
    %257 = arith.addf %256, %255 : vector<8x128xf32>
    %258 = arith.divf %256, %257 : vector<8x128xf32>
    %259 = vector.extract_strided_slice %240 {offsets = [0, 384], sizes = [8, 128], strides = [1, 1]} : vector<8x512xf32> to vector<8x128xf32>
    %260 = math.tanh %259 : vector<8x128xf32>
    %261 = arith.mulf %252, %260 : vector<8x128xf32>
    %262 = arith.mulf %246, %225 : vector<8x128xf32>
    %263 = arith.addf %261, %262 : vector<8x128xf32>
    %264 = math.tanh %263 : vector<8x128xf32>
    %265 = arith.mulf %258, %264 : vector<8x128xf32>
    %266 = arith.truncf %265 : vector<8x128xf32> to vector<8x128xbf16>
    %267 = arith.index_cast %c6_i32 : i32 to index
    %c0_72 = arith.constant 0 : index
    %c0_73 = arith.constant 0 : index
    %268 = vector.load %arg4[%267, %c0_72, %c0_73] : memref<8x8x128xbf16, #tpu.memory_space<vmem>>, vector<1x8x128xbf16>
    %269 = vector.shape_cast %268 : vector<1x8x128xbf16> to vector<8x128xbf16>
    %270 = vector.shape_cast %266 : vector<8x128xbf16> to vector<1x8x128xbf16>
    tpu.vector_store %arg4[%267, %c0_72, %c0_73], %270 {strides = array<i32>} : memref<8x8x128xbf16, #tpu.memory_space<vmem>>, vector<1x8x128xbf16>,
    %c7_i32 = arith.constant 7 : i32
    %271 = arith.index_cast %c7_i32 : i32 to index
    %c0_74 = arith.constant 0 : index
    %c0_75 = arith.constant 0 : index
    %272 = vector.load %arg2[%271, %c0_74, %c0_75] : memref<8x8x512xbf16, #tpu.memory_space<vmem>>, vector<1x8x512xbf16>
    %273 = vector.shape_cast %272 : vector<1x8x512xbf16> to vector<8x512xbf16>
    %274 = arith.extf %273 : vector<8x512xbf16> to vector<8x512xf32>
    %275 = arith.truncf %265 : vector<8x128xf32> to vector<8x128xbf16>
    %c0_76 = arith.constant 0 : index
    %c0_77 = arith.constant 0 : index
    %276 = vector.load %arg3[%c0_76, %c0_77] : memref<128x512xbf16, #tpu.memory_space<vmem>>, vector<128x512xbf16>
    %cst_78 = arith.constant dense<0.000000e+00> : vector<8x512xf32>
    %277 = tpu.matmul %275, %276, %cst_78 {dimension_numbers = #tpu.dot_dimension_numbers<[1], [0], [0], [1], [0, 0, 1, 1], [], []>} : vector<8x128xbf16>, vector<128x512xbf16>, vector<8x512xf32> -> vector<8x512xf32>
    %278 = arith.addf %274, %277 : vector<8x512xf32>
    %279 = vector.extract_strided_slice %278 {offsets = [0, 0], sizes = [8, 128], strides = [1, 1]} : vector<8x512xf32> to vector<8x128xf32>
    %280 = arith.negf %279 : vector<8x128xf32>
    %281 = math.exp %280 : vector<8x128xf32>
    %cst_79 = arith.constant 1.000000e+00 : f32
    %282 = vector.broadcast %cst_79 : f32 to vector<8x128xf32>
    %283 = arith.addf %282, %281 : vector<8x128xf32>
    %284 = arith.divf %282, %283 : vector<8x128xf32>
    %285 = vector.extract_strided_slice %278 {offsets = [0, 128], sizes = [8, 128], strides = [1, 1]} : vector<8x512xf32> to vector<8x128xf32>
    %286 = arith.negf %285 : vector<8x128xf32>
    %287 = math.exp %286 : vector<8x128xf32>
    %cst_80 = arith.constant 1.000000e+00 : f32
    %288 = vector.broadcast %cst_80 : f32 to vector<8x128xf32>
    %289 = arith.addf %288, %287 : vector<8x128xf32>
    %290 = arith.divf %288, %289 : vector<8x128xf32>
    %291 = vector.extract_strided_slice %278 {offsets = [0, 256], sizes = [8, 128], strides = [1, 1]} : vector<8x512xf32> to vector<8x128xf32>
    %292 = arith.negf %291 : vector<8x128xf32>
    %293 = math.exp %292 : vector<8x128xf32>
    %cst_81 = arith.constant 1.000000e+00 : f32
    %294 = vector.broadcast %cst_81 : f32 to vector<8x128xf32>
    %295 = arith.addf %294, %293 : vector<8x128xf32>
    %296 = arith.divf %294, %295 : vector<8x128xf32>
    %297 = vector.extract_strided_slice %278 {offsets = [0, 384], sizes = [8, 128], strides = [1, 1]} : vector<8x512xf32> to vector<8x128xf32>
    %298 = math.tanh %297 : vector<8x128xf32>
    %299 = arith.mulf %290, %298 : vector<8x128xf32>
    %300 = arith.mulf %284, %263 : vector<8x128xf32>
    %301 = arith.addf %299, %300 : vector<8x128xf32>
    %302 = math.tanh %301 : vector<8x128xf32>
    %303 = arith.mulf %296, %302 : vector<8x128xf32>
    %304 = arith.truncf %303 : vector<8x128xf32> to vector<8x128xbf16>
    %305 = arith.index_cast %c7_i32 : i32 to index
    %c0_82 = arith.constant 0 : index
    %c0_83 = arith.constant 0 : index
    %306 = vector.load %arg4[%305, %c0_82, %c0_83] : memref<8x8x128xbf16, #tpu.memory_space<vmem>>, vector<1x8x128xbf16>
    %307 = vector.shape_cast %306 : vector<1x8x128xbf16> to vector<8x128xbf16>
    %308 = vector.shape_cast %304 : vector<8x128xbf16> to vector<1x8x128xbf16>
    tpu.vector_store %arg4[%305, %c0_82, %c0_83], %308 {strides = array<i32>} : memref<8x8x128xbf16, #tpu.memory_space<vmem>>, vector<1x8x128xbf16>,
    %c8_i32 = arith.constant 8 : i32
    %c0_84 = arith.constant 0 : index
    %c0_85 = arith.constant 0 : index
    %309 = vector.load %arg5[%c0_84, %c0_85] : memref<8x128xf32, #tpu.memory_space<vmem>>, vector<8x128xf32>
    tpu.vector_store %arg5[%c0_84, %c0_85], %303 {strides = array<i32>} : memref<8x128xf32, #tpu.memory_space<vmem>>, vector<8x128xf32>,
    %c0_86 = arith.constant 0 : index
    %c0_87 = arith.constant 0 : index
    %310 = vector.load %arg6[%c0_86, %c0_87] : memref<8x128xf32, #tpu.memory_space<vmem>>, vector<8x128xf32>
    tpu.vector_store %arg6[%c0_86, %c0_87], %301 {strides = array<i32>} : memref<8x128xf32, #tpu.memory_space<vmem>>, vector<8x128xf32>,
    return
  }
  func.func @transform_0(%arg0: i32, %arg1: i32) -> (i32, i32, i32) {
    %c0_i32 = arith.constant 0 : i32
    %c0_i32_0 = arith.constant 0 : i32
    return %arg1, %arg0, %c0_i32 : i32, i32, i32
  }
  func.func @transform_1(%arg0: i32, %arg1: i32) -> (i32, i32) {
    %c0_i32 = arith.constant 0 : i32
    %c0_i32_0 = arith.constant 0 : i32
    %c0_i32_1 = arith.constant 0 : i32
    return %c0_i32, %c0_i32_0 : i32, i32
  }
  func.func @transform_2(%arg0: i32, %arg1: i32) -> (i32, i32, i32) {
    %c0_i32 = arith.constant 0 : i32
    %c0_i32_0 = arith.constant 0 : i32
    return %arg1, %arg0, %c0_i32 : i32, i32, i32
  }
}

</mosaic_0001>

<bundles_post_ra>
// kernel: tpu_custom_call.1
= control target key start
LH: loop header
LB: loop body
LE: loop exit
PB: predicated region body
PF: predicated region fallthrough
CT: control target
= control target key end

     0   :  { %7 = vsyncpa [#allocation5], 0  ;;  %s4247_s0 = inlined_call_operand.hbm [shape: bf16[8,8,512], index: 0, kind: input, shape index: {}]   ;;  %s4248_s1 = inlined_call_operand.hbm [shape: bf16[128,512], index: 1, kind: input, shape index: {}]   ;;  %s4249_s2 = inlined_call_operand.hbm [shape: bf16[8,8,128], index: 2, kind: output, shape index: {}]  }
   0x1   :  { %8 = vsyncpa [#allocation8], 0 }
   0x2   :  { %9 = vsyncpa [#allocation6], 0  ;;  %s14_s11 = sshll.u32 %s4247_s0, 4  ;;  %s4159_s12 = smov [#allocation4]   ;;  %s15_s11 = int_to_ptr.hbm [resolvable:$true] %s14_s11 }
   0x3   :  { %s16_s13 = sshll.u32 %s4159_s12, 4  ;;  %s27_s16 = sshll.u32 %s4248_s1, 4  ;;  %s17_s13 = int_to_ptr.vmem [resolvable:$true] %s16_s13  ;;  %s28_s16 = int_to_ptr.hbm [resolvable:$true] %s27_s16 }
   0x4   :  { %s4160_s17 = smov 256   ;;  %s4161_s18 = smov 16  }
   0x5   :  { %22 = dma.hbm_to_vmem [thread:$0]  %s15_s11, 2048, %s17_s13, [#allocation5], %s4160_s17, %s4160_s17, %s4161_s18  }
   0x6   :  { %s4162_s19 = smov [#allocation7]  }
   0x7   :  { %s29_s20 = sshll.u32 %s4162_s19, 4  ;;  %s30_s20 = int_to_ptr.vmem [resolvable:$true] %s29_s20 }
   0x8   :  { %35 = dma.hbm_to_vmem [thread:$0]  %s28_s16, 4096, %s30_s20, [#allocation8], %s4160_s17, %s4160_s17, %s4161_s18  }
   0x9   :  { %4153 = dma.done.wait [#allocation5], 2048  }
   0xa   :  { %4154 = vsyncadd [#allocation5], 4294965248 }
   0xb   :  { %4155 = dma.done.wait [#allocation8], 4096  }
   0xc   :  { %4156 = vsyncadd [#allocation8], 4294963200  ;;  %v2755_v0 = vld [vmem:[#allocation7 + $0xe0] sm:$0xf]  ;;  %v3719_v1 = vld [vmem:[#allocation7 + $0xec] sm:$0xf0] }
   0xd   :  { %v3717_v2 = vld [vmem:[#allocation7 + $0xe4] sm:$0xf]  ;;  %v2756_v3 = vor.u32 %v3719_v1, %v2755_v0  ;;  %v2757_v4 = vld [vmem:[#allocation7 + $0xf0] sm:$0xf0]  ;;  %v2763_v5 = vld [vmem:[#allocation7 + $0xe8] sm:$0xf] }
   0xe   :  { %v3720_v6 = vld [vmem:[#allocation7 + $0xf4] sm:$0xf0]  ;;  %v2760_v7 = vor.u32 %v3717_v2, %v2757_v4  ;;  %v2739_v9 = vld [vmem:[#allocation7 + $0xc0] sm:$0xf]  ;;  %v3715_v10 = vld [vmem:[#allocation7 + $0xcc] sm:$0xf0] }
   0xf   :  { %v2764_v8 = vor.u32 %v3720_v6, %v2763_v5  ;;  %v3713_v11 = vld [vmem:[#allocation7 + $0xc4] sm:$0xf]  ;;  %251 = vmatpush.bf16.msra.mxu0 %v2756_v3  ;;  %v2740_v12 = vor.u32 %v3715_v10, %v2739_v9  ;;  %v2741_v13 = vld [vmem:[#allocation7 + $0xd0] sm:$0xf0]  ;;  %v2747_v14 = vld [vmem:[#allocation7 + $0xc8] sm:$0xf] }
  0x10   :  { %v3716_v15 = vld [vmem:[#allocation7 + $0xd4] sm:$0xf0]  ;;  %264 = vmatpush.bf16.msra.mxu1 %v2760_v7  ;;  %v2744_v16 = vor.u32 %v3713_v11, %v2741_v13  ;;  %v3718_v18 = vld [vmem:[#allocation7 + $0xec] sm:$0xf]  ;;  %v2765_v19 = vld [vmem:[#allocation7 + $0xf8] sm:$0xf0] }
  0x11   :  { %277 = vmatpush.bf16.msra.mxu2 %v2764_v8  ;;  %v2748_v17 = vor.u32 %v3716_v15, %v2747_v14  ;;  %v2723_v20 = vld [vmem:[#allocation7 + $0xa0] sm:$0xf]  ;;  %v2768_v21 = vor.u32 %v3718_v18, %v2765_v19  ;;  %v3711_v22 = vld [vmem:[#allocation7 + $0xac] sm:$0xf0]  ;;  %v3709_v23 = vld [vmem:[#allocation7 + $0xa4] sm:$0xf] }
  0x12   :  { %v2725_v24 = vld [vmem:[#allocation7 + $0xb0] sm:$0xf0]  ;;  %v2731_v25 = vld [vmem:[#allocation7 + $0xa8] sm:$0xf]  ;;  %v3712_v26 = vld [vmem:[#allocation7 + $0xb4] sm:$0xf0]  ;;  %v2724_v28 = vor.u32 %v3711_v22, %v2723_v20 }
  0x13   :  { %v3714_v27 = vld [vmem:[#allocation7 + $0xcc] sm:$0xf]  ;;  %252 = vmatpush.bf16.msra.mxu0 %v2740_v12  ;;  %290 = vmatpush.bf16.msra.mxu3 %v2768_v21  ;;  %v2749_v29 = vld [vmem:[#allocation7 + $0xd8] sm:$0xf0]  ;;  %v2707_v30 = vld [vmem:[#allocation7 + $0x80] sm:$0xf]  ;;  %v2728_v32 = vor.u32 %v3709_v23, %v2725_v24  ;;  %v2732_v33 = vor.u32 %v3712_v26, %v2731_v25 }
  0x14   :  { %v3707_v31 = vld [vmem:[#allocation7 + $0x8c] sm:$0xf0]  ;;  %265 = vmatpush.bf16.msra.mxu1 %v2744_v16  ;;  %v2752_v34 = vor.u32 %v3714_v27, %v2749_v29  ;;  %v3705_v35 = vld [vmem:[#allocation7 + $0x84] sm:$0xf]  ;;  %v2709_v36 = vld [vmem:[#allocation7 + $0x90] sm:$0xf0] }
  0x15   :  { %278 = vmatpush.bf16.msra.mxu2 %v2748_v17  ;;  %v2715_v37 = vld [vmem:[#allocation7 + $0x88] sm:$0xf]  ;;  %v3708_v38 = vld [vmem:[#allocation7 + $0x94] sm:$0xf0]  ;;  %v3710_v39 = vld [vmem:[#allocation7 + $0xac] sm:$0xf]  ;;  %v2708_v41 = vor.u32 %v3707_v31, %v2707_v30  ;;  %v2712_v45 = vor.u32 %v3705_v35, %v2709_v36 }
  0x16   :  { %v2733_v40 = vld [vmem:[#allocation7 + $0xb8] sm:$0xf0]  ;;  %v2691_v43 = vld [vmem:[#allocation7 + $0x60] sm:$0xf]  ;;  %v3703_v44 = vld [vmem:[#allocation7 + $0x6c] sm:$0xf0]  ;;  %v2716_v46 = vor.u32 %v3708_v38, %v2715_v37 }
  0x17   :  { %253 = vmatpush.bf16.msra.mxu0 %v2724_v28  ;;  %291 = vmatpush.bf16.msra.mxu3 %v2752_v34  ;;  %v2736_v42 = vor.u32 %v3710_v39, %v2733_v40  ;;  %v3701_v47 = vld [vmem:[#allocation7 + $0x64] sm:$0xf]  ;;  %v3706_v48 = vld [vmem:[#allocation7 + $0x8c] sm:$0xf]  ;;  %v2717_v49 = vld [vmem:[#allocation7 + $0x98] sm:$0xf0]  ;;  %v2692_v53 = vor.u32 %v3703_v44, %v2691_v43 }
  0x18   :  { %266 = vmatpush.bf16.msra.mxu1 %v2728_v32  ;;  %v2693_v50 = vld [vmem:[#allocation7 + $0x70] sm:$0xf0]  ;;  %v2699_v51 = vld [vmem:[#allocation7 + $0x68] sm:$0xf]  ;;  %v3704_v52 = vld [vmem:[#allocation7 + $0x74] sm:$0xf0]  ;;  %v2720_v54 = vor.u32 %v3706_v48, %v2717_v49 }
  0x19   :  { %279 = vmatpush.bf16.msra.mxu2 %v2732_v33  ;;  %v2675_v55 = vld [vmem:[#allocation7 + $0x40] sm:$0xf]  ;;  %v3699_v56 = vld [vmem:[#allocation7 + $0x4c] sm:$0xf0]  ;;  %v2696_v57 = vor.u32 %v3701_v47, %v2693_v50  ;;  %v2700_v58 = vor.u32 %v3704_v52, %v2699_v51  ;;  %v3697_v59 = vld [vmem:[#allocation7 + $0x44] sm:$0xf] }
  0x1a   :  { %v3702_v60 = vld [vmem:[#allocation7 + $0x6c] sm:$0xf]  ;;  %v2701_v61 = vld [vmem:[#allocation7 + $0x78] sm:$0xf0]  ;;  %v2677_v62 = vld [vmem:[#allocation7 + $0x50] sm:$0xf0]  ;;  %v2676_v1 = vor.u32 %v3699_v56, %v2675_v55 }
  0x1b   :  { %254 = vmatpush.bf16.msra.mxu0 %v2708_v41  ;;  %292 = vmatpush.bf16.msra.mxu3 %v2736_v42  ;;  %v2683_v63 = vld [vmem:[#allocation7 + $0x48] sm:$0xf]  ;;  %v3700_v0 = vld [vmem:[#allocation7 + $0x54] sm:$0xf0]  ;;  %v2704_v2 = vor.u32 %v3702_v60, %v2701_v61  ;;  %v2659_v3 = vld [vmem:[#allocation7 + $0x20] sm:$0xf]  ;;  %v2680_v5 = vor.u32 %v3697_v59, %v2677_v62 }
  0x1c   :  { %267 = vmatpush.bf16.msra.mxu1 %v2712_v45  ;;  %v3695_v4 = vld [vmem:[#allocation7 + $0x2c] sm:$0xf0]  ;;  %v2684_v6 = vor.u32 %v3700_v0, %v2683_v63  ;;  %v3693_v7 = vld [vmem:[#allocation7 + $0x24] sm:$0xf]  ;;  %v3698_v8 = vld [vmem:[#allocation7 + $0x4c] sm:$0xf] }
  0x1d   :  { %280 = vmatpush.bf16.msra.mxu2 %v2716_v46  ;;  %v2685_v9 = vld [vmem:[#allocation7 + $0x58] sm:$0xf0]  ;;  %v2661_v10 = vld [vmem:[#allocation7 + $0x30] sm:$0xf0]  ;;  %v2667_v11 = vld [vmem:[#allocation7 + $0x28] sm:$0xf]  ;;  %v2660_v13 = vor.u32 %v3695_v4, %v2659_v3 }
  0x1e   :  { %v3696_v12 = vld [vmem:[#allocation7 + $0x34] sm:$0xf0]  ;;  %v2688_v14 = vor.u32 %v3698_v8, %v2685_v9  ;;  %v2643_v15 = vld [vmem:[#allocation7] sm:$0xf]  ;;  %v3691_v16 = vld [vmem:[#allocation7 + $0xc] sm:$0xf0]  ;;  %v2664_v17 = vor.u32 %v3693_v7, %v2661_v10 }
  0x1f   :  { %255 = vmatpush.bf16.msra.mxu0 %v2692_v53  ;;  %293 = vmatpush.bf16.msra.mxu3 %v2720_v54  ;;  %v2668_v18 = vor.u32 %v3696_v12, %v2667_v11  ;;  %v3689_v19 = vld [vmem:[#allocation7 + $0x4] sm:$0xf]  ;;  %v3694_v20 = vld [vmem:[#allocation7 + $0x2c] sm:$0xf]  ;;  %v2669_v21 = vld [vmem:[#allocation7 + $0x38] sm:$0xf0]  ;;  %v2644_v25 = vor.u32 %v3691_v16, %v2643_v15 }
  0x20   :  { %268 = vmatpush.bf16.msra.mxu1 %v2696_v57  ;;  %v2645_v22 = vld [vmem:[#allocation7 + $0x10] sm:$0xf0]  ;;  %v2651_v23 = vld [vmem:[#allocation7 + $0x8] sm:$0xf]  ;;  %v3692_v24 = vld [vmem:[#allocation7 + $0x14] sm:$0xf0]  ;;  %v2672_v26 = vor.u32 %v3694_v20, %v2669_v21 }
  0x21   :  { %281 = vmatpush.bf16.msra.mxu2 %v2700_v58  ;;  %v2648_v27 = vor.u32 %v3689_v19, %v2645_v22  ;;  %v2652_v28 = vor.u32 %v3692_v24, %v2651_v23  ;;  %v3690_v29 = vld [vmem:[#allocation7 + $0xc] sm:$0xf]  ;;  %v2653_v30 = vld [vmem:[#allocation7 + $0x18] sm:$0xf0]  ;;  %v4163_v32 = vmov 0.0|0.0   ;;  %v52_v4 = vld [vmem:[#allocation4] sm:$0xff] }
  0x22   :  { %v2656_v31 = vor.u32 %v3690_v29, %v2653_v30  ;;  %v2886_v33 = vld [vmem:[#allocation7 + $0xe0] sm:$0xf]  ;;  %v3751_v34 = vld [vmem:[#allocation7 + $0xec] sm:$0xf0]  ;;  %v3749_v35 = vld [vmem:[#allocation7 + $0xe4] sm:$0xf]  ;;  %v55_v19 = vunpack.c.h.bf16 %v52_v4 }
  0x23   :  { %256 = vmatpush.bf16.msra.mxu0 %v2676_v1  ;;  %294 = vmatpush.bf16.msra.mxu3 %v2704_v2  ;;  %v2887_v36 = vor.u32 %v3751_v34, %v2886_v33  ;;  %v2888_v37 = vld [vmem:[#allocation7 + $0xf0] sm:$0xf0]  ;;  %v2894_v38 = vld [vmem:[#allocation7 + $0xe8] sm:$0xf]  ;;  %v3752_v39 = vld [vmem:[#allocation7 + $0xf4] sm:$0xf0] }
  0x24   :  { %269 = vmatpush.bf16.msra.mxu1 %v2680_v5  ;;  %v2891_v40 = vor.u32 %v3749_v35, %v2888_v37  ;;  %v2895_v41 = vor.u32 %v3752_v39, %v2894_v38  ;;  %v3750_v42 = vld [vmem:[#allocation7 + $0xec] sm:$0xf]  ;;  %v2896_v43 = vld [vmem:[#allocation7 + $0xf8] sm:$0xf0]  ;;  %v2870_v45 = vld [vmem:[#allocation7 + $0xc0] sm:$0xf] }
  0x25   :  { %282 = vmatpush.bf16.msra.mxu2 %v2684_v6  ;;  %v2899_v44 = vor.u32 %v3750_v42, %v2896_v43  ;;  %v3747_v46 = vld [vmem:[#allocation7 + $0xcc] sm:$0xf0]  ;;  %v3745_v47 = vld [vmem:[#allocation7 + $0xc4] sm:$0xf]  ;;  %v2872_v49 = vld [vmem:[#allocation7 + $0xd0] sm:$0xf0] }
  0x26   :  { %v2871_v48 = vor.u32 %v3747_v46, %v2870_v45  ;;  %v2878_v50 = vld [vmem:[#allocation7 + $0xc8] sm:$0xf]  ;;  %v3748_v51 = vld [vmem:[#allocation7 + $0xd4] sm:$0xf0]  ;;  %v2875_v52 = vor.u32 %v3745_v47, %v2872_v49  ;;  %v3746_v54 = vld [vmem:[#allocation7 + $0xcc] sm:$0xf] }
  0x27   :  { %257 = vmatpush.bf16.msra.mxu0 %v2660_v13  ;;  %295 = vmatpush.bf16.msra.mxu3 %v2688_v14  ;;  %v2879_v53 = vor.u32 %v3748_v51, %v2878_v50  ;;  %v2880_v55 = vld [vmem:[#allocation7 + $0xd8] sm:$0xf0]  ;;  %v2854_v57 = vld [vmem:[#allocation7 + $0xa0] sm:$0xf]  ;;  %v3743_v58 = vld [vmem:[#allocation7 + $0xac] sm:$0xf0] }
  0x28   :  { %270 = vmatpush.bf16.msra.mxu1 %v2664_v17  ;;  %v2883_v56 = vor.u32 %v3746_v54, %v2880_v55  ;;  %v3741_v59 = vld [vmem:[#allocation7 + $0xa4] sm:$0xf]  ;;  %v2855_v60 = vor.u32 %v3743_v58, %v2854_v57  ;;  %v2856_v61 = vld [vmem:[#allocation7 + $0xb0] sm:$0xf0]  ;;  %v2862_v62 = vld [vmem:[#allocation7 + $0xa8] sm:$0xf]  ;;  %v54_v17 = vunpack.c.l.bf16 %v52_v4 }
  0x29   :  { %283 = vmatpush.bf16.msra.mxu2 %v2668_v18  ;;  %v3744_v63 = vld [vmem:[#allocation7 + $0xb4] sm:$0xf0]  ;;  %v2859_v0 = vor.u32 %v3741_v59, %v2856_v61  ;;  %v3742_v2 = vld [vmem:[#allocation7 + $0xac] sm:$0xf]  ;;  %v2864_v3 = vld [vmem:[#allocation7 + $0xb8] sm:$0xf0] }
  0x2a   :  { %v2863_v1 = vor.u32 %v3744_v63, %v2862_v62  ;;  %v2867_v5 = vor.u32 %v3742_v2, %v2864_v3  ;;  %v2838_v6 = vld [vmem:[#allocation7 + $0x80] sm:$0xf]  ;;  %v3739_v7 = vld [vmem:[#allocation7 + $0x8c] sm:$0xf0]  ;;  %v3737_v8 = vld [vmem:[#allocation7 + $0x84] sm:$0xf] }
  0x2b   :  { %258 = vmatpush.bf16.msra.mxu0 %v2644_v25  ;;  %296 = vmatpush.bf16.msra.mxu3 %v2672_v26  ;;  %v2839_v9 = vor.u32 %v3739_v7, %v2838_v6  ;;  %v2840_v10 = vld [vmem:[#allocation7 + $0x90] sm:$0xf0]  ;;  %v2846_v11 = vld [vmem:[#allocation7 + $0x88] sm:$0xf]  ;;  %v3740_v12 = vld [vmem:[#allocation7 + $0x94] sm:$0xf0] }
  0x2c   :  { %271 = vmatpush.bf16.msra.mxu1 %v2648_v27  ;;  %v2843_v13 = vor.u32 %v3737_v8, %v2840_v10  ;;  %v2847_v14 = vor.u32 %v3740_v12, %v2846_v11  ;;  %v3738_v15 = vld [vmem:[#allocation7 + $0x8c] sm:$0xf]  ;;  %v2848_v16 = vld [vmem:[#allocation7 + $0x98] sm:$0xf0]  ;;  %v2822_v20 = vld [vmem:[#allocation7 + $0x60] sm:$0xf] }
  0x2d   :  { %284 = vmatpush.bf16.msra.mxu2 %v2652_v28  ;;  %v2851_v18 = vor.u32 %v3738_v15, %v2848_v16  ;;  %v3735_v21 = vld [vmem:[#allocation7 + $0x6c] sm:$0xf0]  ;;  %v3733_v22 = vld [vmem:[#allocation7 + $0x64] sm:$0xf]  ;;  %v2824_v24 = vld [vmem:[#allocation7 + $0x70] sm:$0xf0] }
  0x2e   :  { %259 = vmatmul.bf16.vlgmr.msra.gmra.mxu0 %v4163_v32  ;;  %v2823_v23 = vor.u32 %v3735_v21, %v2822_v20  ;;  %v2830_v25 = vld [vmem:[#allocation7 + $0x68] sm:$0xf]  ;;  %v3736_v26 = vld [vmem:[#allocation7 + $0x74] sm:$0xf0]  ;;  %v2827_v28 = vor.u32 %v3733_v22, %v2824_v24  ;;  %v3734_v30 = vld [vmem:[#allocation7 + $0x6c] sm:$0xf] }
  0x2f   :  { %272 = vmatmul.bf16.vlgmr.msra.gmra.mxu1 %v4163_v32  ;;  %297 = vmatpush.bf16.msra.mxu3 %v2656_v31  ;;  %v2831_v29 = vor.u32 %v3736_v26, %v2830_v25  ;;  %v2832_v31 = vld [vmem:[#allocation7 + $0x78] sm:$0xf0]  ;;  %v4188_v34 = vld [vmem:[#allocation4 + $0x8] sm:$0xff]  ;;  %v2806_v37 = vld [vmem:[#allocation7 + $0x40] sm:$0xf]  ;;  %s4164_s0 = smov [#allocation9]  }
  0x30   :  { %285 = vmatmul.bf16.vlgmr.msra.gmra.mxu2 %v4163_v32  ;;  %571 = vmatpush.bf16.msrb.mxu0 %v2887_v36  ;;  %v2835_v35 = vor.u32 %v3734_v30, %v2832_v31  ;;  %v3731_v38 = vld [vmem:[#allocation7 + $0x4c] sm:$0xf0]  ;;  %v3729_v39 = vld [vmem:[#allocation7 + $0x44] sm:$0xf]  ;;  %v2808_v42 = vld [vmem:[#allocation7 + $0x50] sm:$0xf0]  ;;  %v56_v45 = vunpack.c.l.bf16 %v4188_v34  ;;  %v57_v22 = vunpack.c.h.bf16 %v4188_v34 }
  0x31   :  { %584 = vmatpush.bf16.msrb.mxu1 %v2891_v40  ;;  %597 = vmatpush.bf16.msrb.mxu2 %v2895_v41  ;;  %v2807_v41 = vor.u32 %v3731_v38, %v2806_v37  ;;  %v2814_v43 = vld [vmem:[#allocation7 + $0x48] sm:$0xf]  ;;  %v2811_v46 = vor.u32 %v3729_v39, %v2808_v42  ;;  %v3732_v47 = vld [vmem:[#allocation7 + $0x54] sm:$0xf0]  ;;  %v2816_v50 = vld [vmem:[#allocation7 + $0x58] sm:$0xf0] }
  0x32   :  { %298 = vmatmul.bf16.vlgmr.msra.gmra.mxu3 %v4163_v32  ;;  %v2815_v49 = vor.u32 %v3732_v47, %v2814_v43  ;;  %v2790_v51 = vld [vmem:[#allocation7 + $0x20] sm:$0xf]  ;;  %v3725_v55 = vld [vmem:[#allocation7 + $0x24] sm:$0xf]  ;;  %v2798_v57 = vld [vmem:[#allocation7 + $0x28] sm:$0xf] }
  0x33   :  { %610 = vmatpush.bf16.msrb.mxu3 %v2899_v44  ;;  %v3726_v61 = vld [vmem:[#allocation7 + $0x2c] sm:$0xf]  ;;  %v2800_v62 = vld [vmem:[#allocation7 + $0x38] sm:$0xf0]  ;;  %v2774_v3 = vld [vmem:[#allocation7] sm:$0xf] }
  0x34   :  { %572 = vmatpush.bf16.msrb.mxu0 %v2871_v48  ;;  %v3730_v48 = vld [vmem:[#allocation7 + $0x4c] sm:$0xf]  ;;  %v2803_v2 = vor.u32 %v3726_v61, %v2800_v62  ;;  %v3723_v4 = vld [vmem:[#allocation7 + $0xc] sm:$0xf0]  ;;  %v2776_v8 = vld [vmem:[#allocation7 + $0x10] sm:$0xf0] }
  0x35   :  { %585 = vmatpush.bf16.msrb.mxu1 %v2875_v52  ;;  %598 = vmatpush.bf16.msrb.mxu2 %v2879_v53  ;;  %v3727_v52 = vld [vmem:[#allocation7 + $0x2c] sm:$0xf0]  ;;  %v2819_v53 = vor.u32 %v3730_v48, %v2816_v50  ;;  %v2775_v7 = vor.u32 %v3723_v4, %v2774_v3  ;;  %v3724_v10 = vld [vmem:[#allocation7 + $0x14] sm:$0xf0]  ;;  %v3781_v3 = vld [vmem:[#allocation7 + $0xe4] sm:$0xf] }
  0x36   :  { %v2791_v54 = vor.u32 %v3727_v52, %v2790_v51  ;;  %s2625_s1 = sshll.u32 %s4164_s0, 4  ;;  %s2627_s23 = sshll.u32 %s4249_s2, 4  ;;  %s2626_s1 = int_to_ptr.vmem [resolvable:$true] %s2625_s1  ;;  %s2628_s23 = int_to_ptr.hbm [resolvable:$true] %s2627_s23 }
  0x37   :  { %611 = vmatpush.bf16.msrb.mxu3 %v2883_v56  ;;  %v2792_v56 = vld [vmem:[#allocation7 + $0x30] sm:$0xf0]  ;;  %s4165_s24 = smov 64   ;;  %s4166_s25 = smov 4  }
  0x38   :  { %573 = vmatpush.bf16.msrb.mxu0 %v2855_v60  ;;  %v2795_v59 = vor.u32 %v3725_v55, %v2792_v56  ;;  %v3728_v60 = vld [vmem:[#allocation7 + $0x34] sm:$0xf0] }
  0x39   :  { %586 = vmatpush.bf16.msrb.mxu1 %v2859_v0  ;;  %599 = vmatpush.bf16.msrb.mxu2 %v2863_v1  ;;  %v2799_v1 = vor.u32 %v3728_v60, %v2798_v57 }
  0x3b   :  { %612 = vmatpush.bf16.msrb.mxu3 %v2867_v5  ;;  %v3721_v5 = vld [vmem:[#allocation7 + $0x4] sm:$0xf] }
  0x3c   :  { %574 = vmatpush.bf16.msrb.mxu0 %v2839_v9  ;;  %v2782_v9 = vld [vmem:[#allocation7 + $0x8] sm:$0xf]  ;;  %v2779_v12 = vor.u32 %v3721_v5, %v2776_v8  ;;  %v3019_v5 = vld [vmem:[#allocation7 + $0xf0] sm:$0xf0] }
  0x3d   :  { %587 = vmatpush.bf16.msrb.mxu1 %v2843_v13  ;;  %600 = vmatpush.bf16.msrb.mxu2 %v2847_v14  ;;  %v3722_v13 = vld [vmem:[#allocation7 + $0xc] sm:$0xf]  ;;  %v2784_v14 = vld [vmem:[#allocation7 + $0x18] sm:$0xf0]  ;;  %v3022_v8 = vor.u32 %v3781_v3, %v3019_v5 }
  0x3e   :  { %v2787_v20 = vor.u32 %v3722_v13, %v2784_v14  ;;  %v3001_v13 = vld [vmem:[#allocation7 + $0xc0] sm:$0xf]  ;;  %v3779_v14 = vld [vmem:[#allocation7 + $0xcc] sm:$0xf0] }
  0x3f   :  { %613 = vmatpush.bf16.msrb.mxu3 %v2851_v18 }
  0x40   :  { %575 = vmatpush.bf16.msrb.mxu0 %v2823_v23 }
  0x41   :  { %588 = vmatpush.bf16.msrb.mxu1 %v2827_v28  ;;  %601 = vmatpush.bf16.msrb.mxu2 %v2831_v29 }
  0x43   :  { %614 = vmatpush.bf16.msrb.mxu3 %v2835_v35 }
  0x44   :  { %576 = vmatpush.bf16.msrb.mxu0 %v2807_v41 }
  0x45   :  { %589 = vmatpush.bf16.msrb.mxu1 %v2811_v46  ;;  %602 = vmatpush.bf16.msrb.mxu2 %v2815_v49 }
  0x47   :  { %615 = vmatpush.bf16.msrb.mxu3 %v2819_v53 }
  0x48   :  { %577 = vmatpush.bf16.msrb.mxu0 %v2791_v54 }
  0x49   :  { %590 = vmatpush.bf16.msrb.mxu1 %v2795_v59  ;;  %603 = vmatpush.bf16.msrb.mxu2 %v2799_v1  ;;  %v3017_v1 = vld [vmem:[#allocation7 + $0xe0] sm:$0xf] }
  0x4b   :  { %616 = vmatpush.bf16.msrb.mxu3 %v2803_v2  ;;  %v3783_v2 = vld [vmem:[#allocation7 + $0xec] sm:$0xf0] }
  0x4c   :  { %578 = vmatpush.bf16.msrb.mxu0 %v2775_v7  ;;  %v3018_v4 = vor.u32 %v3783_v2, %v3017_v1  ;;  %v3784_v7 = vld [vmem:[#allocation7 + $0xf4] sm:$0xf0]  ;;  %v2963_v1 = vld [vmem:[#allocation7 + $0x78] sm:$0xf0] }
  0x4d   :  { %591 = vmatpush.bf16.msrb.mxu1 %v2779_v12 }
  0x4f   :  { %617 = vmatpush.bf16.msrb.mxu3 %v2787_v20 }
  0x50   :  { %892 = vmatpush.bf16.msra.mxu0 %v3018_v4  ;;  %v4195_v4 = vld [vmem:[#allocation4 + $0x18] sm:$0xff] }
  0x51   :  { %905 = vmatpush.bf16.msra.mxu1 %v3022_v8  ;;  %v3761_v8 = vld [vmem:[#allocation7 + $0x44] sm:$0xf] }
  0xab   :  { %v260_v27 = vpop.f32.mrf.mxu0 }
  0xac   :  { %v303_v32 = vadd.f32 %v260_v27, %v54_v17  ;;  %v273_v33 = vpop.f32.mrf.mxu1  ;;  %v2783_v17 = vor.u32 %v3724_v10, %v2782_v9  ;;  %v3782_v10 = vld [vmem:[#allocation7 + $0xec] sm:$0xf] }
  0xad   :  { %v304_v36 = vadd.f32 %v273_v33, %v55_v19 }
  0xae   :  { %v2769_v40 = vmul.f32 -1.442695, %v303_v32  ;;  %604 = vmatpush.bf16.msrb.mxu2 %v2783_v17  ;;  %v3003_v17 = vld [vmem:[#allocation7 + $0xd0] sm:$0xf0] }
  0xaf   :  { %v2770_v44 = vmul.f32 -1.442695, %v304_v36 }
  0xb0   :  { %3953 = vpow2.f32 %v2769_v40 }
  0xb1   :  { %3955 = vpow2.f32 %v2770_v44 }
  0xb3   :  { %v286_v58 = vpop.f32.mrf.mxu2  ;;  %v262_v0 = vpop.f32.mrf.mxu0 }
  0xb4   :  { %v305_v63 = vadd.f32 %v286_v58, %v56_v45  ;;  %v275_v6 = vpop.f32.mrf.mxu1 }
  0xb5   :  { %v299_v16 = vpop.f32.mrf.mxu3  ;;  %v3025_v6 = vld [vmem:[#allocation7 + $0xe8] sm:$0xf] }
  0xb6   :  { %v2771_v11 = vmul.f32 -1.442695, %v305_v63  ;;  %v3954_v15 = vpop.eup %3953  ;;  %v306_v26 = vadd.f32 %v299_v16, %v57_v22  ;;  %v3026_v9 = vor.u32 %v3784_v7, %v3025_v6  ;;  %v3002_v16 = vor.u32 %v3779_v14, %v3001_v13  ;;  %v3778_v22 = vld [vmem:[#allocation7 + $0xcc] sm:$0xf]  ;;  %v2937_v6 = vld [vmem:[#allocation7 + $0x40] sm:$0xf] }
  0xb7   :  { %v3956_v18 = vpop.eup %3955  ;;  %v310_v19 = vadd.f32 1.0, %v3954_v15  ;;  %v3777_v15 = vld [vmem:[#allocation7 + $0xc4] sm:$0xf]  ;;  %v3763_v7 = vld [vmem:[#allocation7 + $0x4c] sm:$0xf0]  ;;  %v377_v13 = vunpack.c.l.bf16 %v4195_v4 }
  0xb8   :  { %3957 = vpow2.f32 %v2771_v11  ;;  %v329_v21 = vadd.f32 1.0, %v3956_v18  ;;  %v3027_v11 = vld [vmem:[#allocation7 + $0xf8] sm:$0xf0]  ;;  %918 = vmatpush.bf16.msra.mxu2 %v3026_v9  ;;  %v3009_v18 = vld [vmem:[#allocation7 + $0xc8] sm:$0xf]  ;;  %v3006_v20 = vor.u32 %v3777_v15, %v3003_v17  ;;  %893 = vmatpush.bf16.msra.mxu0 %v3002_v16 }
  0xb9   :  { %3959 = vrcp.f32 %v310_v19  ;;  %v322_v33 = vand.u32 2147483648, %v310_v19  ;;  %v320_v37 = vand.u32 2147483647, %v310_v19  ;;  %vm316_vm2 = vweird.f32 %v310_v19  ;;  %v2945_v15 = vld [vmem:[#allocation7 + $0x48] sm:$0xf] }
  0xba   :  { %3961 = vrcp.f32 %v329_v21  ;;  %v341_v34 = vand.u32 2147483648, %v329_v21  ;;  %v339_v39 = vand.u32 2147483647, %v329_v21  ;;  %vm335_vm4 = vweird.f32 %v329_v21  ;;  %906 = vmatpush.bf16.msra.mxu1 %v3006_v20  ;;  %v3764_v16 = vld [vmem:[#allocation7 + $0x54] sm:$0xf0] }
  0xbb   :  { %v288_v23 = vpop.f32.mrf.mxu2  ;;  %v323_v42 = vor.u32 1.1754944e-38, %v322_v33  ;;  %vm321_vm5 = vcmp.eq.f32.partialorder %v320_v37, 8.507059e+37  ;;  %v3030_v12 = vor.u32 %v3782_v10, %v3027_v11  ;;  %v373_v37 = vld [vmem:[#allocation4 + $0x10] sm:$0xff]  ;;  %v2938_v11 = vor.u32 %v3763_v7, %v2937_v6  ;;  %v3762_v17 = vld [vmem:[#allocation7 + $0x4c] sm:$0xf] }
  0xbc   :  { %v342_v47 = vor.u32 1.1754944e-38, %v341_v34  ;;  %vm340_vm7 = vcmp.eq.f32.partialorder %v339_v39, 8.507059e+37  ;;  %v3011_v23 = vld [vmem:[#allocation7 + $0xd8] sm:$0xf0]  ;;  %v3771_v39 = vld [vmem:[#allocation7 + $0x8c] sm:$0xf0] }
  0xbd   :  { %v301_v27 = vpop.f32.mrf.mxu3  ;;  %931 = vmatpush.bf16.msra.mxu3 %v3030_v12  ;;  %v2939_v12 = vld [vmem:[#allocation7 + $0x50] sm:$0xf0]  ;;  %v2921_v20 = vld [vmem:[#allocation7 + $0x20] sm:$0xf] }
  0xbe   :  { %v3958_v24 = vpop.eup %3957  ;;  %v3773_v27 = vld [vmem:[#allocation7 + $0xa4] sm:$0xf]  ;;  %v2942_v14 = vor.u32 %v3761_v8, %v2939_v12 }
  0xbf   :  { %v348_v25 = vadd.f32 1.0, %v3958_v24  ;;  %v3960_v28 = vpop.eup %3959  ;;  %v3014_v24 = vor.u32 %v3778_v22, %v3011_v23 }
  0xc0   :  { %v3962_v29 = vpop.eup %3961  ;;  %v312_v30 = vmul.f32 %v3960_v28, %v310_v19  ;;  %vm317_vm0 = vweird.f32 %v3960_v28  ;;  %v3780_v19 = vld [vmem:[#allocation7 + $0xd4] sm:$0xf0] }
  0xc1   :  { %3963 = vrcp.f32 %v348_v25  ;;  %v331_v31 = vmul.f32 %v3962_v29, %v329_v21  ;;  %vm336_vm1 = vweird.f32 %v3962_v29  ;;  %vm318_vm3 = vmor %vm316_vm2, %vm317_vm0  ;;  %v360_v57 = vand.u32 2147483648, %v348_v25  ;;  %932 = vmatpush.bf16.msra.mxu3 %v3014_v24  ;;  %v3757_v24 = vld [vmem:[#allocation7 + $0x24] sm:$0xf] }
  0xc2   :  { %v313_v32 = vsub.f32 1.0, %v312_v30  ;;  %3965 = vtanh.f32 %v306_v26  ;;  %vm337_vm6 = vmor %vm335_vm4, %vm336_vm1  ;;  %vm354_vm9 = vweird.f32 %v348_v25  ;;  %v358_v58 = vand.u32 2147483647, %v348_v25  ;;  %v3775_v26 = vld [vmem:[#allocation7 + $0xac] sm:$0xf0] }
  0xc3   :  { %v332_v35 = vsub.f32 1.0, %v331_v31  ;;  %v361_v60 = vor.u32 1.1754944e-38, %v360_v57  ;;  %v3010_v21 = vor.u32 %v3780_v19, %v3009_v18  ;;  %v2993_v30 = vld [vmem:[#allocation7 + $0xa8] sm:$0xf]  ;;  %v3776_v31 = vld [vmem:[#allocation7 + $0xb4] sm:$0xf0]  ;;  %v2946_v18 = vor.u32 %v3764_v16, %v2945_v15 }
  0xc4   :  { %v314_v36 = vmul.f32 %v3960_v28, %v313_v32  ;;  %vm359_vm11 = vcmp.eq.f32.partialorder %v358_v58, 8.507059e+37  ;;  %v2994_v33 = vor.u32 %v3776_v31, %v2993_v30  ;;  %v2955_v57 = vld [vmem:[#allocation7 + $0x70] sm:$0xf0]  ;;  %v2961_v58 = vld [vmem:[#allocation7 + $0x68] sm:$0xf] }
  0xc5   :  { %v333_v38 = vmul.f32 %v3962_v29, %v332_v35  ;;  %919 = vmatpush.bf16.msra.mxu2 %v3010_v21  ;;  %v3774_v35 = vld [vmem:[#allocation7 + $0xac] sm:$0xf]  ;;  %v2947_v19 = vld [vmem:[#allocation7 + $0x58] sm:$0xf0]  ;;  %v3759_v21 = vld [vmem:[#allocation7 + $0x2c] sm:$0xf0] }
  0xc6   :  { %v315_v41 = vadd.f32 %v3960_v28, %v314_v36  ;;  %v2995_v36 = vld [vmem:[#allocation7 + $0xb8] sm:$0xf0]  ;;  %v2950_v22 = vor.u32 %v3762_v17, %v2947_v19  ;;  %v2922_v23 = vor.u32 %v3759_v21, %v2921_v20  ;;  %v3760_v30 = vld [vmem:[#allocation7 + $0x34] sm:$0xf0]  ;;  %v3758_v31 = vld [vmem:[#allocation7 + $0x2c] sm:$0xf] }
  0xc7   :  { %v3964_v40 = vpop.eup %3963  ;;  %v334_v44 = vadd.f32 %v3962_v29, %v333_v38  ;;  %v2998_v34 = vor.u32 %v3774_v35, %v2995_v36  ;;  %v2969_v38 = vld [vmem:[#allocation7 + $0x80] sm:$0xf] }
  0xc8   :  { %v350_v43 = vmul.f32 %v3964_v40, %v348_v25  ;;  %v3966_v45 = vpop.eup %3965  ;;  %v319_v46 = vsel %vm318_vm3, %v3960_v28, %v315_v41  ;;  %vm355_vm8 = vweird.f32 %v3964_v40  ;;  %v2985_v25 = vld [vmem:[#allocation7 + $0xa0] sm:$0xf]  ;;  %v2970_v41 = vor.u32 %v3771_v39, %v2969_v38  ;;  %v3755_v39 = vld [vmem:[#allocation7 + $0xc] sm:$0xf0] }
  0xc9   :  { %v324_v49 = vsel %vm321_vm5, %v323_v42, %v319_v46  ;;  %v338_v50 = vsel %vm337_vm6, %v3962_v29, %v334_v44  ;;  %vm356_vm10 = vmor %vm354_vm9, %vm355_vm8  ;;  %v2986_v28 = vor.u32 %v3775_v26, %v2985_v25  ;;  %v2987_v29 = vld [vmem:[#allocation7 + $0xb0] sm:$0xf0]  ;;  %920 = vmatpush.bf16.msra.mxu2 %v2994_v33  ;;  %933 = vmatpush.bf16.msra.mxu3 %v2998_v34  ;;  %v3772_v44 = vld [vmem:[#allocation7 + $0x94] sm:$0xf0] }
  0xca   :  { %v351_v48 = vsub.f32 1.0, %v350_v43  ;;  %v343_v51 = vsel %vm340_vm7, %v342_v47, %v338_v50  ;;  %v366_v52 = vmul.f32 0.0, %v324_v49  ;;  %v2990_v32 = vor.u32 %v3773_v27, %v2987_v29  ;;  %v2971_v42 = vld [vmem:[#allocation7 + $0x90] sm:$0xf0]  ;;  %v2977_v43 = vld [vmem:[#allocation7 + $0x88] sm:$0xf] }
  0xcb   :  { %v365_v54 = vmul.f32 %v3966_v45, %v343_v51  ;;  %894 = vmatpush.bf16.msra.mxu0 %v2986_v28  ;;  %v2978_v46 = vor.u32 %v3772_v44, %v2977_v43  ;;  %v3770_v47 = vld [vmem:[#allocation7 + $0x8c] sm:$0xf]  ;;  %v375_v49 = vunpack.c.l.bf16 %v373_v37  ;;  %v376_v50 = vunpack.c.h.bf16 %v373_v37  ;;  %v2923_v25 = vld [vmem:[#allocation7 + $0x30] sm:$0xf0]  ;;  %v2929_v26 = vld [vmem:[#allocation7 + $0x28] sm:$0xf] }
  0xcc   :  { %v352_v53 = vmul.f32 %v3964_v40, %v351_v48  ;;  %907 = vmatpush.bf16.msra.mxu1 %v2990_v32  ;;  %v2979_v48 = vld [vmem:[#allocation7 + $0x98] sm:$0xf0]  ;;  %v2926_v29 = vor.u32 %v3757_v24, %v2923_v25  ;;  %v2930_v37 = vor.u32 %v3760_v30, %v2929_v26  ;;  %v2905_v38 = vld [vmem:[#allocation7] sm:$0xf]  ;;  %v2913_v43 = vld [vmem:[#allocation7 + $0x8] sm:$0xf] }
  0xcd   :  { %v4192_v55 = vadd.f32 %v366_v52, %v365_v54  ;;  %v2982_v51 = vor.u32 %v3770_v47, %v2979_v48  ;;  %921 = vmatpush.bf16.msra.mxu2 %v2978_v46  ;;  %v2953_v52 = vld [vmem:[#allocation7 + $0x60] sm:$0xf]  ;;  %v3765_v54 = vld [vmem:[#allocation7 + $0x64] sm:$0xf]  ;;  %v2931_v32 = vld [vmem:[#allocation7 + $0x38] sm:$0xf0] }
  0xce   :  { %v353_v56 = vadd.f32 %v3964_v40, %v352_v53  ;;  %v3767_v53 = vld [vmem:[#allocation7 + $0x6c] sm:$0xf0]  ;;  %v2934_v34 = vor.u32 %v3758_v31, %v2931_v32  ;;  %v3756_v44 = vld [vmem:[#allocation7 + $0x14] sm:$0xf0]  ;;  %v3754_v47 = vld [vmem:[#allocation7 + $0xc] sm:$0xf] }
  0xcf   :  { %3967 = vtanh.f32 %v4192_v55  ;;  %895 = vmatpush.bf16.msra.mxu0 %v2970_v41  ;;  %934 = vmatpush.bf16.msra.mxu3 %v2982_v51  ;;  %v2906_v41 = vor.u32 %v3755_v39, %v2905_v38  ;;  %v2915_v48 = vld [vmem:[#allocation7 + $0x18] sm:$0xf0]  ;;  %v3150_v38 = vld [vmem:[#allocation7 + $0xf0] sm:$0xf0]  ;;  %v3156_v39 = vld [vmem:[#allocation7 + $0xe8] sm:$0xf] }
  0xd0   :  { %v357_v59 = vsel %vm356_vm10, %v3964_v40, %v353_v56  ;;  %v3769_v40 = vld [vmem:[#allocation7 + $0x84] sm:$0xf]  ;;  %v2954_v56 = vor.u32 %v3767_v53, %v2953_v52  ;;  %v2918_v53 = vor.u32 %v3754_v47, %v2915_v48  ;;  %v3811_v47 = vld [vmem:[#allocation7 + $0xcc] sm:$0xf0] }
  0xd1   :  { %v362_v62 = vsel %vm359_vm11, %v361_v60, %v357_v59  ;;  %v2974_v45 = vor.u32 %v3769_v40, %v2971_v42  ;;  %v3768_v59 = vld [vmem:[#allocation7 + $0x74] sm:$0xf0]  ;;  %v3753_v40 = vld [vmem:[#allocation7 + $0x4] sm:$0xf]  ;;  %v2907_v42 = vld [vmem:[#allocation7 + $0x10] sm:$0xf0] }
  0xd2   :  { %v2910_v46 = vor.u32 %v3753_v40, %v2907_v42  ;;  %v3816_v40 = vld [vmem:[#allocation7 + $0xf4] sm:$0xf0]  ;;  %v3809_v48 = vld [vmem:[#allocation7 + $0xc4] sm:$0xf] }
  0xd3   :  { %908 = vmatpush.bf16.msra.mxu1 %v2974_v45  ;;  %896 = vmatpush.bf16.msra.mxu0 %v2954_v56  ;;  %v3157_v42 = vor.u32 %v3816_v40, %v3156_v39  ;;  %v3068_v39 = vld [vmem:[#allocation7 + $0x40] sm:$0xf]  ;;  %v3795_v40 = vld [vmem:[#allocation7 + $0x4c] sm:$0xf0] }
  0xd5   :  { %v3968_v61 = vpop.eup %3967 }
  0xd6   :  { %v369_v63 = vmul.f32 %v3968_v61, %v362_v62  ;;  %v2958_v62 = vor.u32 %v3765_v54, %v2955_v57 }
  0xd7   :  { %897 = vmatpush.bf16.msra.mxu0 %v2938_v11 }
  0xd8   :  { %v370_v0 = vpack.c.bf16 %v369_v63, %v369_v63  ;;  %v2962_v63 = vor.u32 %v3768_v59, %v2961_v58  ;;  %909 = vmatpush.bf16.msra.mxu1 %v2958_v62  ;;  %v378_v58 = vunpack.c.h.bf16 %v4195_v4 }
  0xda   :  { %371 = vst [vmem:[#allocation9] sm:$0xf] %v370_v0  ;;  %579 = vmatmul.bf16.vlgmr.msrb.gmra.mxu0 %v370_v0  ;;  %592 = vmatmul.bf16.vlgmr.msrb.gmra.mxu1 %v370_v0 }
  0xdb   :  { %605 = vmatmul.bf16.vlgmr.msrb.gmra.mxu2 %v370_v0  ;;  %618 = vmatmul.bf16.vlgmr.msrb.gmra.mxu3 %v370_v0  ;;  %v3766_v0 = vld [vmem:[#allocation7 + $0x6c] sm:$0xf] }
  0xdc   :  { %v2966_v5 = vor.u32 %v3766_v0, %v2963_v1  ;;  %922 = vmatpush.bf16.msra.mxu2 %v2962_v63  ;;  %910 = vmatpush.bf16.msra.mxu1 %v2942_v14 }
  0xdd   :  { %898 = vmatpush.bf16.msra.mxu0 %v2922_v23 }
  0xde   :  { %935 = vmatpush.bf16.msra.mxu3 %v2966_v5 }
  0xe0   :  { %923 = vmatpush.bf16.msra.mxu2 %v2946_v18  ;;  %911 = vmatpush.bf16.msra.mxu1 %v2926_v29 }
  0xe1   :  { %899 = vmatpush.bf16.msra.mxu0 %v2906_v41 }
  0xe2   :  { %936 = vmatpush.bf16.msra.mxu3 %v2950_v22 }
  0xe4   :  { %924 = vmatpush.bf16.msra.mxu2 %v2930_v37  ;;  %912 = vmatpush.bf16.msra.mxu1 %v2910_v46  ;;  %v3813_v37 = vld [vmem:[#allocation7 + $0xe4] sm:$0xf]  ;;  %v3132_v46 = vld [vmem:[#allocation7 + $0xc0] sm:$0xf] }
  0xe5   :  { %v3153_v41 = vor.u32 %v3813_v37, %v3150_v38 }
  0xe6   :  { %937 = vmatpush.bf16.msra.mxu3 %v2934_v34 }
  0xe8   :  { %1226 = vmatpush.bf16.msrb.mxu1 %v3153_v41  ;;  %v3793_v41 = vld [vmem:[#allocation7 + $0x44] sm:$0xf] }
  0xea   :  { %938 = vmatpush.bf16.msra.mxu3 %v2918_v53 }
 0x157   :  { %v580_v60 = vpop.f32.mrf.mxu0  ;;  %v593_v61 = vpop.f32.mrf.mxu1 }
 0x158   :  { %v623_v2 = vadd.f32 %v580_v60, %v375_v49  ;;  %v624_v3 = vadd.f32 %v593_v61, %v376_v50  ;;  %v2914_v50 = vor.u32 %v3756_v44, %v2913_v43  ;;  %v3814_v43 = vld [vmem:[#allocation7 + $0xec] sm:$0xf]  ;;  %v3158_v44 = vld [vmem:[#allocation7 + $0xf8] sm:$0xf0] }
 0x15a   :  { %v2900_v9 = vmul.f32 -1.442695, %v623_v2  ;;  %v2901_v10 = vmul.f32 -1.442695, %v624_v3  ;;  %925 = vmatpush.bf16.msra.mxu2 %v2914_v50  ;;  %v3134_v50 = vld [vmem:[#allocation7 + $0xd0] sm:$0xf0] }
 0x15b   :  { %v3137_v53 = vor.u32 %v3809_v48, %v3134_v50  ;;  %v3076_v48 = vld [vmem:[#allocation7 + $0x48] sm:$0xf]  ;;  %v3794_v50 = vld [vmem:[#allocation7 + $0x4c] sm:$0xf] }
 0x15c   :  { %3969 = vpow2.f32 %v2900_v9 }
 0x15d   :  { %3971 = vpow2.f32 %v2901_v10  ;;  %1227 = vmatpush.bf16.msrb.mxu1 %v3137_v53  ;;  %v3052_v53 = vld [vmem:[#allocation7 + $0x20] sm:$0xf] }
 0x15e   :  { %v606_v27 = vpop.f32.mrf.mxu2  ;;  %v619_v28 = vpop.f32.mrf.mxu3  ;;  %1239 = vmatpush.bf16.msrb.mxu2 %v3157_v42 }
 0x15f   :  { %v625_v33 = vadd.f32 %v606_v27, %v377_v13  ;;  %v582_v35 = vpop.f32.mrf.mxu0  ;;  %v595_v36 = vpop.f32.mrf.mxu1  ;;  %v626_v62 = vadd.f32 %v619_v28, %v378_v58 }
 0x160   :  { %v3815_v36 = vld [vmem:[#allocation7 + $0xec] sm:$0xf0] }
 0x161   :  { %v2902_v45 = vmul.f32 -1.442695, %v625_v33 }
 0x162   :  { %v3970_v49 = vpop.eup %3969 }
 0x163   :  { %v3972_v51 = vpop.eup %3971  ;;  %v630_v52 = vadd.f32 1.0, %v3970_v49  ;;  %3973 = vpow2.f32 %v2902_v45  ;;  %v3161_v45 = vor.u32 %v3814_v43, %v3158_v44  ;;  %v3133_v49 = vor.u32 %v3811_v47, %v3132_v46 }
 0x164   :  { %v649_v54 = vadd.f32 1.0, %v3972_v51  ;;  %v3140_v51 = vld [vmem:[#allocation7 + $0xc8] sm:$0xf]  ;;  %v3069_v44 = vor.u32 %v3795_v40, %v3068_v39 }
 0x165   :  { %3975 = vrcp.f32 %v630_v52  ;;  %v642_v3 = vand.u32 2147483648, %v630_v52  ;;  %v640_v7 = vand.u32 2147483647, %v630_v52  ;;  %vm636_vm14 = vweird.f32 %v630_v52  ;;  %1252 = vmatpush.bf16.msrb.mxu3 %v3161_v45  ;;  %v3070_v45 = vld [vmem:[#allocation7 + $0x50] sm:$0xf0] }
 0x166   :  { %3977 = vrcp.f32 %v649_v54  ;;  %v608_v56 = vpop.f32.mrf.mxu2  ;;  %v621_v57 = vpop.f32.mrf.mxu3  ;;  %v661_v8 = vand.u32 2147483648, %v649_v54  ;;  %v659_v4 = vand.u32 2147483647, %v649_v54  ;;  %vm655_vm0 = vweird.f32 %v649_v54 }
 0x167   :  { %v643_v12 = vor.u32 1.1754944e-38, %v642_v3  ;;  %vm641_vm1 = vcmp.eq.f32.partialorder %v640_v7, 8.507059e+37  ;;  %v3810_v56 = vld [vmem:[#allocation7 + $0xcc] sm:$0xf]  ;;  %v3142_v57 = vld [vmem:[#allocation7 + $0xd8] sm:$0xf0]  ;;  %v3073_v47 = vor.u32 %v3793_v41, %v3070_v45 }
 0x168   :  { %v662_v16 = vor.u32 1.1754944e-38, %v661_v8  ;;  %vm660_vm3 = vcmp.eq.f32.partialorder %v659_v4, 8.507059e+37  ;;  %v3145_v58 = vor.u32 %v3810_v56, %v3142_v57  ;;  %v694_v7 = vld [vmem:[#allocation4 + $0x20] sm:$0xff]  ;;  %v3803_v4 = vld [vmem:[#allocation7 + $0x8c] sm:$0xf0] }
 0x169   :  { %v3974_v59 = vpop.eup %3973 }
 0x16a   :  { %v668_v60 = vadd.f32 1.0, %v3974_v59  ;;  %v3116_v59 = vld [vmem:[#allocation7 + $0xa0] sm:$0xf]  ;;  %1253 = vmatpush.bf16.msrb.mxu3 %v3145_v58  ;;  %v3789_v58 = vld [vmem:[#allocation7 + $0x24] sm:$0xf] }
 0x16b   :  { %v3976_v61 = vpop.eup %3975 }
 0x16c   :  { %v3978_v63 = vpop.eup %3977  ;;  %v632_v0 = vmul.f32 %v3976_v61, %v630_v52  ;;  %3979 = vrcp.f32 %v668_v60  ;;  %vm637_vm12 = vweird.f32 %v3976_v61  ;;  %v680_v27 = vand.u32 2147483648, %v668_v60  ;;  %v3812_v52 = vld [vmem:[#allocation7 + $0xd4] sm:$0xf0] }
 0x16d   :  { %v651_v1 = vmul.f32 %v3978_v63, %v649_v54  ;;  %3981 = vtanh.f32 %v626_v62  ;;  %vm656_vm13 = vweird.f32 %v3978_v63  ;;  %vm638_vm15 = vmor %vm636_vm14, %vm637_vm12  ;;  %vm674_vm5 = vweird.f32 %v668_v60 }
 0x16e   :  { %v633_v2 = vsub.f32 1.0, %v632_v0  ;;  %vm657_vm2 = vmor %vm655_vm0, %vm656_vm13  ;;  %v678_v28 = vand.u32 2147483647, %v668_v60  ;;  %v681_v30 = vor.u32 1.1754944e-38, %v680_v27  ;;  %v3141_v54 = vor.u32 %v3812_v52, %v3140_v51  ;;  %v3124_v0 = vld [vmem:[#allocation7 + $0xa8] sm:$0xf] }
 0x16f   :  { %v652_v5 = vsub.f32 1.0, %v651_v1  ;;  %v3808_v1 = vld [vmem:[#allocation7 + $0xb4] sm:$0xf0]  ;;  %v3086_v27 = vld [vmem:[#allocation7 + $0x70] sm:$0xf0] }
 0x170   :  { %v634_v6 = vmul.f32 %v3976_v61, %v633_v2  ;;  %vm679_vm7 = vcmp.eq.f32.partialorder %v678_v28, 8.507059e+37  ;;  %1240 = vmatpush.bf16.msrb.mxu2 %v3141_v54  ;;  %v3125_v3 = vor.u32 %v3808_v1, %v3124_v0  ;;  %v3092_v28 = vld [vmem:[#allocation7 + $0x68] sm:$0xf]  ;;  %v3078_v52 = vld [vmem:[#allocation7 + $0x58] sm:$0xf0] }
 0x171   :  { %v653_v9 = vmul.f32 %v3978_v63, %v652_v5  ;;  %v3806_v5 = vld [vmem:[#allocation7 + $0xac] sm:$0xf]  ;;  %v3791_v54 = vld [vmem:[#allocation7 + $0x2c] sm:$0xf0]  ;;  %v3081_v56 = vor.u32 %v3794_v50, %v3078_v52  ;;  %v3792_v0 = vld [vmem:[#allocation7 + $0x34] sm:$0xf0] }
 0x172   :  { %v3980_v10 = vpop.eup %3979  ;;  %v635_v11 = vadd.f32 %v3976_v61, %v634_v6  ;;  %v3126_v6 = vld [vmem:[#allocation7 + $0xb8] sm:$0xf0]  ;;  %v3053_v57 = vor.u32 %v3791_v54, %v3052_v53  ;;  %v3790_v1 = vld [vmem:[#allocation7 + $0x2c] sm:$0xf] }
 0x173   :  { %v670_v13 = vmul.f32 %v3980_v10, %v668_v60  ;;  %v654_v14 = vadd.f32 %v3978_v63, %v653_v9  ;;  %v3982_v17 = vpop.eup %3981  ;;  %vm675_vm4 = vweird.f32 %v3980_v10  ;;  %v3807_v60 = vld [vmem:[#allocation7 + $0xac] sm:$0xf0]  ;;  %v3129_v8 = vor.u32 %v3806_v5, %v3126_v6  ;;  %v3100_v9 = vld [vmem:[#allocation7 + $0x80] sm:$0xf] }
 0x174   :  { %v639_v15 = vsel %vm638_vm15, %v3976_v61, %v635_v11  ;;  %vm676_vm6 = vmor %vm674_vm5, %vm675_vm4  ;;  %v3805_v61 = vld [vmem:[#allocation7 + $0xa4] sm:$0xf]  ;;  %v3117_v62 = vor.u32 %v3807_v60, %v3116_v59  ;;  %1241 = vmatpush.bf16.msrb.mxu2 %v3125_v3  ;;  %v3101_v11 = vor.u32 %v3803_v4, %v3100_v9  ;;  %v3054_v59 = vld [vmem:[#allocation7 + $0x30] sm:$0xf0] }
 0x175   :  { %v671_v18 = vsub.f32 1.0, %v670_v13  ;;  %v644_v19 = vsel %vm641_vm1, %v643_v12, %v639_v15  ;;  %v658_v20 = vsel %vm657_vm2, %v3978_v63, %v654_v14  ;;  %v3118_v63 = vld [vmem:[#allocation7 + $0xb0] sm:$0xf0]  ;;  %1254 = vmatpush.bf16.msrb.mxu3 %v3129_v8  ;;  %v3108_v13 = vld [vmem:[#allocation7 + $0x88] sm:$0xf] }
 0x176   :  { %v663_v21 = vsel %vm660_vm3, %v662_v16, %v658_v20  ;;  %v686_v22 = vmul.f32 %v644_v19, %v4192_v55  ;;  %v3148_v55 = vld [vmem:[#allocation7 + $0xe0] sm:$0xf]  ;;  %v3121_v2 = vor.u32 %v3805_v61, %v3118_v63  ;;  %v3102_v12 = vld [vmem:[#allocation7 + $0x90] sm:$0xf0]  ;;  %v3804_v14 = vld [vmem:[#allocation7 + $0x94] sm:$0xf0]  ;;  %v696_v19 = vunpack.c.l.bf16 %v694_v7 }
 0x177   :  { %v672_v23 = vmul.f32 %v3980_v10, %v671_v18  ;;  %v685_v24 = vmul.f32 %v3982_v17, %v663_v21  ;;  %v3149_v34 = vor.u32 %v3815_v36, %v3148_v55  ;;  %v3109_v16 = vor.u32 %v3804_v14, %v3108_v13  ;;  %v3802_v17 = vld [vmem:[#allocation7 + $0x8c] sm:$0xf]  ;;  %v3110_v18 = vld [vmem:[#allocation7 + $0x98] sm:$0xf0]  ;;  %v3060_v60 = vld [vmem:[#allocation7 + $0x28] sm:$0xf] }
 0x178   :  { %1228 = vmatpush.bf16.msrb.mxu1 %v3121_v2  ;;  %v697_v20 = vunpack.c.h.bf16 %v694_v7  ;;  %v3113_v21 = vor.u32 %v3802_v17, %v3110_v18  ;;  %v3094_v55 = vld [vmem:[#allocation7 + $0x78] sm:$0xf0]  ;;  %v3057_v63 = vor.u32 %v3789_v58, %v3054_v59  ;;  %v3061_v7 = vor.u32 %v3792_v0, %v3060_v60  ;;  %v3036_v9 = vld [vmem:[#allocation7] sm:$0xf]  ;;  %v3787_v4 = vld [vmem:[#allocation7 + $0xc] sm:$0xf0] }
 0x179   :  { %v4200_v25 = vadd.f32 %v686_v22, %v685_v24  ;;  %v673_v26 = vadd.f32 %v3980_v10, %v672_v23  ;;  %1213 = vmatpush.bf16.msrb.mxu0 %v3149_v34  ;;  %1242 = vmatpush.bf16.msrb.mxu2 %v3109_v16  ;;  %v3084_v22 = vld [vmem:[#allocation7 + $0x60] sm:$0xf]  ;;  %v3799_v23 = vld [vmem:[#allocation7 + $0x6c] sm:$0xf0]  ;;  %v3797_v24 = vld [vmem:[#allocation7 + $0x64] sm:$0xf] }
 0x17a   :  { %1255 = vmatpush.bf16.msrb.mxu3 %v3113_v21  ;;  %v4203_v34 = vld [vmem:[#allocation4 + $0x28] sm:$0xff]  ;;  %v3062_v2 = vld [vmem:[#allocation7 + $0x38] sm:$0xf0]  ;;  %v3788_v14 = vld [vmem:[#allocation7 + $0x14] sm:$0xf0] }
 0x17b   :  { %3983 = vtanh.f32 %v4200_v25  ;;  %v677_v29 = vsel %vm676_vm6, %v3980_v10, %v673_v26  ;;  %v3801_v10 = vld [vmem:[#allocation7 + $0x84] sm:$0xf]  ;;  %v3085_v26 = vor.u32 %v3799_v23, %v3084_v22  ;;  %v698_v46 = vunpack.c.l.bf16 %v4203_v34  ;;  %v3044_v13 = vld [vmem:[#allocation7 + $0x8] sm:$0xf]  ;;  %v3786_v17 = vld [vmem:[#allocation7 + $0xc] sm:$0xf] }
 0x17c   :  { %v682_v32 = vsel %vm679_vm7, %v681_v30, %v677_v29  ;;  %v3105_v15 = vor.u32 %v3801_v10, %v3102_v12  ;;  %v3800_v29 = vld [vmem:[#allocation7 + $0x74] sm:$0xf0]  ;;  %v3065_v8 = vor.u32 %v3790_v1, %v3062_v2  ;;  %v3785_v10 = vld [vmem:[#allocation7 + $0x4] sm:$0xf]  ;;  %v3038_v12 = vld [vmem:[#allocation7 + $0x10] sm:$0xf0] }
 0x17d   :  { %1214 = vmatpush.bf16.msrb.mxu0 %v3133_v49  ;;  %v3796_v49 = vld [vmem:[#allocation7 + $0x54] sm:$0xf0]  ;;  %v3041_v16 = vor.u32 %v3785_v10, %v3038_v12  ;;  %v3046_v18 = vld [vmem:[#allocation7 + $0x18] sm:$0xf0] }
 0x17e   :  { %1229 = vmatpush.bf16.msrb.mxu1 %v3105_v15  ;;  %v3077_v51 = vor.u32 %v3796_v49, %v3076_v48  ;;  %v3049_v23 = vor.u32 %v3786_v17, %v3046_v18  ;;  %v3848_v10 = vld [vmem:[#allocation7 + $0xf4] sm:$0xf0]  ;;  %v3843_v17 = vld [vmem:[#allocation7 + $0xcc] sm:$0xf0]  ;;  %v3841_v18 = vld [vmem:[#allocation7 + $0xc4] sm:$0xf] }
 0x181   :  { %v3984_v31 = vpop.eup %3983  ;;  %1215 = vmatpush.bf16.msrb.mxu0 %v3117_v62 }
 0x182   :  { %v689_v33 = vmul.f32 %v3984_v31, %v682_v32  ;;  %v3089_v32 = vor.u32 %v3797_v24, %v3086_v27 }
 0x184   :  { %v690_v35 = vpack.c.bf16 %v689_v33, %v689_v33  ;;  %v3093_v33 = vor.u32 %v3800_v29, %v3092_v28  ;;  %1230 = vmatpush.bf16.msrb.mxu1 %v3089_v32  ;;  %v699_v28 = vunpack.c.h.bf16 %v4203_v34 }
 0x185   :  { %1216 = vmatpush.bf16.msrb.mxu0 %v3101_v11  ;;  %v3037_v11 = vor.u32 %v3787_v4, %v3036_v9  ;;  %v3281_v9 = vld [vmem:[#allocation7 + $0xf0] sm:$0xf0]  ;;  %v3287_v4 = vld [vmem:[#allocation7 + $0xe8] sm:$0xf] }
 0x186   :  { %692 = vst [vmem:[#allocation9 + $0x4] sm:$0xf] %v690_v35  ;;  %900 = vmatmul.bf16.vlgmr.msra.gmra.mxu0 %v690_v35  ;;  %913 = vmatmul.bf16.vlgmr.msra.gmra.mxu1 %v690_v35  ;;  %v3288_v12 = vor.u32 %v3848_v10, %v3287_v4  ;;  %v3199_v4 = vld [vmem:[#allocation7 + $0x40] sm:$0xf]  ;;  %v3827_v10 = vld [vmem:[#allocation7 + $0x4c] sm:$0xf0] }
 0x187   :  { %926 = vmatmul.bf16.vlgmr.msra.gmra.mxu2 %v690_v35  ;;  %939 = vmatmul.bf16.vlgmr.msra.gmra.mxu3 %v690_v35  ;;  %v3798_v35 = vld [vmem:[#allocation7 + $0x6c] sm:$0xf] }
 0x188   :  { %v3097_v38 = vor.u32 %v3798_v35, %v3094_v55  ;;  %1243 = vmatpush.bf16.msrb.mxu2 %v3093_v33  ;;  %1231 = vmatpush.bf16.msrb.mxu1 %v3073_v47 }
 0x189   :  { %1217 = vmatpush.bf16.msrb.mxu0 %v3085_v26 }
 0x18a   :  { %1256 = vmatpush.bf16.msrb.mxu3 %v3097_v38 }
 0x18c   :  { %1244 = vmatpush.bf16.msrb.mxu2 %v3077_v51  ;;  %1232 = vmatpush.bf16.msrb.mxu1 %v3057_v63 }
 0x18d   :  { %1218 = vmatpush.bf16.msrb.mxu0 %v3069_v44 }
 0x18e   :  { %1257 = vmatpush.bf16.msrb.mxu3 %v3081_v56 }
 0x190   :  { %1245 = vmatpush.bf16.msrb.mxu2 %v3061_v7  ;;  %1233 = vmatpush.bf16.msrb.mxu1 %v3041_v16  ;;  %v3845_v7 = vld [vmem:[#allocation7 + $0xe4] sm:$0xf]  ;;  %v3263_v16 = vld [vmem:[#allocation7 + $0xc0] sm:$0xf] }
 0x191   :  { %1219 = vmatpush.bf16.msrb.mxu0 %v3053_v57 }
 0x192   :  { %1258 = vmatpush.bf16.msrb.mxu3 %v3065_v8 }
 0x195   :  { %1220 = vmatpush.bf16.msrb.mxu0 %v3037_v11  ;;  %v3284_v11 = vor.u32 %v3845_v7, %v3281_v9 }
 0x196   :  { %1259 = vmatpush.bf16.msrb.mxu3 %v3049_v23 }
 0x197   :  { %1547 = vmatpush.bf16.msra.mxu1 %v3284_v11  ;;  %v3825_v11 = vld [vmem:[#allocation7 + $0x44] sm:$0xf] }
 0x203   :  { %v901_v30 = vpop.f32.mrf.mxu0  ;;  %v914_v31 = vpop.f32.mrf.mxu1 }
 0x204   :  { %v944_v36 = vadd.f32 %v901_v30, %v696_v19  ;;  %v945_v37 = vadd.f32 %v914_v31, %v697_v20  ;;  %v3045_v20 = vor.u32 %v3788_v14, %v3044_v13  ;;  %v3846_v13 = vld [vmem:[#allocation7 + $0xec] sm:$0xf]  ;;  %v3289_v14 = vld [vmem:[#allocation7 + $0xf8] sm:$0xf0] }
 0x206   :  { %v3031_v42 = vmul.f32 -1.442695, %v944_v36  ;;  %v3032_v43 = vmul.f32 -1.442695, %v945_v37  ;;  %1246 = vmatpush.bf16.msrb.mxu2 %v3045_v20  ;;  %v3265_v20 = vld [vmem:[#allocation7 + $0xd0] sm:$0xf0] }
 0x207   :  { %v3268_v23 = vor.u32 %v3841_v18, %v3265_v20  ;;  %v3207_v18 = vld [vmem:[#allocation7 + $0x48] sm:$0xf]  ;;  %v3826_v20 = vld [vmem:[#allocation7 + $0x4c] sm:$0xf] }
 0x208   :  { %3985 = vpow2.f32 %v3031_v42 }
 0x209   :  { %3987 = vpow2.f32 %v3032_v43  ;;  %1548 = vmatpush.bf16.msra.mxu1 %v3268_v23  ;;  %v3183_v23 = vld [vmem:[#allocation7 + $0x20] sm:$0xf] }
 0x20a   :  { %v927_v61 = vpop.f32.mrf.mxu2  ;;  %v940_v62 = vpop.f32.mrf.mxu3  ;;  %1560 = vmatpush.bf16.msra.mxu2 %v3288_v12 }
 0x20b   :  { %v946_v3 = vadd.f32 %v927_v61, %v698_v46  ;;  %v903_v5 = vpop.f32.mrf.mxu0  ;;  %v916_v6 = vpop.f32.mrf.mxu1  ;;  %v947_v32 = vadd.f32 %v940_v62, %v699_v28 }
 0x20c   :  { %v3847_v6 = vld [vmem:[#allocation7 + $0xec] sm:$0xf0] }
 0x20d   :  { %v3033_v15 = vmul.f32 -1.442695, %v946_v3 }
 0x20e   :  { %v3986_v19 = vpop.eup %3985 }
 0x20f   :  { %v3988_v21 = vpop.eup %3987  ;;  %v951_v22 = vadd.f32 1.0, %v3986_v19  ;;  %3989 = vpow2.f32 %v3033_v15  ;;  %v3292_v15 = vor.u32 %v3846_v13, %v3289_v14  ;;  %v3264_v19 = vor.u32 %v3843_v17, %v3263_v16 }
 0x210   :  { %v970_v24 = vadd.f32 1.0, %v3988_v21  ;;  %v3271_v21 = vld [vmem:[#allocation7 + $0xc8] sm:$0xf]  ;;  %v3200_v14 = vor.u32 %v3827_v10, %v3199_v4 }
 0x211   :  { %3991 = vrcp.f32 %v951_v22  ;;  %v963_v37 = vand.u32 2147483648, %v951_v22  ;;  %v961_v40 = vand.u32 2147483647, %v951_v22  ;;  %vm957_vm10 = vweird.f32 %v951_v22  ;;  %1573 = vmatpush.bf16.msra.mxu3 %v3292_v15  ;;  %v3201_v15 = vld [vmem:[#allocation7 + $0x50] sm:$0xf0] }
 0x212   :  { %3993 = vrcp.f32 %v970_v24  ;;  %v929_v26 = vpop.f32.mrf.mxu2  ;;  %v942_v27 = vpop.f32.mrf.mxu3  ;;  %v982_v41 = vand.u32 2147483648, %v970_v24  ;;  %v980_v34 = vand.u32 2147483647, %v970_v24  ;;  %vm976_vm12 = vweird.f32 %v970_v24 }
 0x213   :  { %v964_v45 = vor.u32 1.1754944e-38, %v963_v37  ;;  %vm962_vm13 = vcmp.eq.f32.partialorder %v961_v40, 8.507059e+37  ;;  %v3842_v26 = vld [vmem:[#allocation7 + $0xcc] sm:$0xf]  ;;  %v3273_v27 = vld [vmem:[#allocation7 + $0xd8] sm:$0xf0]  ;;  %v3204_v17 = vor.u32 %v3825_v11, %v3201_v15 }
 0x214   :  { %v983_v49 = vor.u32 1.1754944e-38, %v982_v41  ;;  %vm981_vm15 = vcmp.eq.f32.partialorder %v980_v34, 8.507059e+37  ;;  %v3276_v28 = vor.u32 %v3842_v26, %v3273_v27  ;;  %v1015_v40 = vld [vmem:[#allocation4 + $0x30] sm:$0xff] }
 0x215   :  { %v3990_v29 = vpop.eup %3989  ;;  %v3835_v34 = vld [vmem:[#allocation7 + $0x8c] sm:$0xf0] }
 0x216   :  { %v989_v30 = vadd.f32 1.0, %v3990_v29  ;;  %v3247_v29 = vld [vmem:[#allocation7 + $0xa0] sm:$0xf]  ;;  %1574 = vmatpush.bf16.msra.mxu3 %v3276_v28  ;;  %v3821_v28 = vld [vmem:[#allocation7 + $0x24] sm:$0xf] }
 0x217   :  { %v3992_v31 = vpop.eup %3991 }
 0x218   :  { %v3994_v33 = vpop.eup %3993  ;;  %v953_v35 = vmul.f32 %v3992_v31, %v951_v22  ;;  %3995 = vrcp.f32 %v989_v30  ;;  %vm958_vm8 = vweird.f32 %v3992_v31  ;;  %v1001_v61 = vand.u32 2147483648, %v989_v30  ;;  %v3844_v22 = vld [vmem:[#allocation7 + $0xd4] sm:$0xf0] }
 0x219   :  { %v972_v55 = vmul.f32 %v3994_v33, %v970_v24  ;;  %3997 = vtanh.f32 %v947_v32  ;;  %vm977_vm9 = vweird.f32 %v3994_v33  ;;  %vm959_vm11 = vmor %vm957_vm10, %vm958_vm8  ;;  %vm995_vm1 = vweird.f32 %v989_v30 }
 0x21a   :  { %v954_v36 = vsub.f32 1.0, %v953_v35  ;;  %vm978_vm14 = vmor %vm976_vm12, %vm977_vm9  ;;  %v999_v62 = vand.u32 2147483647, %v989_v30  ;;  %v1002_v0 = vor.u32 1.1754944e-38, %v1001_v61  ;;  %v3272_v24 = vor.u32 %v3844_v22, %v3271_v21  ;;  %v3255_v35 = vld [vmem:[#allocation7 + $0xa8] sm:$0xf] }
 0x21b   :  { %v973_v38 = vsub.f32 1.0, %v972_v55  ;;  %v3840_v55 = vld [vmem:[#allocation7 + $0xb4] sm:$0xf0]  ;;  %v3217_v61 = vld [vmem:[#allocation7 + $0x70] sm:$0xf0] }
 0x21c   :  { %v955_v39 = vmul.f32 %v3992_v31, %v954_v36  ;;  %vm1000_vm3 = vcmp.eq.f32.partialorder %v999_v62, 8.507059e+37  ;;  %1561 = vmatpush.bf16.msra.mxu2 %v3272_v24  ;;  %v3256_v37 = vor.u32 %v3840_v55, %v3255_v35  ;;  %v3223_v62 = vld [vmem:[#allocation7 + $0x68] sm:$0xf]  ;;  %v3209_v22 = vld [vmem:[#allocation7 + $0x58] sm:$0xf0] }
 0x21d   :  { %v974_v42 = vmul.f32 %v3994_v33, %v973_v38  ;;  %v3838_v38 = vld [vmem:[#allocation7 + $0xac] sm:$0xf]  ;;  %v3823_v24 = vld [vmem:[#allocation7 + $0x2c] sm:$0xf0]  ;;  %v3212_v26 = vor.u32 %v3826_v20, %v3209_v22  ;;  %v3824_v35 = vld [vmem:[#allocation7 + $0x34] sm:$0xf0] }
 0x21e   :  { %v3996_v43 = vpop.eup %3995  ;;  %v956_v44 = vadd.f32 %v3992_v31, %v955_v39  ;;  %v3257_v39 = vld [vmem:[#allocation7 + $0xb8] sm:$0xf0]  ;;  %v3184_v27 = vor.u32 %v3823_v24, %v3183_v23  ;;  %v3822_v55 = vld [vmem:[#allocation7 + $0x2c] sm:$0xf] }
 0x21f   :  { %v991_v46 = vmul.f32 %v3996_v43, %v989_v30  ;;  %v975_v47 = vadd.f32 %v3994_v33, %v974_v42  ;;  %v3998_v50 = vpop.eup %3997  ;;  %vm996_vm0 = vweird.f32 %v3996_v43  ;;  %v3839_v30 = vld [vmem:[#allocation7 + $0xac] sm:$0xf0]  ;;  %v3260_v41 = vor.u32 %v3838_v38, %v3257_v39  ;;  %v3231_v42 = vld [vmem:[#allocation7 + $0x80] sm:$0xf] }
 0x220   :  { %v960_v48 = vsel %vm959_vm11, %v3992_v31, %v956_v44  ;;  %vm997_vm2 = vmor %vm995_vm1, %vm996_vm0  ;;  %v3837_v31 = vld [vmem:[#allocation7 + $0xa4] sm:$0xf]  ;;  %v3248_v32 = vor.u32 %v3839_v30, %v3247_v29  ;;  %1562 = vmatpush.bf16.msra.mxu2 %v3256_v37  ;;  %v3232_v44 = vor.u32 %v3835_v34, %v3231_v42  ;;  %v3185_v29 = vld [vmem:[#allocation7 + $0x30] sm:$0xf0] }
 0x221   :  { %v992_v51 = vsub.f32 1.0, %v991_v46  ;;  %v965_v52 = vsel %vm962_vm13, %v964_v45, %v960_v48  ;;  %v979_v53 = vsel %vm978_vm14, %v3994_v33, %v975_v47  ;;  %v3249_v33 = vld [vmem:[#allocation7 + $0xb0] sm:$0xf0]  ;;  %1575 = vmatpush.bf16.msra.mxu3 %v3260_v41  ;;  %v3239_v46 = vld [vmem:[#allocation7 + $0x88] sm:$0xf] }
 0x222   :  { %v984_v54 = vsel %vm981_vm15, %v983_v49, %v979_v53  ;;  %v1007_v56 = vmul.f32 %v965_v52, %v4200_v25  ;;  %v3279_v25 = vld [vmem:[#allocation7 + $0xe0] sm:$0xf]  ;;  %v3252_v36 = vor.u32 %v3837_v31, %v3249_v33  ;;  %v3233_v45 = vld [vmem:[#allocation7 + $0x90] sm:$0xf0]  ;;  %v3836_v47 = vld [vmem:[#allocation7 + $0x94] sm:$0xf0]  ;;  %v1017_v52 = vunpack.c.l.bf16 %v1015_v40 }
 0x223   :  { %v993_v57 = vmul.f32 %v3996_v43, %v992_v51  ;;  %v1006_v58 = vmul.f32 %v3998_v50, %v984_v54  ;;  %v3280_v8 = vor.u32 %v3847_v6, %v3279_v25  ;;  %v3240_v49 = vor.u32 %v3836_v47, %v3239_v46  ;;  %v3834_v50 = vld [vmem:[#allocation7 + $0x8c] sm:$0xf]  ;;  %v3241_v51 = vld [vmem:[#allocation7 + $0x98] sm:$0xf0]  ;;  %v3191_v30 = vld [vmem:[#allocation7 + $0x28] sm:$0xf] }
 0x224   :  { %1549 = vmatpush.bf16.msra.mxu1 %v3252_v36  ;;  %v1018_v53 = vunpack.c.h.bf16 %v1015_v40  ;;  %v3244_v54 = vor.u32 %v3834_v50, %v3241_v51  ;;  %v3225_v25 = vld [vmem:[#allocation7 + $0x78] sm:$0xf0]  ;;  %v3188_v33 = vor.u32 %v3821_v28, %v3185_v29  ;;  %v3192_v40 = vor.u32 %v3824_v35, %v3191_v30  ;;  %v3167_v42 = vld [vmem:[#allocation7] sm:$0xf]  ;;  %v3819_v34 = vld [vmem:[#allocation7 + $0xc] sm:$0xf0] }
 0x225   :  { %v4208_v59 = vadd.f32 %v1007_v56, %v1006_v58  ;;  %v994_v60 = vadd.f32 %v3996_v43, %v993_v57  ;;  %1534 = vmatpush.bf16.msra.mxu0 %v3280_v8  ;;  %1563 = vmatpush.bf16.msra.mxu2 %v3240_v49  ;;  %v3215_v56 = vld [vmem:[#allocation7 + $0x60] sm:$0xf]  ;;  %v3831_v57 = vld [vmem:[#allocation7 + $0x6c] sm:$0xf0]  ;;  %v3829_v58 = vld [vmem:[#allocation7 + $0x64] sm:$0xf] }
 0x226   :  { %1576 = vmatpush.bf16.msra.mxu3 %v3244_v54  ;;  %v4211_v8 = vld [vmem:[#allocation4 + $0x38] sm:$0xff]  ;;  %v3175_v46 = vld [vmem:[#allocation7 + $0x8] sm:$0xf]  ;;  %v3818_v50 = vld [vmem:[#allocation7 + $0xc] sm:$0xf] }
 0x227   :  { %3999 = vtanh.f32 %v4208_v59  ;;  %v998_v63 = vsel %vm997_vm2, %v3996_v43, %v994_v60  ;;  %v3833_v43 = vld [vmem:[#allocation7 + $0x84] sm:$0xf]  ;;  %v3216_v60 = vor.u32 %v3831_v57, %v3215_v56  ;;  %v1019_v16 = vunpack.c.l.bf16 %v4211_v8  ;;  %v3193_v36 = vld [vmem:[#allocation7 + $0x38] sm:$0xf0]  ;;  %v3820_v47 = vld [vmem:[#allocation7 + $0x14] sm:$0xf0] }
 0x228   :  { %v1003_v2 = vsel %vm1000_vm3, %v1002_v0, %v998_v63  ;;  %v3236_v48 = vor.u32 %v3833_v43, %v3233_v45  ;;  %v3832_v63 = vld [vmem:[#allocation7 + $0x74] sm:$0xf0]  ;;  %v3196_v41 = vor.u32 %v3822_v55, %v3193_v36  ;;  %v3817_v43 = vld [vmem:[#allocation7 + $0x4] sm:$0xf]  ;;  %v3169_v45 = vld [vmem:[#allocation7 + $0x10] sm:$0xf0] }
 0x229   :  { %1535 = vmatpush.bf16.msra.mxu0 %v3264_v19  ;;  %v3828_v19 = vld [vmem:[#allocation7 + $0x54] sm:$0xf0]  ;;  %v3172_v49 = vor.u32 %v3817_v43, %v3169_v45  ;;  %v3177_v51 = vld [vmem:[#allocation7 + $0x18] sm:$0xf0] }
 0x22a   :  { %1550 = vmatpush.bf16.msra.mxu1 %v3236_v48  ;;  %v3208_v21 = vor.u32 %v3828_v19, %v3207_v18  ;;  %v3180_v57 = vor.u32 %v3818_v50, %v3177_v51  ;;  %v3880_v43 = vld [vmem:[#allocation7 + $0xf4] sm:$0xf0]  ;;  %v3875_v50 = vld [vmem:[#allocation7 + $0xcc] sm:$0xf0]  ;;  %v3873_v51 = vld [vmem:[#allocation7 + $0xc4] sm:$0xf] }
 0x22d   :  { %v4000_v1 = vpop.eup %3999  ;;  %1536 = vmatpush.bf16.msra.mxu0 %v3248_v32 }
 0x22e   :  { %v1010_v3 = vmul.f32 %v4000_v1, %v1003_v2  ;;  %v3220_v2 = vor.u32 %v3829_v58, %v3217_v61 }
 0x230   :  { %v1011_v5 = vpack.c.bf16 %v1010_v3, %v1010_v3  ;;  %v3224_v3 = vor.u32 %v3832_v63, %v3223_v62  ;;  %1551 = vmatpush.bf16.msra.mxu1 %v3220_v2  ;;  %v1020_v62 = vunpack.c.h.bf16 %v4211_v8 }
 0x231   :  { %1537 = vmatpush.bf16.msra.mxu0 %v3232_v44  ;;  %v3168_v44 = vor.u32 %v3819_v34, %v3167_v42  ;;  %v3412_v42 = vld [vmem:[#allocation7 + $0xf0] sm:$0xf0]  ;;  %v3418_v34 = vld [vmem:[#allocation7 + $0xe8] sm:$0xf] }
 0x232   :  { %1013 = vst [vmem:[#allocation9 + $0x8] sm:$0xf] %v1011_v5  ;;  %1221 = vmatmul.bf16.vlgmr.msrb.gmra.mxu0 %v1011_v5  ;;  %1234 = vmatmul.bf16.vlgmr.msrb.gmra.mxu1 %v1011_v5  ;;  %v3419_v45 = vor.u32 %v3880_v43, %v3418_v34  ;;  %v3330_v34 = vld [vmem:[#allocation7 + $0x40] sm:$0xf]  ;;  %v3859_v43 = vld [vmem:[#allocation7 + $0x4c] sm:$0xf0] }
 0x233   :  { %1247 = vmatmul.bf16.vlgmr.msrb.gmra.mxu2 %v1011_v5  ;;  %1260 = vmatmul.bf16.vlgmr.msrb.gmra.mxu3 %v1011_v5  ;;  %v3830_v5 = vld [vmem:[#allocation7 + $0x6c] sm:$0xf] }
 0x234   :  { %v3228_v9 = vor.u32 %v3830_v5, %v3225_v25  ;;  %1564 = vmatpush.bf16.msra.mxu2 %v3224_v3  ;;  %1552 = vmatpush.bf16.msra.mxu1 %v3204_v17 }
 0x235   :  { %1538 = vmatpush.bf16.msra.mxu0 %v3216_v60 }
 0x236   :  { %1577 = vmatpush.bf16.msra.mxu3 %v3228_v9 }
 0x238   :  { %1565 = vmatpush.bf16.msra.mxu2 %v3208_v21  ;;  %1553 = vmatpush.bf16.msra.mxu1 %v3188_v33 }
 0x239   :  { %1539 = vmatpush.bf16.msra.mxu0 %v3200_v14 }
 0x23a   :  { %1578 = vmatpush.bf16.msra.mxu3 %v3212_v26 }
 0x23c   :  { %1566 = vmatpush.bf16.msra.mxu2 %v3192_v40  ;;  %1554 = vmatpush.bf16.msra.mxu1 %v3172_v49  ;;  %v3877_v40 = vld [vmem:[#allocation7 + $0xe4] sm:$0xf]  ;;  %v3394_v49 = vld [vmem:[#allocation7 + $0xc0] sm:$0xf] }
 0x23d   :  { %1540 = vmatpush.bf16.msra.mxu0 %v3184_v27 }
 0x23e   :  { %1579 = vmatpush.bf16.msra.mxu3 %v3196_v41 }
 0x241   :  { %1541 = vmatpush.bf16.msra.mxu0 %v3168_v44  ;;  %v3415_v44 = vor.u32 %v3877_v40, %v3412_v42 }
 0x242   :  { %1580 = vmatpush.bf16.msra.mxu3 %v3180_v57 }
 0x243   :  { %1868 = vmatpush.bf16.msrb.mxu1 %v3415_v44  ;;  %v3857_v44 = vld [vmem:[#allocation7 + $0x44] sm:$0xf] }
 0x2af   :  { %v1222_v0 = vpop.f32.mrf.mxu0  ;;  %v1235_v1 = vpop.f32.mrf.mxu1 }
 0x2b0   :  { %v1265_v6 = vadd.f32 %v1222_v0, %v1017_v52  ;;  %v1266_v7 = vadd.f32 %v1235_v1, %v1018_v53  ;;  %v3176_v53 = vor.u32 %v3820_v47, %v3175_v46  ;;  %v3878_v46 = vld [vmem:[#allocation7 + $0xec] sm:$0xf]  ;;  %v3420_v47 = vld [vmem:[#allocation7 + $0xf8] sm:$0xf0] }
 0x2b2   :  { %v3162_v12 = vmul.f32 -1.442695, %v1265_v6  ;;  %v3163_v13 = vmul.f32 -1.442695, %v1266_v7  ;;  %1567 = vmatpush.bf16.msra.mxu2 %v3176_v53  ;;  %v3396_v53 = vld [vmem:[#allocation7 + $0xd0] sm:$0xf0] }
 0x2b3   :  { %v3399_v57 = vor.u32 %v3873_v51, %v3396_v53  ;;  %v3338_v51 = vld [vmem:[#allocation7 + $0x48] sm:$0xf]  ;;  %v3858_v53 = vld [vmem:[#allocation7 + $0x4c] sm:$0xf] }
 0x2b4   :  { %4001 = vpow2.f32 %v3162_v12 }
 0x2b5   :  { %4003 = vpow2.f32 %v3163_v13  ;;  %1869 = vmatpush.bf16.msrb.mxu1 %v3399_v57  ;;  %v3314_v57 = vld [vmem:[#allocation7 + $0x20] sm:$0xf] }
 0x2b6   :  { %v1248_v31 = vpop.f32.mrf.mxu2  ;;  %v1261_v32 = vpop.f32.mrf.mxu3  ;;  %1881 = vmatpush.bf16.msrb.mxu2 %v3419_v45 }
 0x2b7   :  { %v1267_v37 = vadd.f32 %v1248_v31, %v1019_v16  ;;  %v1224_v38 = vpop.f32.mrf.mxu0  ;;  %v1237_v39 = vpop.f32.mrf.mxu1  ;;  %v1268_v2 = vadd.f32 %v1261_v32, %v1020_v62 }
 0x2b8   :  { %v3879_v39 = vld [vmem:[#allocation7 + $0xec] sm:$0xf0] }
 0x2b9   :  { %v3164_v48 = vmul.f32 -1.442695, %v1267_v37 }
 0x2ba   :  { %v4002_v52 = vpop.eup %4001 }
 0x2bb   :  { %v4004_v54 = vpop.eup %4003  ;;  %v1272_v56 = vadd.f32 1.0, %v4002_v52  ;;  %4005 = vpow2.f32 %v3164_v48  ;;  %v3423_v48 = vor.u32 %v3878_v46, %v3420_v47  ;;  %v3395_v52 = vor.u32 %v3875_v50, %v3394_v49 }
 0x2bc   :  { %v1291_v58 = vadd.f32 1.0, %v4004_v54  ;;  %v3402_v54 = vld [vmem:[#allocation7 + $0xc8] sm:$0xf]  ;;  %v3331_v47 = vor.u32 %v3859_v43, %v3330_v34 }
 0x2bd   :  { %4007 = vrcp.f32 %v1272_v56  ;;  %v1284_v7 = vand.u32 2147483648, %v1272_v56  ;;  %v1282_v10 = vand.u32 2147483647, %v1272_v56  ;;  %vm1278_vm6 = vweird.f32 %v1272_v56  ;;  %1894 = vmatpush.bf16.msrb.mxu3 %v3423_v48  ;;  %v3332_v48 = vld [vmem:[#allocation7 + $0x50] sm:$0xf0] }
 0x2be   :  { %4009 = vrcp.f32 %v1291_v58  ;;  %v1250_v60 = vpop.f32.mrf.mxu2  ;;  %v1263_v61 = vpop.f32.mrf.mxu3  ;;  %v1303_v11 = vand.u32 2147483648, %v1291_v58  ;;  %v1301_v8 = vand.u32 2147483647, %v1291_v58  ;;  %vm1297_vm8 = vweird.f32 %v1291_v58 }
 0x2bf   :  { %v1285_v15 = vor.u32 1.1754944e-38, %v1284_v7  ;;  %vm1283_vm9 = vcmp.eq.f32.partialorder %v1282_v10, 8.507059e+37  ;;  %v3874_v60 = vld [vmem:[#allocation7 + $0xcc] sm:$0xf]  ;;  %v3404_v61 = vld [vmem:[#allocation7 + $0xd8] sm:$0xf0]  ;;  %v3335_v50 = vor.u32 %v3857_v44, %v3332_v48 }
 0x2c0   :  { %v1304_v19 = vor.u32 1.1754944e-38, %v1303_v11  ;;  %vm1302_vm11 = vcmp.eq.f32.partialorder %v1301_v8, 8.507059e+37  ;;  %v3407_v62 = vor.u32 %v3874_v60, %v3404_v61  ;;  %v1336_v10 = vld [vmem:[#allocation4 + $0x40] sm:$0xff]  ;;  %v3867_v8 = vld [vmem:[#allocation7 + $0x8c] sm:$0xf0] }
 0x2c1   :  { %v4006_v63 = vpop.eup %4005 }
 0x2c2   :  { %v1310_v0 = vadd.f32 1.0, %v4006_v63  ;;  %v3378_v63 = vld [vmem:[#allocation7 + $0xa0] sm:$0xf]  ;;  %1895 = vmatpush.bf16.msrb.mxu3 %v3407_v62  ;;  %v3853_v62 = vld [vmem:[#allocation7 + $0x24] sm:$0xf] }
 0x2c3   :  { %v4008_v1 = vpop.eup %4007 }
 0x2c4   :  { %v4010_v3 = vpop.eup %4009  ;;  %v1274_v5 = vmul.f32 %v4008_v1, %v1272_v56  ;;  %4011 = vrcp.f32 %v1310_v0  ;;  %vm1279_vm4 = vweird.f32 %v4008_v1  ;;  %v1322_v31 = vand.u32 2147483648, %v1310_v0  ;;  %v3876_v56 = vld [vmem:[#allocation7 + $0xd4] sm:$0xf0] }
 0x2c5   :  { %v1293_v25 = vmul.f32 %v4010_v3, %v1291_v58  ;;  %4013 = vtanh.f32 %v1268_v2  ;;  %vm1298_vm5 = vweird.f32 %v4010_v3  ;;  %vm1280_vm7 = vmor %vm1278_vm6, %vm1279_vm4  ;;  %vm1316_vm13 = vweird.f32 %v1310_v0 }
 0x2c6   :  { %v1275_v6 = vsub.f32 1.0, %v1274_v5  ;;  %vm1299_vm10 = vmor %vm1297_vm8, %vm1298_vm5  ;;  %v1320_v32 = vand.u32 2147483647, %v1310_v0  ;;  %v1323_v35 = vor.u32 1.1754944e-38, %v1322_v31  ;;  %v3403_v58 = vor.u32 %v3876_v56, %v3402_v54  ;;  %v3386_v5 = vld [vmem:[#allocation7 + $0xa8] sm:$0xf] }
 0x2c7   :  { %v1294_v9 = vsub.f32 1.0, %v1293_v25  ;;  %v3872_v25 = vld [vmem:[#allocation7 + $0xb4] sm:$0xf0]  ;;  %v3348_v31 = vld [vmem:[#allocation7 + $0x70] sm:$0xf0] }
 0x2c8   :  { %v1276_v4 = vmul.f32 %v4008_v1, %v1275_v6  ;;  %vm1321_vm15 = vcmp.eq.f32.partialorder %v1320_v32, 8.507059e+37  ;;  %1882 = vmatpush.bf16.msrb.mxu2 %v3403_v58  ;;  %v3387_v7 = vor.u32 %v3872_v25, %v3386_v5  ;;  %v3354_v32 = vld [vmem:[#allocation7 + $0x68] sm:$0xf]  ;;  %v3340_v56 = vld [vmem:[#allocation7 + $0x58] sm:$0xf0] }
 0x2c9   :  { %v1295_v12 = vmul.f32 %v4010_v3, %v1294_v9  ;;  %v3870_v9 = vld [vmem:[#allocation7 + $0xac] sm:$0xf]  ;;  %v3855_v58 = vld [vmem:[#allocation7 + $0x2c] sm:$0xf0]  ;;  %v3343_v60 = vor.u32 %v3858_v53, %v3340_v56  ;;  %v3856_v5 = vld [vmem:[#allocation7 + $0x34] sm:$0xf0] }
 0x2ca   :  { %v4012_v13 = vpop.eup %4011  ;;  %v1277_v14 = vadd.f32 %v4008_v1, %v1276_v4  ;;  %v3388_v4 = vld [vmem:[#allocation7 + $0xb8] sm:$0xf0]  ;;  %v3315_v61 = vor.u32 %v3855_v58, %v3314_v57  ;;  %v3854_v25 = vld [vmem:[#allocation7 + $0x2c] sm:$0xf] }
 0x2cb   :  { %v1312_v16 = vmul.f32 %v4012_v13, %v1310_v0  ;;  %v1296_v17 = vadd.f32 %v4010_v3, %v1295_v12  ;;  %v4014_v20 = vpop.eup %4013  ;;  %vm1317_vm12 = vweird.f32 %v4012_v13  ;;  %v3871_v0 = vld [vmem:[#allocation7 + $0xac] sm:$0xf0]  ;;  %v3391_v11 = vor.u32 %v3870_v9, %v3388_v4  ;;  %v3362_v12 = vld [vmem:[#allocation7 + $0x80] sm:$0xf] }
 0x2cc   :  { %v1281_v18 = vsel %vm1280_vm7, %v4008_v1, %v1277_v14  ;;  %vm1318_vm14 = vmor %vm1316_vm13, %vm1317_vm12  ;;  %v3869_v1 = vld [vmem:[#allocation7 + $0xa4] sm:$0xf]  ;;  %v3379_v2 = vor.u32 %v3871_v0, %v3378_v63  ;;  %1883 = vmatpush.bf16.msrb.mxu2 %v3387_v7  ;;  %v3363_v14 = vor.u32 %v3867_v8, %v3362_v12  ;;  %v3316_v63 = vld [vmem:[#allocation7 + $0x30] sm:$0xf0] }
 0x2cd   :  { %v1313_v21 = vsub.f32 1.0, %v1312_v16  ;;  %v1286_v22 = vsel %vm1283_vm9, %v1285_v15, %v1281_v18  ;;  %v1300_v23 = vsel %vm1299_vm10, %v4010_v3, %v1296_v17  ;;  %v3380_v3 = vld [vmem:[#allocation7 + $0xb0] sm:$0xf0]  ;;  %1896 = vmatpush.bf16.msrb.mxu3 %v3391_v11  ;;  %v3370_v16 = vld [vmem:[#allocation7 + $0x88] sm:$0xf] }
 0x2ce   :  { %v1305_v24 = vsel %vm1302_vm11, %v1304_v19, %v1300_v23  ;;  %v1328_v26 = vmul.f32 %v1286_v22, %v4208_v59  ;;  %v3410_v59 = vld [vmem:[#allocation7 + $0xe0] sm:$0xf]  ;;  %v3383_v6 = vor.u32 %v3869_v1, %v3380_v3  ;;  %v3364_v15 = vld [vmem:[#allocation7 + $0x90] sm:$0xf0]  ;;  %v3868_v17 = vld [vmem:[#allocation7 + $0x94] sm:$0xf0]  ;;  %v1338_v22 = vunpack.c.l.bf16 %v1336_v10 }
 0x2cf   :  { %v1314_v27 = vmul.f32 %v4012_v13, %v1313_v21  ;;  %v1327_v28 = vmul.f32 %v4014_v20, %v1305_v24  ;;  %v3411_v41 = vor.u32 %v3879_v39, %v3410_v59  ;;  %v3371_v19 = vor.u32 %v3868_v17, %v3370_v16  ;;  %v3866_v20 = vld [vmem:[#allocation7 + $0x8c] sm:$0xf]  ;;  %v3372_v21 = vld [vmem:[#allocation7 + $0x98] sm:$0xf0]  ;;  %v3322_v0 = vld [vmem:[#allocation7 + $0x28] sm:$0xf] }
 0x2d0   :  { %1870 = vmatpush.bf16.msrb.mxu1 %v3383_v6  ;;  %v1339_v23 = vunpack.c.h.bf16 %v1336_v10  ;;  %v3375_v24 = vor.u32 %v3866_v20, %v3372_v21  ;;  %v3356_v59 = vld [vmem:[#allocation7 + $0x78] sm:$0xf0]  ;;  %v3319_v3 = vor.u32 %v3853_v62, %v3316_v63  ;;  %v3323_v10 = vor.u32 %v3856_v5, %v3322_v0  ;;  %v3298_v12 = vld [vmem:[#allocation7] sm:$0xf]  ;;  %v3851_v8 = vld [vmem:[#allocation7 + $0xc] sm:$0xf0] }
 0x2d1   :  { %v4216_v29 = vadd.f32 %v1328_v26, %v1327_v28  ;;  %v1315_v30 = vadd.f32 %v4012_v13, %v1314_v27  ;;  %1855 = vmatpush.bf16.msrb.mxu0 %v3411_v41  ;;  %1884 = vmatpush.bf16.msrb.mxu2 %v3371_v19  ;;  %v3346_v26 = vld [vmem:[#allocation7 + $0x60] sm:$0xf]  ;;  %v3863_v27 = vld [vmem:[#allocation7 + $0x6c] sm:$0xf0]  ;;  %v3861_v28 = vld [vmem:[#allocation7 + $0x64] sm:$0xf] }
 0x2d2   :  { %1897 = vmatpush.bf16.msrb.mxu3 %v3375_v24  ;;  %v4219_v41 = vld [vmem:[#allocation4 + $0x48] sm:$0xff]  ;;  %v3324_v6 = vld [vmem:[#allocation7 + $0x38] sm:$0xf0]  ;;  %v3852_v17 = vld [vmem:[#allocation7 + $0x14] sm:$0xf0] }
 0x2d3   :  { %4015 = vtanh.f32 %v4216_v29  ;;  %v1319_v33 = vsel %vm1318_vm14, %v4012_v13, %v1315_v30  ;;  %v3865_v13 = vld [vmem:[#allocation7 + $0x84] sm:$0xf]  ;;  %v3347_v30 = vor.u32 %v3863_v27, %v3346_v26  ;;  %v1340_v49 = vunpack.c.l.bf16 %v4219_v41  ;;  %v3306_v16 = vld [vmem:[#allocation7 + $0x8] sm:$0xf]  ;;  %v3850_v20 = vld [vmem:[#allocation7 + $0xc] sm:$0xf] }
 0x2d4   :  { %v1324_v36 = vsel %vm1321_vm15, %v1323_v35, %v1319_v33  ;;  %v3367_v18 = vor.u32 %v3865_v13, %v3364_v15  ;;  %v3864_v33 = vld [vmem:[#allocation7 + $0x74] sm:$0xf0]  ;;  %v3327_v11 = vor.u32 %v3854_v25, %v3324_v6  ;;  %v3849_v13 = vld [vmem:[#allocation7 + $0x4] sm:$0xf]  ;;  %v3300_v15 = vld [vmem:[#allocation7 + $0x10] sm:$0xf0] }
 0x2d5   :  { %1856 = vmatpush.bf16.msrb.mxu0 %v3395_v52  ;;  %v3860_v52 = vld [vmem:[#allocation7 + $0x54] sm:$0xf0]  ;;  %v3303_v19 = vor.u32 %v3849_v13, %v3300_v15  ;;  %v3308_v21 = vld [vmem:[#allocation7 + $0x18] sm:$0xf0] }
 0x2d6   :  { %1871 = vmatpush.bf16.msrb.mxu1 %v3367_v18  ;;  %v3339_v54 = vor.u32 %v3860_v52, %v3338_v51  ;;  %v3311_v27 = vor.u32 %v3850_v20, %v3308_v21  ;;  %v3912_v13 = vld [vmem:[#allocation7 + $0xf4] sm:$0xf0]  ;;  %v3907_v20 = vld [vmem:[#allocation7 + $0xcc] sm:$0xf0]  ;;  %v3905_v21 = vld [vmem:[#allocation7 + $0xc4] sm:$0xf] }
 0x2d9   :  { %v4016_v55 = vpop.eup %4015  ;;  %1857 = vmatpush.bf16.msrb.mxu0 %v3379_v2 }
 0x2da   :  { %v1331_v37 = vmul.f32 %v4016_v55, %v1324_v36  ;;  %v3351_v36 = vor.u32 %v3861_v28, %v3348_v31 }
 0x2dc   :  { %v1332_v38 = vpack.c.bf16 %v1331_v37, %v1331_v37  ;;  %v3355_v37 = vor.u32 %v3864_v33, %v3354_v32  ;;  %1872 = vmatpush.bf16.msrb.mxu1 %v3351_v36  ;;  %v1341_v32 = vunpack.c.h.bf16 %v4219_v41 }
 0x2dd   :  { %1858 = vmatpush.bf16.msrb.mxu0 %v3363_v14  ;;  %v3299_v14 = vor.u32 %v3851_v8, %v3298_v12  ;;  %v3543_v12 = vld [vmem:[#allocation7 + $0xf0] sm:$0xf0]  ;;  %v3549_v8 = vld [vmem:[#allocation7 + $0xe8] sm:$0xf] }
 0x2de   :  { %1334 = vst [vmem:[#allocation9 + $0xc] sm:$0xf] %v1332_v38  ;;  %1542 = vmatmul.bf16.vlgmr.msra.gmra.mxu0 %v1332_v38  ;;  %1555 = vmatmul.bf16.vlgmr.msra.gmra.mxu1 %v1332_v38  ;;  %v3550_v15 = vor.u32 %v3912_v13, %v3549_v8  ;;  %v3461_v8 = vld [vmem:[#allocation7 + $0x40] sm:$0xf]  ;;  %v3891_v13 = vld [vmem:[#allocation7 + $0x4c] sm:$0xf0] }
 0x2df   :  { %1568 = vmatmul.bf16.vlgmr.msra.gmra.mxu2 %v1332_v38  ;;  %1581 = vmatmul.bf16.vlgmr.msra.gmra.mxu3 %v1332_v38  ;;  %v3862_v38 = vld [vmem:[#allocation7 + $0x6c] sm:$0xf] }
 0x2e0   :  { %v3359_v42 = vor.u32 %v3862_v38, %v3356_v59  ;;  %1885 = vmatpush.bf16.msrb.mxu2 %v3355_v37  ;;  %1873 = vmatpush.bf16.msrb.mxu1 %v3335_v50 }
 0x2e1   :  { %1859 = vmatpush.bf16.msrb.mxu0 %v3347_v30 }
 0x2e2   :  { %1898 = vmatpush.bf16.msrb.mxu3 %v3359_v42 }
 0x2e4   :  { %1886 = vmatpush.bf16.msrb.mxu2 %v3339_v54  ;;  %1874 = vmatpush.bf16.msrb.mxu1 %v3319_v3 }
 0x2e5   :  { %1860 = vmatpush.bf16.msrb.mxu0 %v3331_v47 }
 0x2e6   :  { %1899 = vmatpush.bf16.msrb.mxu3 %v3343_v60 }
 0x2e8   :  { %1887 = vmatpush.bf16.msrb.mxu2 %v3323_v10  ;;  %1875 = vmatpush.bf16.msrb.mxu1 %v3303_v19  ;;  %v3909_v10 = vld [vmem:[#allocation7 + $0xe4] sm:$0xf]  ;;  %v3525_v19 = vld [vmem:[#allocation7 + $0xc0] sm:$0xf] }
 0x2e9   :  { %1861 = vmatpush.bf16.msrb.mxu0 %v3315_v61 }
 0x2ea   :  { %1900 = vmatpush.bf16.msrb.mxu3 %v3327_v11 }
 0x2ed   :  { %1862 = vmatpush.bf16.msrb.mxu0 %v3299_v14  ;;  %v3546_v14 = vor.u32 %v3909_v10, %v3543_v12 }
 0x2ee   :  { %1901 = vmatpush.bf16.msrb.mxu3 %v3311_v27 }
 0x2ef   :  { %2189 = vmatpush.bf16.msra.mxu1 %v3546_v14  ;;  %v3889_v14 = vld [vmem:[#allocation7 + $0x44] sm:$0xf] }
 0x35b   :  { %v1543_v35 = vpop.f32.mrf.mxu0  ;;  %v1556_v55 = vpop.f32.mrf.mxu1 }
 0x35c   :  { %v1586_v39 = vadd.f32 %v1543_v35, %v1338_v22  ;;  %v1587_v40 = vadd.f32 %v1556_v55, %v1339_v23  ;;  %v3307_v23 = vor.u32 %v3852_v17, %v3306_v16  ;;  %v3910_v16 = vld [vmem:[#allocation7 + $0xec] sm:$0xf]  ;;  %v3551_v17 = vld [vmem:[#allocation7 + $0xf8] sm:$0xf0] }
 0x35e   :  { %v3293_v45 = vmul.f32 -1.442695, %v1586_v39  ;;  %v3294_v46 = vmul.f32 -1.442695, %v1587_v40  ;;  %1888 = vmatpush.bf16.msrb.mxu2 %v3307_v23  ;;  %v3527_v23 = vld [vmem:[#allocation7 + $0xd0] sm:$0xf0] }
 0x35f   :  { %v3530_v27 = vor.u32 %v3905_v21, %v3527_v23  ;;  %v3469_v21 = vld [vmem:[#allocation7 + $0x48] sm:$0xf]  ;;  %v3890_v23 = vld [vmem:[#allocation7 + $0x4c] sm:$0xf] }
 0x360   :  { %4017 = vpow2.f32 %v3293_v45 }
 0x361   :  { %4019 = vpow2.f32 %v3294_v46  ;;  %2190 = vmatpush.bf16.msra.mxu1 %v3530_v27  ;;  %v3445_v27 = vld [vmem:[#allocation7 + $0x20] sm:$0xf] }
 0x362   :  { %v1569_v1 = vpop.f32.mrf.mxu2  ;;  %v1582_v2 = vpop.f32.mrf.mxu3  ;;  %2202 = vmatpush.bf16.msra.mxu2 %v3550_v15 }
 0x363   :  { %v1588_v7 = vadd.f32 %v1569_v1, %v1340_v49  ;;  %v1545_v9 = vpop.f32.mrf.mxu0  ;;  %v1558_v4 = vpop.f32.mrf.mxu1  ;;  %v1589_v36 = vadd.f32 %v1582_v2, %v1341_v32 }
 0x364   :  { %v3911_v4 = vld [vmem:[#allocation7 + $0xec] sm:$0xf0] }
 0x365   :  { %v3295_v18 = vmul.f32 -1.442695, %v1588_v7 }
 0x366   :  { %v4018_v22 = vpop.eup %4017 }
 0x367   :  { %v4020_v24 = vpop.eup %4019  ;;  %v1593_v26 = vadd.f32 1.0, %v4018_v22  ;;  %4021 = vpow2.f32 %v3295_v18  ;;  %v3554_v18 = vor.u32 %v3910_v16, %v3551_v17  ;;  %v3526_v22 = vor.u32 %v3907_v20, %v3525_v19 }
 0x368   :  { %v1612_v28 = vadd.f32 1.0, %v4020_v24  ;;  %v3533_v24 = vld [vmem:[#allocation7 + $0xc8] sm:$0xf]  ;;  %v3462_v17 = vor.u32 %v3891_v13, %v3461_v8 }
 0x369   :  { %4023 = vrcp.f32 %v1593_v26  ;;  %v1605_v40 = vand.u32 2147483648, %v1593_v26  ;;  %v1603_v43 = vand.u32 2147483647, %v1593_v26  ;;  %vm1599_vm2 = vweird.f32 %v1593_v26  ;;  %2215 = vmatpush.bf16.msra.mxu3 %v3554_v18  ;;  %v3463_v18 = vld [vmem:[#allocation7 + $0x50] sm:$0xf0] }
 0x36a   :  { %4025 = vrcp.f32 %v1612_v28  ;;  %v1571_v30 = vpop.f32.mrf.mxu2  ;;  %v1584_v31 = vpop.f32.mrf.mxu3  ;;  %v1624_v44 = vand.u32 2147483648, %v1612_v28  ;;  %v1622_v41 = vand.u32 2147483647, %v1612_v28  ;;  %vm1618_vm4 = vweird.f32 %v1612_v28 }
 0x36b   :  { %v1606_v48 = vor.u32 1.1754944e-38, %v1605_v40  ;;  %vm1604_vm5 = vcmp.eq.f32.partialorder %v1603_v43, 8.507059e+37  ;;  %v3906_v30 = vld [vmem:[#allocation7 + $0xcc] sm:$0xf]  ;;  %v3535_v31 = vld [vmem:[#allocation7 + $0xd8] sm:$0xf0]  ;;  %v3466_v20 = vor.u32 %v3889_v14, %v3463_v18 }
 0x36c   :  { %v1625_v52 = vor.u32 1.1754944e-38, %v1624_v44  ;;  %vm1623_vm7 = vcmp.eq.f32.partialorder %v1622_v41, 8.507059e+37  ;;  %v3538_v32 = vor.u32 %v3906_v30, %v3535_v31  ;;  %v1657_v43 = vld [vmem:[#allocation4 + $0x50] sm:$0xff] }
 0x36d   :  { %v4022_v33 = vpop.eup %4021  ;;  %v3899_v41 = vld [vmem:[#allocation7 + $0x8c] sm:$0xf0] }
 0x36e   :  { %v1631_v35 = vadd.f32 1.0, %v4022_v33  ;;  %v3509_v33 = vld [vmem:[#allocation7 + $0xa0] sm:$0xf]  ;;  %2216 = vmatpush.bf16.msra.mxu3 %v3538_v32  ;;  %v3885_v32 = vld [vmem:[#allocation7 + $0x24] sm:$0xf] }
 0x36f   :  { %v4024_v55 = vpop.eup %4023 }
 0x370   :  { %v4026_v37 = vpop.eup %4025  ;;  %v1595_v38 = vmul.f32 %v4024_v55, %v1593_v26  ;;  %4027 = vrcp.f32 %v1631_v35  ;;  %vm1600_vm0 = vweird.f32 %v4024_v55  ;;  %v1643_v1 = vand.u32 2147483648, %v1631_v35  ;;  %v3908_v26 = vld [vmem:[#allocation7 + $0xd4] sm:$0xf0] }
 0x371   :  { %v1614_v59 = vmul.f32 %v4026_v37, %v1612_v28  ;;  %4029 = vtanh.f32 %v1589_v36  ;;  %vm1619_vm1 = vweird.f32 %v4026_v37  ;;  %vm1601_vm3 = vmor %vm1599_vm2, %vm1600_vm0  ;;  %vm1637_vm9 = vweird.f32 %v1631_v35 }
 0x372   :  { %v1596_v39 = vsub.f32 1.0, %v1595_v38  ;;  %vm1620_vm6 = vmor %vm1618_vm4, %vm1619_vm1  ;;  %v1641_v2 = vand.u32 2147483647, %v1631_v35  ;;  %v1644_v5 = vor.u32 1.1754944e-38, %v1643_v1  ;;  %v3534_v28 = vor.u32 %v3908_v26, %v3533_v24  ;;  %v3517_v38 = vld [vmem:[#allocation7 + $0xa8] sm:$0xf] }
 0x373   :  { %v1615_v42 = vsub.f32 1.0, %v1614_v59  ;;  %v3904_v59 = vld [vmem:[#allocation7 + $0xb4] sm:$0xf0]  ;;  %v3479_v1 = vld [vmem:[#allocation7 + $0x70] sm:$0xf0] }
 0x374   :  { %v1597_v34 = vmul.f32 %v4024_v55, %v1596_v39  ;;  %vm1642_vm11 = vcmp.eq.f32.partialorder %v1641_v2, 8.507059e+37  ;;  %2203 = vmatpush.bf16.msra.mxu2 %v3534_v28  ;;  %v3518_v40 = vor.u32 %v3904_v59, %v3517_v38  ;;  %v3485_v2 = vld [vmem:[#allocation7 + $0x68] sm:$0xf]  ;;  %v3471_v26 = vld [vmem:[#allocation7 + $0x58] sm:$0xf0] }
 0x375   :  { %v1616_v45 = vmul.f32 %v4026_v37, %v1615_v42  ;;  %v3902_v42 = vld [vmem:[#allocation7 + $0xac] sm:$0xf]  ;;  %v3887_v28 = vld [vmem:[#allocation7 + $0x2c] sm:$0xf0]  ;;  %v3474_v30 = vor.u32 %v3890_v23, %v3471_v26  ;;  %v3888_v38 = vld [vmem:[#allocation7 + $0x34] sm:$0xf0] }
 0x376   :  { %v4028_v46 = vpop.eup %4027  ;;  %v1598_v47 = vadd.f32 %v4024_v55, %v1597_v34  ;;  %v3519_v34 = vld [vmem:[#allocation7 + $0xb8] sm:$0xf0]  ;;  %v3446_v31 = vor.u32 %v3887_v28, %v3445_v27  ;;  %v3886_v59 = vld [vmem:[#allocation7 + $0x2c] sm:$0xf] }
 0x377   :  { %v1633_v49 = vmul.f32 %v4028_v46, %v1631_v35  ;;  %v1617_v50 = vadd.f32 %v4026_v37, %v1616_v45  ;;  %v4030_v53 = vpop.eup %4029  ;;  %vm1638_vm8 = vweird.f32 %v4028_v46  ;;  %v3903_v35 = vld [vmem:[#allocation7 + $0xac] sm:$0xf0]  ;;  %v3522_v44 = vor.u32 %v3902_v42, %v3519_v34  ;;  %v3493_v45 = vld [vmem:[#allocation7 + $0x80] sm:$0xf] }
 0x378   :  { %v1602_v51 = vsel %vm1601_vm3, %v4024_v55, %v1598_v47  ;;  %vm1639_vm10 = vmor %vm1637_vm9, %vm1638_vm8  ;;  %v3901_v55 = vld [vmem:[#allocation7 + $0xa4] sm:$0xf]  ;;  %v3510_v36 = vor.u32 %v3903_v35, %v3509_v33  ;;  %2204 = vmatpush.bf16.msra.mxu2 %v3518_v40  ;;  %v3494_v47 = vor.u32 %v3899_v41, %v3493_v45  ;;  %v3447_v33 = vld [vmem:[#allocation7 + $0x30] sm:$0xf0] }
 0x379   :  { %v1634_v54 = vsub.f32 1.0, %v1633_v49  ;;  %v1607_v56 = vsel %vm1604_vm5, %v1606_v48, %v1602_v51  ;;  %v1621_v57 = vsel %vm1620_vm6, %v4026_v37, %v1617_v50  ;;  %v3511_v37 = vld [vmem:[#allocation7 + $0xb0] sm:$0xf0]  ;;  %2217 = vmatpush.bf16.msra.mxu3 %v3522_v44  ;;  %v3501_v49 = vld [vmem:[#allocation7 + $0x88] sm:$0xf] }
 0x37a   :  { %v1626_v58 = vsel %vm1623_vm7, %v1625_v52, %v1621_v57  ;;  %v1649_v60 = vmul.f32 %v1607_v56, %v4216_v29  ;;  %v3541_v29 = vld [vmem:[#allocation7 + $0xe0] sm:$0xf]  ;;  %v3514_v39 = vor.u32 %v3901_v55, %v3511_v37  ;;  %v3495_v48 = vld [vmem:[#allocation7 + $0x90] sm:$0xf0]  ;;  %v3900_v50 = vld [vmem:[#allocation7 + $0x94] sm:$0xf0]  ;;  %v1659_v56 = vunpack.c.l.bf16 %v1657_v43 }
 0x37b   :  { %v1635_v61 = vmul.f32 %v4028_v46, %v1634_v54  ;;  %v1648_v62 = vmul.f32 %v4030_v53, %v1626_v58  ;;  %v3542_v11 = vor.u32 %v3911_v4, %v3541_v29  ;;  %v3502_v52 = vor.u32 %v3900_v50, %v3501_v49  ;;  %v3898_v53 = vld [vmem:[#allocation7 + $0x8c] sm:$0xf]  ;;  %v3503_v54 = vld [vmem:[#allocation7 + $0x98] sm:$0xf0]  ;;  %v3453_v35 = vld [vmem:[#allocation7 + $0x28] sm:$0xf] }
 0x37c   :  { %2191 = vmatpush.bf16.msra.mxu1 %v3514_v39  ;;  %v1660_v57 = vunpack.c.h.bf16 %v1657_v43  ;;  %v3506_v58 = vor.u32 %v3898_v53, %v3503_v54  ;;  %v3487_v29 = vld [vmem:[#allocation7 + $0x78] sm:$0xf0]  ;;  %v3450_v37 = vor.u32 %v3885_v32, %v3447_v33  ;;  %v3454_v43 = vor.u32 %v3888_v38, %v3453_v35  ;;  %v3429_v45 = vld [vmem:[#allocation7] sm:$0xf]  ;;  %v3883_v41 = vld [vmem:[#allocation7 + $0xc] sm:$0xf0] }
 0x37d   :  { %v4224_v63 = vadd.f32 %v1649_v60, %v1648_v62  ;;  %v1636_v0 = vadd.f32 %v4028_v46, %v1635_v61  ;;  %2176 = vmatpush.bf16.msra.mxu0 %v3542_v11  ;;  %2205 = vmatpush.bf16.msra.mxu2 %v3502_v52  ;;  %v3477_v60 = vld [vmem:[#allocation7 + $0x60] sm:$0xf]  ;;  %v3895_v61 = vld [vmem:[#allocation7 + $0x6c] sm:$0xf0]  ;;  %v3893_v62 = vld [vmem:[#allocation7 + $0x64] sm:$0xf] }
 0x37e   :  { %2218 = vmatpush.bf16.msra.mxu3 %v3506_v58  ;;  %v4227_v11 = vld [vmem:[#allocation4 + $0x58] sm:$0xff]  ;;  %v3437_v49 = vld [vmem:[#allocation7 + $0x8] sm:$0xf]  ;;  %v3882_v53 = vld [vmem:[#allocation7 + $0xc] sm:$0xf] }
 0x37f   :  { %4031 = vtanh.f32 %v4224_v63  ;;  %v1640_v3 = vsel %vm1639_vm10, %v4028_v46, %v1636_v0  ;;  %v3897_v46 = vld [vmem:[#allocation7 + $0x84] sm:$0xf]  ;;  %v3478_v0 = vor.u32 %v3895_v61, %v3477_v60  ;;  %v1661_v19 = vunpack.c.l.bf16 %v4227_v11  ;;  %v3455_v39 = vld [vmem:[#allocation7 + $0x38] sm:$0xf0]  ;;  %v3884_v50 = vld [vmem:[#allocation7 + $0x14] sm:$0xf0] }
 0x380   :  { %v1645_v6 = vsel %vm1642_vm11, %v1644_v5, %v1640_v3  ;;  %v3498_v51 = vor.u32 %v3897_v46, %v3495_v48  ;;  %v3896_v3 = vld [vmem:[#allocation7 + $0x74] sm:$0xf0]  ;;  %v3458_v44 = vor.u32 %v3886_v59, %v3455_v39  ;;  %v3881_v46 = vld [vmem:[#allocation7 + $0x4] sm:$0xf]  ;;  %v3431_v48 = vld [vmem:[#allocation7 + $0x10] sm:$0xf0] }
 0x381   :  { %2177 = vmatpush.bf16.msra.mxu0 %v3526_v22  ;;  %v3892_v22 = vld [vmem:[#allocation7 + $0x54] sm:$0xf0]  ;;  %v3434_v52 = vor.u32 %v3881_v46, %v3431_v48  ;;  %v3439_v54 = vld [vmem:[#allocation7 + $0x18] sm:$0xf0] }
 0x382   :  { %2192 = vmatpush.bf16.msra.mxu1 %v3498_v51  ;;  %v3470_v24 = vor.u32 %v3892_v22, %v3469_v21  ;;  %v3442_v61 = vor.u32 %v3882_v53, %v3439_v54  ;;  %v3944_v46 = vld [vmem:[#allocation7 + $0xf4] sm:$0xf0]  ;;  %v3939_v53 = vld [vmem:[#allocation7 + $0xcc] sm:$0xf0]  ;;  %v3937_v54 = vld [vmem:[#allocation7 + $0xc4] sm:$0xf] }
 0x385   :  { %v4032_v25 = vpop.eup %4031  ;;  %2178 = vmatpush.bf16.msra.mxu0 %v3510_v36 }
 0x386   :  { %v1652_v7 = vmul.f32 %v4032_v25, %v1645_v6  ;;  %v3482_v6 = vor.u32 %v3893_v62, %v3479_v1 }
 0x388   :  { %v1653_v9 = vpack.c.bf16 %v1652_v7, %v1652_v7  ;;  %v3486_v7 = vor.u32 %v3896_v3, %v3485_v2  ;;  %2193 = vmatpush.bf16.msra.mxu1 %v3482_v6  ;;  %v1662_v2 = vunpack.c.h.bf16 %v4227_v11 }
 0x389   :  { %2179 = vmatpush.bf16.msra.mxu0 %v3494_v47  ;;  %v3430_v47 = vor.u32 %v3883_v41, %v3429_v45  ;;  %v3674_v45 = vld [vmem:[#allocation7 + $0xf0] sm:$0xf0]  ;;  %v3680_v41 = vld [vmem:[#allocation7 + $0xe8] sm:$0xf] }
 0x38a   :  { %1655 = vst [vmem:[#allocation9 + $0x10] sm:$0xf] %v1653_v9  ;;  %1863 = vmatmul.bf16.vlgmr.msrb.gmra.mxu0 %v1653_v9  ;;  %1876 = vmatmul.bf16.vlgmr.msrb.gmra.mxu1 %v1653_v9  ;;  %v3681_v48 = vor.u32 %v3944_v46, %v3680_v41  ;;  %v3592_v41 = vld [vmem:[#allocation7 + $0x40] sm:$0xf]  ;;  %v3923_v46 = vld [vmem:[#allocation7 + $0x4c] sm:$0xf0] }
 0x38b   :  { %1889 = vmatmul.bf16.vlgmr.msrb.gmra.mxu2 %v1653_v9  ;;  %1902 = vmatmul.bf16.vlgmr.msrb.gmra.mxu3 %v1653_v9  ;;  %v3894_v9 = vld [vmem:[#allocation7 + $0x6c] sm:$0xf] }
 0x38c   :  { %v3490_v12 = vor.u32 %v3894_v9, %v3487_v29  ;;  %2206 = vmatpush.bf16.msra.mxu2 %v3486_v7  ;;  %2194 = vmatpush.bf16.msra.mxu1 %v3466_v20 }
 0x38d   :  { %2180 = vmatpush.bf16.msra.mxu0 %v3478_v0 }
 0x38e   :  { %2219 = vmatpush.bf16.msra.mxu3 %v3490_v12 }
 0x390   :  { %2207 = vmatpush.bf16.msra.mxu2 %v3470_v24  ;;  %2195 = vmatpush.bf16.msra.mxu1 %v3450_v37 }
 0x391   :  { %2181 = vmatpush.bf16.msra.mxu0 %v3462_v17 }
 0x392   :  { %2220 = vmatpush.bf16.msra.mxu3 %v3474_v30 }
 0x394   :  { %2208 = vmatpush.bf16.msra.mxu2 %v3454_v43  ;;  %2196 = vmatpush.bf16.msra.mxu1 %v3434_v52  ;;  %v3941_v43 = vld [vmem:[#allocation7 + $0xe4] sm:$0xf]  ;;  %v3656_v52 = vld [vmem:[#allocation7 + $0xc0] sm:$0xf] }
 0x395   :  { %2182 = vmatpush.bf16.msra.mxu0 %v3446_v31 }
 0x396   :  { %2221 = vmatpush.bf16.msra.mxu3 %v3458_v44 }
 0x399   :  { %2183 = vmatpush.bf16.msra.mxu0 %v3430_v47  ;;  %v3677_v47 = vor.u32 %v3941_v43, %v3674_v45 }
 0x39a   :  { %2222 = vmatpush.bf16.msra.mxu3 %v3442_v61 }
 0x39b   :  { %2510 = vmatpush.bf16.msrb.mxu1 %v3677_v47  ;;  %v3921_v47 = vld [vmem:[#allocation7 + $0x44] sm:$0xf] }
 0x407   :  { %v1864_v5 = vpop.f32.mrf.mxu0  ;;  %v1877_v25 = vpop.f32.mrf.mxu1 }
 0x408   :  { %v1907_v4 = vadd.f32 %v1864_v5, %v1659_v56  ;;  %v1908_v10 = vadd.f32 %v1877_v25, %v1660_v57  ;;  %v3438_v57 = vor.u32 %v3884_v50, %v3437_v49  ;;  %v3942_v49 = vld [vmem:[#allocation7 + $0xec] sm:$0xf]  ;;  %v3682_v50 = vld [vmem:[#allocation7 + $0xf8] sm:$0xf0] }
 0x40a   :  { %v3424_v15 = vmul.f32 -1.442695, %v1907_v4  ;;  %v3425_v16 = vmul.f32 -1.442695, %v1908_v10  ;;  %2209 = vmatpush.bf16.msra.mxu2 %v3438_v57  ;;  %v3658_v57 = vld [vmem:[#allocation7 + $0xd0] sm:$0xf0] }
 0x40b   :  { %v3661_v61 = vor.u32 %v3937_v54, %v3658_v57  ;;  %v3600_v54 = vld [vmem:[#allocation7 + $0x48] sm:$0xf]  ;;  %v3922_v57 = vld [vmem:[#allocation7 + $0x4c] sm:$0xf] }
 0x40c   :  { %4033 = vpow2.f32 %v3424_v15 }
 0x40d   :  { %4035 = vpow2.f32 %v3425_v16  ;;  %2511 = vmatpush.bf16.msrb.mxu1 %v3661_v61  ;;  %v3576_v61 = vld [vmem:[#allocation7 + $0x20] sm:$0xf] }
 0x40e   :  { %v1890_v55 = vpop.f32.mrf.mxu2  ;;  %v1903_v36 = vpop.f32.mrf.mxu3  ;;  %2523 = vmatpush.bf16.msrb.mxu2 %v3681_v48 }
 0x40f   :  { %v1909_v40 = vadd.f32 %v1890_v55, %v1661_v19  ;;  %v1866_v42 = vpop.f32.mrf.mxu0  ;;  %v1879_v34 = vpop.f32.mrf.mxu1  ;;  %v1910_v6 = vadd.f32 %v1903_v36, %v1662_v2 }
 0x410   :  { %v3943_v34 = vld [vmem:[#allocation7 + $0xec] sm:$0xf0] }
 0x411   :  { %v3426_v51 = vmul.f32 -1.442695, %v1909_v40 }
 0x412   :  { %v4034_v56 = vpop.eup %4033 }
 0x413   :  { %v4036_v58 = vpop.eup %4035  ;;  %v1914_v60 = vadd.f32 1.0, %v4034_v56  ;;  %4037 = vpow2.f32 %v3426_v51  ;;  %v3685_v51 = vor.u32 %v3942_v49, %v3682_v50  ;;  %v3657_v56 = vor.u32 %v3939_v53, %v3656_v52 }
 0x414   :  { %v1933_v62 = vadd.f32 1.0, %v4036_v58  ;;  %v3664_v58 = vld [vmem:[#allocation7 + $0xc8] sm:$0xf]  ;;  %v3593_v50 = vor.u32 %v3923_v46, %v3592_v41 }
 0x415   :  { %4039 = vrcp.f32 %v1914_v60  ;;  %v1926_v10 = vand.u32 2147483648, %v1914_v60  ;;  %v1924_v13 = vand.u32 2147483647, %v1914_v60  ;;  %vm1920_vm14 = vweird.f32 %v1914_v60  ;;  %2536 = vmatpush.bf16.msrb.mxu3 %v3685_v51  ;;  %v3594_v51 = vld [vmem:[#allocation7 + $0x50] sm:$0xf0] }
 0x416   :  { %4041 = vrcp.f32 %v1933_v62  ;;  %v1892_v0 = vpop.f32.mrf.mxu2  ;;  %v1905_v1 = vpop.f32.mrf.mxu3  ;;  %v1945_v14 = vand.u32 2147483648, %v1933_v62  ;;  %v1943_v11 = vand.u32 2147483647, %v1933_v62  ;;  %vm1939_vm0 = vweird.f32 %v1933_v62 }
 0x417   :  { %v1927_v18 = vor.u32 1.1754944e-38, %v1926_v10  ;;  %vm1925_vm1 = vcmp.eq.f32.partialorder %v1924_v13, 8.507059e+37  ;;  %v3938_v0 = vld [vmem:[#allocation7 + $0xcc] sm:$0xf]  ;;  %v3666_v1 = vld [vmem:[#allocation7 + $0xd8] sm:$0xf0]  ;;  %v3597_v53 = vor.u32 %v3921_v47, %v3594_v51 }
 0x418   :  { %v1946_v22 = vor.u32 1.1754944e-38, %v1945_v14  ;;  %vm1944_vm3 = vcmp.eq.f32.partialorder %v1943_v11, 8.507059e+37  ;;  %v3669_v2 = vor.u32 %v3938_v0, %v3666_v1  ;;  %v1978_v13 = vld [vmem:[#allocation4 + $0x60] sm:$0xff]  ;;  %v3931_v11 = vld [vmem:[#allocation7 + $0x8c] sm:$0xf0] }
 0x419   :  { %v4038_v3 = vpop.eup %4037 }
 0x41a   :  { %v1952_v5 = vadd.f32 1.0, %v4038_v3  ;;  %v3640_v3 = vld [vmem:[#allocation7 + $0xa0] sm:$0xf]  ;;  %2537 = vmatpush.bf16.msrb.mxu3 %v3669_v2  ;;  %v3917_v2 = vld [vmem:[#allocation7 + $0x24] sm:$0xf] }
 0x41b   :  { %v4040_v25 = vpop.eup %4039 }
 0x41c   :  { %v4042_v7 = vpop.eup %4041  ;;  %v1916_v9 = vmul.f32 %v4040_v25, %v1914_v60  ;;  %4043 = vrcp.f32 %v1952_v5  ;;  %vm1921_vm12 = vweird.f32 %v4040_v25  ;;  %v1964_v55 = vand.u32 2147483648, %v1952_v5  ;;  %v3940_v60 = vld [vmem:[#allocation7 + $0xd4] sm:$0xf0] }
 0x41d   :  { %v1935_v29 = vmul.f32 %v4042_v7, %v1933_v62  ;;  %4045 = vtanh.f32 %v1910_v6  ;;  %vm1940_vm13 = vweird.f32 %v4042_v7  ;;  %vm1922_vm15 = vmor %vm1920_vm14, %vm1921_vm12  ;;  %vm1958_vm5 = vweird.f32 %v1952_v5 }
 0x41e   :  { %v1917_v4 = vsub.f32 1.0, %v1916_v9  ;;  %vm1941_vm2 = vmor %vm1939_vm0, %vm1940_vm13  ;;  %v1962_v36 = vand.u32 2147483647, %v1952_v5  ;;  %v1965_v38 = vor.u32 1.1754944e-38, %v1964_v55  ;;  %v3665_v62 = vor.u32 %v3940_v60, %v3664_v58  ;;  %v3648_v9 = vld [vmem:[#allocation7 + $0xa8] sm:$0xf] }
 0x41f   :  { %v1936_v12 = vsub.f32 1.0, %v1935_v29  ;;  %v3936_v29 = vld [vmem:[#allocation7 + $0xb4] sm:$0xf0]  ;;  %v3610_v55 = vld [vmem:[#allocation7 + $0x70] sm:$0xf0] }
 0x420   :  { %v1918_v8 = vmul.f32 %v4040_v25, %v1917_v4  ;;  %vm1963_vm7 = vcmp.eq.f32.partialorder %v1962_v36, 8.507059e+37  ;;  %2524 = vmatpush.bf16.msrb.mxu2 %v3665_v62  ;;  %v3649_v10 = vor.u32 %v3936_v29, %v3648_v9  ;;  %v3616_v36 = vld [vmem:[#allocation7 + $0x68] sm:$0xf]  ;;  %v3602_v60 = vld [vmem:[#allocation7 + $0x58] sm:$0xf0] }
 0x421   :  { %v1937_v15 = vmul.f32 %v4042_v7, %v1936_v12  ;;  %v3934_v12 = vld [vmem:[#allocation7 + $0xac] sm:$0xf]  ;;  %v3919_v62 = vld [vmem:[#allocation7 + $0x2c] sm:$0xf0]  ;;  %v3605_v0 = vor.u32 %v3922_v57, %v3602_v60  ;;  %v3920_v9 = vld [vmem:[#allocation7 + $0x34] sm:$0xf0] }
 0x422   :  { %v4044_v16 = vpop.eup %4043  ;;  %v1919_v17 = vadd.f32 %v4040_v25, %v1918_v8  ;;  %v3650_v8 = vld [vmem:[#allocation7 + $0xb8] sm:$0xf0]  ;;  %v3577_v1 = vor.u32 %v3919_v62, %v3576_v61  ;;  %v3918_v29 = vld [vmem:[#allocation7 + $0x2c] sm:$0xf] }
 0x423   :  { %v1954_v19 = vmul.f32 %v4044_v16, %v1952_v5  ;;  %v1938_v20 = vadd.f32 %v4042_v7, %v1937_v15  ;;  %v4046_v23 = vpop.eup %4045  ;;  %vm1959_vm4 = vweird.f32 %v4044_v16  ;;  %v3935_v5 = vld [vmem:[#allocation7 + $0xac] sm:$0xf0]  ;;  %v3653_v14 = vor.u32 %v3934_v12, %v3650_v8  ;;  %v3624_v15 = vld [vmem:[#allocation7 + $0x80] sm:$0xf] }
 0x424   :  { %v1923_v21 = vsel %vm1922_vm15, %v4040_v25, %v1919_v17  ;;  %vm1960_vm6 = vmor %vm1958_vm5, %vm1959_vm4  ;;  %v3933_v25 = vld [vmem:[#allocation7 + $0xa4] sm:$0xf]  ;;  %v3641_v6 = vor.u32 %v3935_v5, %v3640_v3  ;;  %2525 = vmatpush.bf16.msrb.mxu2 %v3649_v10  ;;  %v3625_v17 = vor.u32 %v3931_v11, %v3624_v15  ;;  %v3578_v3 = vld [vmem:[#allocation7 + $0x30] sm:$0xf0] }
 0x425   :  { %v1955_v24 = vsub.f32 1.0, %v1954_v19  ;;  %v1928_v26 = vsel %vm1925_vm1, %v1927_v18, %v1923_v21  ;;  %v1942_v27 = vsel %vm1941_vm2, %v4042_v7, %v1938_v20  ;;  %v3642_v7 = vld [vmem:[#allocation7 + $0xb0] sm:$0xf0]  ;;  %2538 = vmatpush.bf16.msrb.mxu3 %v3653_v14  ;;  %v3632_v19 = vld [vmem:[#allocation7 + $0x88] sm:$0xf] }
 0x426   :  { %v1947_v28 = vsel %vm1944_vm3, %v1946_v22, %v1942_v27  ;;  %v1970_v30 = vmul.f32 %v1928_v26, %v4224_v63  ;;  %v3672_v63 = vld [vmem:[#allocation7 + $0xe0] sm:$0xf]  ;;  %v3645_v4 = vor.u32 %v3933_v25, %v3642_v7  ;;  %v3626_v18 = vld [vmem:[#allocation7 + $0x90] sm:$0xf0]  ;;  %v3932_v20 = vld [vmem:[#allocation7 + $0x94] sm:$0xf0]  ;;  %v1980_v26 = vunpack.c.l.bf16 %v1978_v13 }
 0x427   :  { %v1956_v31 = vmul.f32 %v4044_v16, %v1955_v24  ;;  %v1969_v32 = vmul.f32 %v4046_v23, %v1947_v28  ;;  %v3673_v44 = vor.u32 %v3943_v34, %v3672_v63  ;;  %v3633_v22 = vor.u32 %v3932_v20, %v3632_v19  ;;  %v3930_v23 = vld [vmem:[#allocation7 + $0x8c] sm:$0xf]  ;;  %v3634_v24 = vld [vmem:[#allocation7 + $0x98] sm:$0xf0]  ;;  %v3584_v5 = vld [vmem:[#allocation7 + $0x28] sm:$0xf] }
 0x428   :  { %2512 = vmatpush.bf16.msrb.mxu1 %v3645_v4  ;;  %v1981_v27 = vunpack.c.h.bf16 %v1978_v13  ;;  %v3637_v28 = vor.u32 %v3930_v23, %v3634_v24  ;;  %v3618_v63 = vld [vmem:[#allocation7 + $0x78] sm:$0xf0]  ;;  %v3581_v7 = vor.u32 %v3917_v2, %v3578_v3  ;;  %v3585_v13 = vor.u32 %v3920_v9, %v3584_v5  ;;  %v3560_v15 = vld [vmem:[#allocation7] sm:$0xf]  ;;  %v3915_v11 = vld [vmem:[#allocation7 + $0xc] sm:$0xf0] }
 0x429   :  { %v4232_v33 = vadd.f32 %v1970_v30, %v1969_v32  ;;  %v1957_v35 = vadd.f32 %v4044_v16, %v1956_v31  ;;  %2497 = vmatpush.bf16.msrb.mxu0 %v3673_v44  ;;  %2526 = vmatpush.bf16.msrb.mxu2 %v3633_v22  ;;  %v3608_v30 = vld [vmem:[#allocation7 + $0x60] sm:$0xf]  ;;  %v3927_v31 = vld [vmem:[#allocation7 + $0x6c] sm:$0xf0]  ;;  %v3925_v32 = vld [vmem:[#allocation7 + $0x64] sm:$0xf] }
 0x42a   :  { %2539 = vmatpush.bf16.msrb.mxu3 %v3637_v28  ;;  %v4235_v44 = vld [vmem:[#allocation4 + $0x68] sm:$0xff]  ;;  %v3586_v4 = vld [vmem:[#allocation7 + $0x38] sm:$0xf0]  ;;  %v3916_v20 = vld [vmem:[#allocation7 + $0x14] sm:$0xf0] }
 0x42b   :  { %4047 = vtanh.f32 %v4232_v33  ;;  %v1961_v37 = vsel %vm1960_vm6, %v4044_v16, %v1957_v35  ;;  %v3929_v16 = vld [vmem:[#allocation7 + $0x84] sm:$0xf]  ;;  %v3609_v35 = vor.u32 %v3927_v31, %v3608_v30  ;;  %v1982_v52 = vunpack.c.l.bf16 %v4235_v44  ;;  %v3568_v19 = vld [vmem:[#allocation7 + $0x8] sm:$0xf]  ;;  %v3914_v23 = vld [vmem:[#allocation7 + $0xc] sm:$0xf] }
 0x42c   :  { %v1966_v39 = vsel %vm1963_vm7, %v1965_v38, %v1961_v37  ;;  %v3629_v21 = vor.u32 %v3929_v16, %v3626_v18  ;;  %v3928_v37 = vld [vmem:[#allocation7 + $0x74] sm:$0xf0]  ;;  %v3589_v14 = vor.u32 %v3918_v29, %v3586_v4  ;;  %v3913_v16 = vld [vmem:[#allocation7 + $0x4] sm:$0xf]  ;;  %v3562_v18 = vld [vmem:[#allocation7 + $0x10] sm:$0xf0] }
 0x42d   :  { %2498 = vmatpush.bf16.msrb.mxu0 %v3657_v56  ;;  %v3924_v56 = vld [vmem:[#allocation7 + $0x54] sm:$0xf0]  ;;  %v3565_v22 = vor.u32 %v3913_v16, %v3562_v18  ;;  %v3570_v24 = vld [vmem:[#allocation7 + $0x18] sm:$0xf0] }
 0x42e   :  { %2513 = vmatpush.bf16.msrb.mxu1 %v3629_v21  ;;  %v3601_v58 = vor.u32 %v3924_v56, %v3600_v54  ;;  %v3573_v31 = vor.u32 %v3914_v23, %v3570_v24 }
 0x431   :  { %v4048_v59 = vpop.eup %4047  ;;  %2499 = vmatpush.bf16.msrb.mxu0 %v3641_v6 }
 0x432   :  { %v1973_v40 = vmul.f32 %v4048_v59, %v1966_v39  ;;  %v3613_v39 = vor.u32 %v3925_v32, %v3610_v55 }
 0x434   :  { %v1974_v42 = vpack.c.bf16 %v1973_v40, %v1973_v40  ;;  %v3617_v40 = vor.u32 %v3928_v37, %v3616_v36  ;;  %2514 = vmatpush.bf16.msrb.mxu1 %v3613_v39  ;;  %v1983_v36 = vunpack.c.h.bf16 %v4235_v44 }
 0x435   :  { %2500 = vmatpush.bf16.msrb.mxu0 %v3625_v17  ;;  %v3561_v17 = vor.u32 %v3915_v11, %v3560_v15 }
 0x436   :  { %1976 = vst [vmem:[#allocation9 + $0x14] sm:$0xf] %v1974_v42  ;;  %2184 = vmatmul.bf16.vlgmr.msra.gmra.mxu0 %v1974_v42  ;;  %2197 = vmatmul.bf16.vlgmr.msra.gmra.mxu1 %v1974_v42 }
 0x437   :  { %2210 = vmatmul.bf16.vlgmr.msra.gmra.mxu2 %v1974_v42  ;;  %2223 = vmatmul.bf16.vlgmr.msra.gmra.mxu3 %v1974_v42  ;;  %v3926_v42 = vld [vmem:[#allocation7 + $0x6c] sm:$0xf] }
 0x438   :  { %v3621_v45 = vor.u32 %v3926_v42, %v3618_v63  ;;  %2527 = vmatpush.bf16.msrb.mxu2 %v3617_v40  ;;  %2515 = vmatpush.bf16.msrb.mxu1 %v3597_v53 }
 0x439   :  { %2501 = vmatpush.bf16.msrb.mxu0 %v3609_v35 }
 0x43a   :  { %2540 = vmatpush.bf16.msrb.mxu3 %v3621_v45 }
 0x43c   :  { %2528 = vmatpush.bf16.msrb.mxu2 %v3601_v58  ;;  %2516 = vmatpush.bf16.msrb.mxu1 %v3581_v7 }
 0x43d   :  { %2502 = vmatpush.bf16.msrb.mxu0 %v3593_v50 }
 0x43e   :  { %2541 = vmatpush.bf16.msrb.mxu3 %v3605_v0 }
 0x440   :  { %2529 = vmatpush.bf16.msrb.mxu2 %v3585_v13  ;;  %2517 = vmatpush.bf16.msrb.mxu1 %v3565_v22 }
 0x441   :  { %2503 = vmatpush.bf16.msrb.mxu0 %v3577_v1 }
 0x442   :  { %2542 = vmatpush.bf16.msrb.mxu3 %v3589_v14 }
 0x445   :  { %2504 = vmatpush.bf16.msrb.mxu0 %v3561_v17  ;;  %v2300_v17 = vld [vmem:[#allocation4 + $0x78] sm:$0xff] }
 0x446   :  { %2543 = vmatpush.bf16.msrb.mxu3 %v3573_v31 }
 0x4b3   :  { %v2185_v38 = vpop.f32.mrf.mxu0  ;;  %v2198_v59 = vpop.f32.mrf.mxu1 }
 0x4b4   :  { %v2228_v34 = vadd.f32 %v2185_v38, %v1980_v26  ;;  %v2229_v43 = vadd.f32 %v2198_v59, %v1981_v27  ;;  %v3569_v27 = vor.u32 %v3916_v20, %v3568_v19  ;;  %v2303_v20 = vunpack.c.l.bf16 %v2300_v17 }
 0x4b6   :  { %v3555_v48 = vmul.f32 -1.442695, %v2228_v34  ;;  %v3556_v49 = vmul.f32 -1.442695, %v2229_v43  ;;  %2530 = vmatpush.bf16.msrb.mxu2 %v3569_v27 }
 0x4b8   :  { %4049 = vpow2.f32 %v3555_v48 }
 0x4b9   :  { %4051 = vpow2.f32 %v3556_v49 }
 0x4ba   :  { %v2211_v25 = vpop.f32.mrf.mxu2  ;;  %v2224_v6 = vpop.f32.mrf.mxu3 }
 0x4bb   :  { %v2230_v10 = vadd.f32 %v2211_v25, %v1982_v52  ;;  %v2187_v12 = vpop.f32.mrf.mxu0  ;;  %v2200_v8 = vpop.f32.mrf.mxu1  ;;  %v2231_v39 = vadd.f32 %v2224_v6, %v1983_v36  ;;  %v2304_v36 = vunpack.c.h.bf16 %v2300_v17 }
 0x4bd   :  { %v3557_v21 = vmul.f32 -1.442695, %v2230_v10 }
 0x4be   :  { %v4050_v26 = vpop.eup %4049 }
 0x4bf   :  { %v4052_v28 = vpop.eup %4051  ;;  %v2235_v30 = vadd.f32 1.0, %v4050_v26  ;;  %4053 = vpow2.f32 %v3557_v21 }
 0x4c0   :  { %v2254_v32 = vadd.f32 1.0, %v4052_v28 }
 0x4c1   :  { %4055 = vrcp.f32 %v2235_v30  ;;  %v2247_v43 = vand.u32 2147483648, %v2235_v30  ;;  %v2245_v46 = vand.u32 2147483647, %v2235_v30  ;;  %vm2241_vm10 = vweird.f32 %v2235_v30 }
 0x4c2   :  { %4057 = vrcp.f32 %v2254_v32  ;;  %v2213_v35 = vpop.f32.mrf.mxu2  ;;  %v2226_v55 = vpop.f32.mrf.mxu3  ;;  %v2266_v47 = vand.u32 2147483648, %v2254_v32  ;;  %v2264_v44 = vand.u32 2147483647, %v2254_v32  ;;  %vm2260_vm12 = vweird.f32 %v2254_v32 }
 0x4c3   :  { %v2248_v51 = vor.u32 1.1754944e-38, %v2247_v43  ;;  %vm2246_vm13 = vcmp.eq.f32.partialorder %v2245_v46, 8.507059e+37 }
 0x4c4   :  { %v2267_v56 = vor.u32 1.1754944e-38, %v2266_v47  ;;  %vm2265_vm15 = vcmp.eq.f32.partialorder %v2264_v44, 8.507059e+37 }
 0x4c5   :  { %v4054_v37 = vpop.eup %4053 }
 0x4c6   :  { %v2273_v38 = vadd.f32 1.0, %v4054_v37 }
 0x4c7   :  { %v4056_v59 = vpop.eup %4055 }
 0x4c8   :  { %v4058_v40 = vpop.eup %4057  ;;  %v2237_v42 = vmul.f32 %v4056_v59, %v2235_v30  ;;  %4059 = vrcp.f32 %v2273_v38  ;;  %vm2242_vm8 = vweird.f32 %v4056_v59  ;;  %v2285_v25 = vand.u32 2147483648, %v2273_v38 }
 0x4c9   :  { %v2256_v63 = vmul.f32 %v4058_v40, %v2254_v32  ;;  %4061 = vtanh.f32 %v2231_v39  ;;  %vm2261_vm9 = vweird.f32 %v4058_v40  ;;  %vm2243_vm11 = vmor %vm2241_vm10, %vm2242_vm8  ;;  %vm2279_vm1 = vweird.f32 %v2273_v38 }
 0x4ca   :  { %v2238_v34 = vsub.f32 1.0, %v2237_v42  ;;  %vm2262_vm14 = vmor %vm2260_vm12, %vm2261_vm9  ;;  %v2283_v6 = vand.u32 2147483647, %v2273_v38  ;;  %v2286_v9 = vor.u32 1.1754944e-38, %v2285_v25 }
 0x4cb   :  { %v2257_v45 = vsub.f32 1.0, %v2256_v63 }
 0x4cc   :  { %v2239_v41 = vmul.f32 %v4056_v59, %v2238_v34  ;;  %vm2284_vm3 = vcmp.eq.f32.partialorder %v2283_v6, 8.507059e+37 }
 0x4cd   :  { %v2258_v48 = vmul.f32 %v4058_v40, %v2257_v45 }
 0x4ce   :  { %v4060_v49 = vpop.eup %4059  ;;  %v2240_v50 = vadd.f32 %v4056_v59, %v2239_v41 }
 0x4cf   :  { %v2275_v52 = vmul.f32 %v4060_v49, %v2273_v38  ;;  %v2259_v53 = vadd.f32 %v4058_v40, %v2258_v48  ;;  %v4062_v57 = vpop.eup %4061  ;;  %vm2280_vm0 = vweird.f32 %v4060_v49 }
 0x4d0   :  { %v2244_v54 = vsel %vm2243_vm11, %v4056_v59, %v2240_v50  ;;  %vm2281_vm2 = vmor %vm2279_vm1, %vm2280_vm0 }
 0x4d1   :  { %v2276_v58 = vsub.f32 1.0, %v2275_v52  ;;  %v2249_v60 = vsel %vm2246_vm13, %v2248_v51, %v2244_v54  ;;  %v2263_v61 = vsel %vm2262_vm14, %v4058_v40, %v2259_v53 }
 0x4d2   :  { %v2268_v62 = vsel %vm2265_vm15, %v2267_v56, %v2263_v61  ;;  %v2291_v0 = vmul.f32 %v2249_v60, %v4232_v33  ;;  %v2299_v33 = vld [vmem:[#allocation4 + $0x70] sm:$0xff] }
 0x4d3   :  { %v2277_v1 = vmul.f32 %v4060_v49, %v2276_v58  ;;  %v2290_v2 = vmul.f32 %v4062_v57, %v2268_v62  ;;  %v2301_v8 = vunpack.c.l.bf16 %v2299_v33  ;;  %v2302_v13 = vunpack.c.h.bf16 %v2299_v33 }
 0x4d5   :  { %v4240_v3 = vadd.f32 %v2291_v0, %v2290_v2  ;;  %v2278_v5 = vadd.f32 %v4060_v49, %v2277_v1 }
 0x4d7   :  { %4063 = vtanh.f32 %v4240_v3  ;;  %v2282_v7 = vsel %vm2281_vm2, %v4060_v49, %v2278_v5 }
 0x4d8   :  { %v2287_v4 = vsel %vm2284_vm3, %v2286_v9, %v2282_v7 }
 0x4dd   :  { %v4064_v29 = vpop.eup %4063 }
 0x4de   :  { %v2294_v10 = vmul.f32 %v4064_v29, %v2287_v4 }
 0x4e0   :  { %v2295_v12 = vpack.c.bf16 %v2294_v10, %v2294_v10 }
 0x4e2   :  { %2297 = vst [vmem:[#allocation9 + $0x18] sm:$0xf] %v2295_v12  ;;  %2505 = vmatmul.bf16.vlgmr.msrb.gmra.mxu0 %v2295_v12  ;;  %2518 = vmatmul.bf16.vlgmr.msrb.gmra.mxu1 %v2295_v12 }
 0x4e3   :  { %2531 = vmatmul.bf16.vlgmr.msrb.gmra.mxu2 %v2295_v12  ;;  %2544 = vmatmul.bf16.vlgmr.msrb.gmra.mxu3 %v2295_v12 }
 0x55f   :  { %v2506_v14 = vpop.f32.mrf.mxu0  ;;  %v2519_v15 = vpop.f32.mrf.mxu1 }
 0x560   :  { %v2549_v11 = vadd.f32 %v2506_v14, %v2301_v8  ;;  %v2550_v16 = vadd.f32 %v2519_v15, %v2302_v13 }
 0x562   :  { %v3686_v18 = vmul.f32 -1.442695, %v2549_v11  ;;  %v3687_v19 = vmul.f32 -1.442695, %v2550_v16 }
 0x564   :  { %4065 = vpow2.f32 %v3686_v18 }
 0x565   :  { %4067 = vpow2.f32 %v3687_v19 }
 0x566   :  { %v2532_v21 = vpop.f32.mrf.mxu2  ;;  %v2545_v22 = vpop.f32.mrf.mxu3 }
 0x567   :  { %v2551_v23 = vadd.f32 %v2532_v21, %v2303_v20  ;;  %v2508_v24 = vpop.f32.mrf.mxu0  ;;  %v2521_v26 = vpop.f32.mrf.mxu1  ;;  %v2552_v39 = vadd.f32 %v2545_v22, %v2304_v36 }
 0x569   :  { %v3688_v27 = vmul.f32 -1.442695, %v2551_v23 }
 0x56a   :  { %v4066_v28 = vpop.eup %4065 }
 0x56b   :  { %v4068_v30 = vpop.eup %4067  ;;  %v2556_v31 = vadd.f32 1.0, %v4066_v28  ;;  %4069 = vpow2.f32 %v3688_v27 }
 0x56c   :  { %v2575_v32 = vadd.f32 1.0, %v4068_v30 }
 0x56d   :  { %4071 = vrcp.f32 %v2556_v31  ;;  %v2568_v43 = vand.u32 2147483648, %v2556_v31  ;;  %v2566_v46 = vand.u32 2147483647, %v2556_v31  ;;  %vm2562_vm6 = vweird.f32 %v2556_v31 }
 0x56e   :  { %4073 = vrcp.f32 %v2575_v32  ;;  %v2534_v35 = vpop.f32.mrf.mxu2  ;;  %v2547_v55 = vpop.f32.mrf.mxu3  ;;  %v2587_v47 = vand.u32 2147483648, %v2575_v32  ;;  %v2585_v44 = vand.u32 2147483647, %v2575_v32  ;;  %vm2581_vm8 = vweird.f32 %v2575_v32 }
 0x56f   :  { %v2569_v51 = vor.u32 1.1754944e-38, %v2568_v43  ;;  %vm2567_vm9 = vcmp.eq.f32.partialorder %v2566_v46, 8.507059e+37 }
 0x570   :  { %v2588_v56 = vor.u32 1.1754944e-38, %v2587_v47  ;;  %vm2586_vm11 = vcmp.eq.f32.partialorder %v2585_v44, 8.507059e+37 }
 0x571   :  { %v4070_v37 = vpop.eup %4069 }
 0x572   :  { %v2594_v38 = vadd.f32 1.0, %v4070_v37 }
 0x573   :  { %v4072_v59 = vpop.eup %4071 }
 0x574   :  { %v4074_v40 = vpop.eup %4073  ;;  %v2558_v42 = vmul.f32 %v4072_v59, %v2556_v31  ;;  %4075 = vrcp.f32 %v2594_v38  ;;  %vm2563_vm4 = vweird.f32 %v4072_v59  ;;  %v2606_v6 = vand.u32 2147483648, %v2594_v38 }
 0x575   :  { %v2577_v63 = vmul.f32 %v4074_v40, %v2575_v32  ;;  %4077 = vtanh.f32 %v2552_v39  ;;  %vm2582_vm5 = vweird.f32 %v4074_v40  ;;  %vm2564_vm7 = vmor %vm2562_vm6, %vm2563_vm4  ;;  %vm2600_vm13 = vweird.f32 %v2594_v38 }
 0x576   :  { %v2559_v34 = vsub.f32 1.0, %v2558_v42  ;;  %vm2583_vm10 = vmor %vm2581_vm8, %vm2582_vm5  ;;  %v2604_v7 = vand.u32 2147483647, %v2594_v38  ;;  %v2607_v29 = vor.u32 1.1754944e-38, %v2606_v6 }
 0x577   :  { %v2578_v45 = vsub.f32 1.0, %v2577_v63 }
 0x578   :  { %v2560_v41 = vmul.f32 %v4072_v59, %v2559_v34  ;;  %vm2605_vm15 = vcmp.eq.f32.partialorder %v2604_v7, 8.507059e+37 }
 0x579   :  { %v2579_v48 = vmul.f32 %v4074_v40, %v2578_v45 }
 0x57a   :  { %v4076_v49 = vpop.eup %4075  ;;  %v2561_v50 = vadd.f32 %v4072_v59, %v2560_v41 }
 0x57b   :  { %v2596_v52 = vmul.f32 %v4076_v49, %v2594_v38  ;;  %v2580_v53 = vadd.f32 %v4074_v40, %v2579_v48  ;;  %v4078_v57 = vpop.eup %4077  ;;  %vm2601_vm12 = vweird.f32 %v4076_v49 }
 0x57c   :  { %v2565_v54 = vsel %vm2564_vm7, %v4072_v59, %v2561_v50  ;;  %vm2602_vm14 = vmor %vm2600_vm13, %vm2601_vm12 }
 0x57d   :  { %v2597_v58 = vsub.f32 1.0, %v2596_v52  ;;  %v2570_v60 = vsel %vm2567_vm9, %v2569_v51, %v2565_v54  ;;  %v2584_v61 = vsel %vm2583_vm10, %v4074_v40, %v2580_v53 }
 0x57e   :  { %v2589_v62 = vsel %vm2586_vm11, %v2588_v56, %v2584_v61  ;;  %v2612_v0 = vmul.f32 %v2570_v60, %v4240_v3 }
 0x57f   :  { %v2598_v1 = vmul.f32 %v4076_v49, %v2597_v58  ;;  %v2611_v2 = vmul.f32 %v4078_v57, %v2589_v62 }
 0x581   :  { %v2613_v5 = vadd.f32 %v2612_v0, %v2611_v2  ;;  %v2599_v25 = vadd.f32 %v4076_v49, %v2598_v1 }
 0x583   :  { %4079 = vtanh.f32 %v2613_v5  ;;  %v2603_v9 = vsel %vm2602_vm14, %v4076_v49, %v2599_v25 }
 0x584   :  { %v2608_v4 = vsel %vm2605_vm15, %v2607_v29, %v2603_v9 }
 0x589   :  { %v4080_v3 = vpop.eup %4079 }
 0x58a   :  { %v2615_v10 = vmul.f32 %v4080_v3, %v2608_v4 }
 0x58c   :  { %v2616_v12 = vpack.c.bf16 %v2615_v10, %v2615_v10 }
 0x58e   :  { %2618 = vst [vmem:[#allocation9 + $0x1c] sm:$0xf] %v2616_v12 }
 0x58f   :  { %2633 = dma.vmem_to_hbm [thread:$0]  %s2626_s1, 512, %s2628_s23, [#allocation6], %s4165_s24, %s4165_s24, %s4166_s25  }
 0x590   :  { %4157 = dma.done.wait [#allocation6], 512  }
 0x591   :  { %4158 = vsyncadd [#allocation6], 4294966784 }
 0x592   :  { %2638 = vsyncpa [#allocation5], 1 }
 0x593   :  { %2639 = vsyncpa [#allocation8], 1 }
 0x594   :  { %2640 = vsyncpa [#allocation6], 1 }

</bundles_post_ra>
